<compile_context>
chip_gen: v7x
topology: tpu7x:2x2x1
jax: 0.10.0
libtpu: 0.0.40
codegen_flags: <defaults>
</compile_context>

<pallas_src>
import functools
import math

import jax
import jax.numpy as jnp
from jax.experimental import pallas as pl
from jax.experimental.pallas import tpu as pltpu


def _layer_norm(x, gamma, beta, eps=1e-5):
    mu = jnp.mean(x, axis=-1, keepdims=True)
    xc = x - mu
    var = jnp.mean(xc * xc, axis=-1, keepdims=True)
    inv = jax.lax.rsqrt(var + eps)
    return xc * inv * gamma + beta


def encoder_layer_kernel(x_ref, wqkv_ref, bqkv_ref, wo_ref, bo_ref,
                         w1_ref, b1_ref, w2_ref, b2_ref,
                         g1_ref, be1_ref, g2_ref, be2_ref,
                         o_ref, *, num_heads, kv_block):
    xb = x_ref[...]                               # (Bt, S, D) f32
    Bt, S, D = xb.shape
    hd = D // num_heads
    M = Bt * S
    x2 = xb.reshape(M, D)

    # --- QKV projection: one bf16 MXU matmul over M = Bt*S rows, f32 acc ---
    # (1/sqrt(hd) is already folded into the q columns of wqkv/bqkv.)
    qkv = jnp.dot(x2.astype(jnp.bfloat16), wqkv_ref[...],
                  preferred_element_type=jnp.float32) + bqkv_ref[...]

    def to_heads(t):                              # (M, D) -> (Bt*H, S, hd) bf16
        t4 = t.reshape(Bt, S, num_heads, hd)
        t4 = pltpu.einshape("bshd->bhsd", t4)     # single XLU relayout
        return t4.reshape(Bt * num_heads, S, hd).astype(jnp.bfloat16)

    qh = to_heads(qkv[:, :D])
    kh = to_heads(qkv[:, D:2 * D])
    vh = to_heads(qkv[:, 2 * D:])

    if kv_block >= S:
        # Full-softmax path (small S): one batched score + one batched PV matmul.
        s = jnp.einsum("bqd,bkd->bqk", qh, kh, preferred_element_type=jnp.float32)
        s = s - jnp.max(s, axis=-1, keepdims=True)
        p = jnp.exp(s)
        p = p * pl.reciprocal(jnp.sum(p, axis=-1, keepdims=True), approx=True)
        o = jnp.einsum("bqk,bkd->bqd", p.astype(jnp.bfloat16), vh,
                       preferred_element_type=jnp.float32)
    else:
        # KV-tiled online softmax: bounds the live score tensor to (B*H, S, kv_block).
        nchunks = S // kv_block
        m_i = jnp.full((Bt * num_heads, S, 1), -jnp.inf, jnp.float32)
        l_i = jnp.zeros((Bt * num_heads, S, 1), jnp.float32)
        acc = jnp.zeros((Bt * num_heads, S, hd), jnp.float32)
        for c in range(nchunks):                  # static trip count
            kc = kh[:, c * kv_block:(c + 1) * kv_block, :]
            vc = vh[:, c * kv_block:(c + 1) * kv_block, :]
            s = jnp.einsum("bqd,bkd->bqk", qh, kc,
                           preferred_element_type=jnp.float32)
            m_new = jnp.maximum(m_i, jnp.max(s, axis=-1, keepdims=True))
            alpha = jnp.exp(m_i - m_new)
            p = jnp.exp(s - m_new)
            l_i = alpha * l_i + jnp.sum(p, axis=-1, keepdims=True)
            acc = alpha * acc + jnp.einsum("bqk,bkd->bqd", p.astype(jnp.bfloat16),
                                           vc, preferred_element_type=jnp.float32)
            m_i = m_new
        o = acc * pl.reciprocal(l_i, approx=True)

    # Merge heads: one XLU relayout back instead of H lane-slice concatenations.
    o4 = o.reshape(Bt, num_heads, S, hd)
    o4 = pltpu.einshape("bhsd->bshd", o4)
    attn = o4.reshape(M, D)

    attn = jnp.dot(attn.astype(jnp.bfloat16), wo_ref[...],
                   preferred_element_type=jnp.float32) + bo_ref[...]

    y = _layer_norm(x2 + attn, g1_ref[...], be1_ref[...])

    # --- feed-forward: bf16 MXU matmuls over M rows, f32 activations ---
    h1 = jnp.dot(y.astype(jnp.bfloat16), w1_ref[...],
                 preferred_element_type=jnp.float32) + b1_ref[...]
    h1 = jnp.maximum(h1, 0.0)
    ff = jnp.dot(h1.astype(jnp.bfloat16), w2_ref[...],
                 preferred_element_type=jnp.float32) + b2_ref[...]

    z = _layer_norm(y + ff, g2_ref[...], be2_ref[...])
    o_ref[...] = z.reshape(Bt, S, D).astype(o_ref.dtype)


_PARAM_KEYS = ("wqkv", "bqkv", "wo", "bo", "w1", "b1", "w2", "b2",
               "g1", "be1", "g2", "be2")


def prepare_kernel_params(params, num_heads):
    """One-time weight prep: fold 1/sqrt(hd) into the q slice of wqkv/bqkv and
    pre-cast matmul weights to bf16 (no per-forward HBM f32->bf16 round trip)."""
    D = params["wqkv"].shape[0]
    hd = D // num_heads
    scale = jnp.concatenate([
        jnp.full((D,), 1.0 / math.sqrt(hd), jnp.float32),
        jnp.ones((2 * D,), jnp.float32)])
    out = dict(params)
    out["wqkv"] = (params["wqkv"] * scale[None, :]).astype(jnp.bfloat16)
    out["bqkv"] = params["bqkv"] * scale[None, :]
    for k in ("wo", "w1", "w2"):
        out[k] = params[k].astype(jnp.bfloat16)
    return out


def _choose_block_b(B, S, target_m=256):
    """Largest batch fold Bt (divisor of B) with Bt*S <= target_m, preferring
    >= 2 grid steps so both v7x TensorCores get work."""
    best = 1
    for bt in range(1, B + 1):
        if B % bt == 0 and bt * S <= max(target_m, S):
            best = bt
    if B // best < 2:
        for bt in range(best - 1, 0, -1):
            if B % bt == 0 and B // bt >= 2:
                best = bt
                break
    return best


def _vmem_limit_bytes(Bt, S, D, F, H, kv_block):
    bf16, f32 = 2, 4
    weights = (3 * D * D + D * D + 2 * D * F) * bf16      # single-buffered (Buffered(1))
    biases = (3 * D + 2 * D + F + 4 * D) * f32
    io = 2 * 2 * Bt * S * D * f32                          # double-buffered x + out blocks
    M = Bt * S
    inter = (M * 3 * D + M * F + 4 * M * D) * f32 \
        + Bt * H * S * kv_block * f32 \
        + 3 * Bt * H * S * (D // H) * bf16
    est = weights + biases + io + inter
    return int(min(64 << 20, max(32 << 20, 2 * est)))      # 64 MiB = v7x physical VMEM


def encoder_layer_pallas(x_bsd, kparams, num_heads, kv_block=512):
    """x_bsd: (B, S, D) float32.  One transformer encoder layer (batch-first)."""
    B, S, D = x_bsd.shape
    F = kparams["w1"].shape[1]
    Bt = _choose_block_b(B, S)
    kvb = kv_block if (S > kv_block and S % kv_block == 0) else S

    flat = [kparams[k] for k in _PARAM_KEYS]

    def const_spec(a):
        zeros = (0,) * a.ndim
        # Constant-index weights: single-buffered -> half the weight VMEM footprint.
        return pl.BlockSpec(a.shape, lambda b, _z=zeros: _z,
                            pipeline_mode=pl.Buffered(1))

    in_specs = ([pl.BlockSpec((Bt, S, D), lambda b: (b, 0, 0))]
                + [const_spec(a) for a in flat])

    return pl.pallas_call(
        functools.partial(encoder_layer_kernel, num_heads=num_heads, kv_block=kvb),
        out_shape=jax.ShapeDtypeStruct((B, S, D), jnp.float32),
        grid=(B // Bt,),
        in_specs=in_specs,
        out_specs=pl.BlockSpec((Bt, S, D), lambda b: (b, 0, 0)),
        compiler_params=pltpu.CompilerParams(
            dimension_semantics=("parallel",),
            vmem_limit_bytes=_vmem_limit_bytes(Bt, S, D, F, num_heads, kvb)),
    )(x_bsd, *flat)


def make_encoder_params(key, d_model, dim_ff):
    ks = jax.random.split(key, 6)
    init = lambda k, shape: (0.02 * jax.random.normal(k, shape)).astype(jnp.float32)
    return {
        "wqkv": init(ks[0], (d_model, 3 * d_model)),
        "bqkv": jnp.zeros((1, 3 * d_model), jnp.float32),
        "wo":   init(ks[1], (d_model, d_model)),
        "bo":   jnp.zeros((1, d_model), jnp.float32),
        "w1":   init(ks[2], (d_model, dim_ff)),
        "b1":   jnp.zeros((1, dim_ff), jnp.float32),
        "w2":   init(ks[3], (dim_ff, d_model)),
        "b2":   jnp.zeros((1, d_model), jnp.float32),
        "g1":   jnp.ones((1, d_model), jnp.float32),
        "be1":  jnp.zeros((1, d_model), jnp.float32),
        "g2":   jnp.ones((1, d_model), jnp.float32),
        "be2":  jnp.zeros((1, d_model), jnp.float32),
    }


def encoder_stack_forward(x_sbd, kernel_params_list, inp_lens, num_heads):
    """Mirrors EncoderStack.forward: x is [S, B, D]; returns [sum(S_i), B, D].

    The seq-first <-> batch-first transpose is hoisted: one in, one out for the
    whole stack.  kernel_params_list must come from prepare_kernel_params().
    """
    S = x_sbd.shape[0]
    x_bsd = jnp.transpose(x_sbd, (1, 0, 2))              # [S,B,D] -> [B,S,D], once
    outs = []
    for i_len, kparams in zip(inp_lens, kernel_params_list):
        inp_len = S // (2 ** i_len)
        x_slice = x_bsd[:, S - inp_len:, :]               # static tail slice (glue)
        outs.append(encoder_layer_pallas(x_slice, kparams, num_heads))
    y_bsd = jnp.concatenate(outs, axis=1)                 # cat along seq (batch-major)
    return jnp.transpose(y_bsd, (1, 0, 2))                # back to [S_total, B, D], once


def _reference_layer(x_bsd, p, num_heads):
    """Pure-JAX f32 reference of the same encoder layer (sanity check)."""
    B, S, D = x_bsd.shape
    hd = D // num_heads
    qkv = x_bsd @ p["wqkv"] + p["bqkv"]
    q, k, v = qkv[..., :D] / math.sqrt(hd), qkv[..., D:2 * D], qkv[..., 2 * D:]
    q = q.reshape(B, S, num_heads, hd).transpose(0, 2, 1, 3)
    k = k.reshape(B, S, num_heads, hd).transpose(0, 2, 1, 3)
    v = v.reshape(B, S, num_heads, hd).transpose(0, 2, 1, 3)
    s = jnp.einsum("bhqd,bhkd->bhqk", q, k)
    pattn = jax.nn.softmax(s, axis=-1)
    o = jnp.einsum("bhqk,bhkd->bhqd", pattn, v).transpose(0, 2, 1, 3).reshape(B, S, D)
    o = o @ p["wo"] + p["bo"]
    y = _layer_norm(x_bsd + o, p["g1"], p["be1"])
    ff = jnp.maximum(y @ p["w1"] + p["b1"], 0.0) @ p["w2"] + p["b2"]
    return _layer_norm(y + ff, p["g2"], p["be2"])


if __name__ == "__main__":
    # Small shapes consistent with the module's forward: x is [seq, batch, d_model].
    SEQ, BATCH, D_MODEL, N_HEADS, D_FF = 8, 2, 32, 4, 64
    inp_lens = (0, 1, 2)                     # slices of length 8, 4, 2 -> output seq = 14

    key = jax.random.PRNGKey(0)
    kx, kp = jax.random.split(key)
    x = jax.random.normal(kx, (SEQ, BATCH, D_MODEL), dtype=jnp.float32)

    enc_keys = jax.random.split(kp, len(inp_lens))
    encoder_params = [make_encoder_params(k, D_MODEL, D_FF) for k in enc_keys]
    # One-time weight prep (bf16 cast + q-scale fold) -- cached across forwards.
    kernel_params = [prepare_kernel_params(p, N_HEADS) for p in encoder_params]

    fwd = jax.jit(functools.partial(encoder_stack_forward,
                                    inp_lens=inp_lens, num_heads=N_HEADS))
    out = jax.block_until_ready(fwd(x, kernel_params))
    assert out.shape == (sum(SEQ // 2 ** i for i in inp_lens), BATCH, D_MODEL), out.shape

    # Sanity check against a pure-JAX f32 reference.  bf16 MXU operands +
    # approx reciprocal -> allow quantization-level tolerance.
    ref_outs = []
    for i_len, p in zip(inp_lens, encoder_params):
        inp_len = SEQ // 2 ** i_len
        xb = jnp.transpose(x[-inp_len:], (1, 0, 2))
        ref_outs.append(jnp.transpose(_reference_layer(xb, p, N_HEADS), (1, 0, 2)))
    ref = jnp.concatenate(ref_outs, axis=0)
    max_err = float(jnp.max(jnp.abs(out - ref)))
    assert max_err < 3e-2, max_err

    print("KERNEL_OK")
</pallas_src>

<mosaic_0001>
module attributes {stable_mosaic.version = 11 : i64} {
  func.func @encoder_layer_kernel(%arg0: i32, %arg1: memref<1x8x32xf32, #tpu.memory_space<vmem>>, %arg2: memref<32x96xbf16, #tpu.memory_space<vmem>>, %arg3: memref<1x96xf32, #tpu.memory_space<vmem>>, %arg4: memref<32x32xbf16, #tpu.memory_space<vmem>>, %arg5: memref<1x32xf32, #tpu.memory_space<vmem>>, %arg6: memref<32x64xbf16, #tpu.memory_space<vmem>>, %arg7: memref<1x64xf32, #tpu.memory_space<vmem>>, %arg8: memref<64x32xbf16, #tpu.memory_space<vmem>>, %arg9: memref<1x32xf32, #tpu.memory_space<vmem>>, %arg10: memref<1x32xf32, #tpu.memory_space<vmem>>, %arg11: memref<1x32xf32, #tpu.memory_space<vmem>>, %arg12: memref<1x32xf32, #tpu.memory_space<vmem>>, %arg13: memref<1x32xf32, #tpu.memory_space<vmem>>, %arg14: memref<1x8x32xf32, #tpu.memory_space<vmem>>) attributes {dimension_semantics = [#tpu.dimension_semantics<parallel>], iteration_bounds = array<i64: 2>, scalar_prefetch = 0 : i64, scratch_operands = 0 : i64, tpu.core_type = #tpu.core_type<tc>, window_params = [{transform_indices = @transform_0, window_bounds = array<i64: 1, 8, 32>}, {pipeline_mode = #tpu.pipeline_mode<synchronous>, transform_indices = @transform_1, window_bounds = array<i64: 32, 96>}, {pipeline_mode = #tpu.pipeline_mode<synchronous>, transform_indices = @transform_2, window_bounds = array<i64: 1, 96>}, {pipeline_mode = #tpu.pipeline_mode<synchronous>, transform_indices = @transform_3, window_bounds = array<i64: 32, 32>}, {pipeline_mode = #tpu.pipeline_mode<synchronous>, transform_indices = @transform_4, window_bounds = array<i64: 1, 32>}, {pipeline_mode = #tpu.pipeline_mode<synchronous>, transform_indices = @transform_5, window_bounds = array<i64: 32, 64>}, {pipeline_mode = #tpu.pipeline_mode<synchronous>, transform_indices = @transform_6, window_bounds = array<i64: 1, 64>}, {pipeline_mode = #tpu.pipeline_mode<synchronous>, transform_indices = @transform_7, window_bounds = array<i64: 64, 32>}, {pipeline_mode = #tpu.pipeline_mode<synchronous>, transform_indices = @transform_8, window_bounds = array<i64: 1, 32>}, {pipeline_mode = #tpu.pipeline_mode<synchronous>, transform_indices = @transform_9, window_bounds = array<i64: 1, 32>}, {pipeline_mode = #tpu.pipeline_mode<synchronous>, transform_indices = @transform_10, window_bounds = array<i64: 1, 32>}, {pipeline_mode = #tpu.pipeline_mode<synchronous>, transform_indices = @transform_11, window_bounds = array<i64: 1, 32>}, {pipeline_mode = #tpu.pipeline_mode<synchronous>, transform_indices = @transform_12, window_bounds = array<i64: 1, 32>}, {transform_indices = @transform_13, window_bounds = array<i64: 1, 8, 32>}]} {
    %c0 = arith.constant 0 : index
    %c0_0 = arith.constant 0 : index
    %c0_1 = arith.constant 0 : index
    %0 = vector.load %arg1[%c0, %c0_0, %c0_1] : memref<1x8x32xf32, #tpu.memory_space<vmem>>, vector<1x8x32xf32>
    %1 = vector.shape_cast %0 : vector<1x8x32xf32> to vector<8x32xf32>
    %2 = arith.truncf %1 : vector<8x32xf32> to vector<8x32xbf16>
    %c0_2 = arith.constant 0 : index
    %c0_3 = arith.constant 0 : index
    %3 = vector.load %arg2[%c0_2, %c0_3] : memref<32x96xbf16, #tpu.memory_space<vmem>>, vector<32x96xbf16>
    %cst = arith.constant dense<0.000000e+00> : vector<8x96xf32>
    %4 = tpu.matmul %2, %3, %cst {dimension_numbers = #tpu.dot_dimension_numbers<[1], [0], [0], [1], [0, 0, 1, 1], [], []>} : vector<8x32xbf16>, vector<32x96xbf16>, vector<8x96xf32> -> vector<8x96xf32>
    %c0_4 = arith.constant 0 : index
    %c0_5 = arith.constant 0 : index
    %5 = vector.load %arg3[%c0_4, %c0_5] : memref<1x96xf32, #tpu.memory_space<vmem>>, vector<1x96xf32>
    %6 = vector.broadcast %5 : vector<1x96xf32> to vector<8x96xf32>
    %7 = arith.addf %4, %6 : vector<8x96xf32>
    %8 = vector.extract_strided_slice %7 {offsets = [0, 0], sizes = [8, 32], strides = [1, 1]} : vector<8x96xf32> to vector<8x32xf32>
    %9 = vector.shape_cast %8 : vector<8x32xf32> to vector<1x8x4x8xf32>
    %10 = tpu.transpose %9, [0, 2, 1, 3] : vector<1x8x4x8xf32> -> vector<1x4x8x8xf32>
    %11 = vector.shape_cast %10 : vector<1x4x8x8xf32> to vector<4x8x8xf32>
    %12 = arith.truncf %11 : vector<4x8x8xf32> to vector<4x8x8xbf16>
    %13 = vector.extract_strided_slice %7 {offsets = [0, 32], sizes = [8, 32], strides = [1, 1]} : vector<8x96xf32> to vector<8x32xf32>
    %14 = vector.shape_cast %13 : vector<8x32xf32> to vector<1x8x4x8xf32>
    %15 = tpu.transpose %14, [0, 2, 1, 3] : vector<1x8x4x8xf32> -> vector<1x4x8x8xf32>
    %16 = vector.shape_cast %15 : vector<1x4x8x8xf32> to vector<4x8x8xf32>
    %17 = arith.truncf %16 : vector<4x8x8xf32> to vector<4x8x8xbf16>
    %18 = vector.extract_strided_slice %7 {offsets = [0, 64], sizes = [8, 32], strides = [1, 1]} : vector<8x96xf32> to vector<8x32xf32>
    %19 = vector.shape_cast %18 : vector<8x32xf32> to vector<1x8x4x8xf32>
    %20 = tpu.transpose %19, [0, 2, 1, 3] : vector<1x8x4x8xf32> -> vector<1x4x8x8xf32>
    %21 = vector.shape_cast %20 : vector<1x4x8x8xf32> to vector<4x8x8xf32>
    %22 = arith.truncf %21 : vector<4x8x8xf32> to vector<4x8x8xbf16>
    "tpu.trace_start"() <{level = 10 : i32, message = "bqd,bkd->bqk"}> : () -> ()
    %cst_6 = arith.constant dense<0.000000e+00> : vector<4x8x8xf32>
    %23 = tpu.matmul %12, %17, %cst_6 {dimension_numbers = #tpu.dot_dimension_numbers<[2], [2], [1], [1], [0, 0, 0, 1, 1, 1], [0], [0]>} : vector<4x8x8xbf16>, vector<4x8x8xbf16>, vector<4x8x8xf32> -> vector<4x8x8xf32>
    "tpu.trace_stop"() : () -> ()
    %cst_7 = arith.constant dense<0xFF800000> : vector<4x8xf32>
    %24 = vector.multi_reduction <maximumf>, %23, %cst_7 [2] : vector<4x8x8xf32> to vector<4x8xf32>
    %25 = vector.shape_cast %24 : vector<4x8xf32> to vector<4x8x1xf32>
    %26 = vector.broadcast %25 : vector<4x8x1xf32> to vector<4x8x8xf32>
    %27 = arith.subf %23, %26 : vector<4x8x8xf32>
    %28 = math.exp %27 : vector<4x8x8xf32>
    %cst_8 = arith.constant dense<0.000000e+00> : vector<4x8xf32>
    %29 = vector.multi_reduction <add>, %28, %cst_8 [2] : vector<4x8x8xf32> to vector<4x8xf32>
    %30 = vector.shape_cast %29 : vector<4x8xf32> to vector<4x8x1xf32>
    %31 = tpu.reciprocal %30 {approx = true} : vector<4x8x1xf32> -> vector<4x8x1xf32>
    %32 = vector.broadcast %31 : vector<4x8x1xf32> to vector<4x8x8xf32>
    %33 = arith.mulf %28, %32 : vector<4x8x8xf32>
    %34 = arith.truncf %33 : vector<4x8x8xf32> to vector<4x8x8xbf16>
    "tpu.trace_start"() <{level = 10 : i32, message = "bqk,bkd->bqd"}> : () -> ()
    %cst_9 = arith.constant dense<0.000000e+00> : vector<4x8x8xf32>
    %35 = tpu.matmul %34, %22, %cst_9 {dimension_numbers = #tpu.dot_dimension_numbers<[2], [1], [1], [2], [0, 0, 0, 1, 1, 2], [0], [0]>} : vector<4x8x8xbf16>, vector<4x8x8xbf16>, vector<4x8x8xf32> -> vector<4x8x8xf32>
    "tpu.trace_stop"() : () -> ()
    %36 = vector.shape_cast %35 : vector<4x8x8xf32> to vector<1x4x8x8xf32>
    %37 = tpu.transpose %36, [0, 2, 1, 3] : vector<1x4x8x8xf32> -> vector<1x8x4x8xf32>
    %38 = vector.shape_cast %37 : vector<1x8x4x8xf32> to vector<8x32xf32>
    %39 = arith.truncf %38 : vector<8x32xf32> to vector<8x32xbf16>
    %c0_10 = arith.constant 0 : index
    %c0_11 = arith.constant 0 : index
    %40 = vector.load %arg4[%c0_10, %c0_11] : memref<32x32xbf16, #tpu.memory_space<vmem>>, vector<32x32xbf16>
    %cst_12 = arith.constant dense<0.000000e+00> : vector<8x32xf32>
    %41 = tpu.matmul %39, %40, %cst_12 {dimension_numbers = #tpu.dot_dimension_numbers<[1], [0], [0], [1], [0, 0, 1, 1], [], []>} : vector<8x32xbf16>, vector<32x32xbf16>, vector<8x32xf32> -> vector<8x32xf32>
    %c0_13 = arith.constant 0 : index
    %c0_14 = arith.constant 0 : index
    %42 = vector.load %arg5[%c0_13, %c0_14] : memref<1x32xf32, #tpu.memory_space<vmem>>, vector<1x32xf32>
    %43 = vector.broadcast %42 : vector<1x32xf32> to vector<8x32xf32>
    %44 = arith.addf %41, %43 : vector<8x32xf32>
    %45 = arith.addf %1, %44 : vector<8x32xf32>
    %c0_15 = arith.constant 0 : index
    %c0_16 = arith.constant 0 : index
    %46 = vector.load %arg10[%c0_15, %c0_16] : memref<1x32xf32, #tpu.memory_space<vmem>>, vector<1x32xf32>
    %c0_17 = arith.constant 0 : index
    %c0_18 = arith.constant 0 : index
    %47 = vector.load %arg11[%c0_17, %c0_18] : memref<1x32xf32, #tpu.memory_space<vmem>>, vector<1x32xf32>
    %cst_19 = arith.constant dense<0.000000e+00> : vector<8xf32>
    %48 = vector.multi_reduction <add>, %45, %cst_19 [1] : vector<8x32xf32> to vector<8xf32>
    %49 = vector.shape_cast %48 : vector<8xf32> to vector<8x1xf32>
    %cst_20 = arith.constant 3.200000e+01 : f32
    %50 = vector.broadcast %cst_20 : f32 to vector<8x1xf32>
    %51 = arith.divf %49, %50 : vector<8x1xf32>
    %52 = vector.broadcast %51 : vector<8x1xf32> to vector<8x32xf32>
    %53 = arith.subf %45, %52 : vector<8x32xf32>
    %54 = arith.mulf %53, %53 : vector<8x32xf32>
    %cst_21 = arith.constant dense<0.000000e+00> : vector<8xf32>
    %55 = vector.multi_reduction <add>, %54, %cst_21 [1] : vector<8x32xf32> to vector<8xf32>
    %56 = vector.shape_cast %55 : vector<8xf32> to vector<8x1xf32>
    %cst_22 = arith.constant 3.200000e+01 : f32
    %57 = vector.broadcast %cst_22 : f32 to vector<8x1xf32>
    %58 = arith.divf %56, %57 : vector<8x1xf32>
    %cst_23 = arith.constant 9.99999974E-6 : f32
    %59 = vector.broadcast %cst_23 : f32 to vector<8x1xf32>
    %60 = arith.addf %58, %59 : vector<8x1xf32>
    %61 = math.rsqrt %60 : vector<8x1xf32>
    %62 = vector.broadcast %61 : vector<8x1xf32> to vector<8x32xf32>
    %63 = arith.mulf %53, %62 : vector<8x32xf32>
    %64 = vector.broadcast %46 : vector<1x32xf32> to vector<8x32xf32>
    %65 = arith.mulf %63, %64 : vector<8x32xf32>
    %66 = vector.broadcast %47 : vector<1x32xf32> to vector<8x32xf32>
    %67 = arith.addf %65, %66 : vector<8x32xf32>
    %68 = arith.truncf %67 : vector<8x32xf32> to vector<8x32xbf16>
    %c0_24 = arith.constant 0 : index
    %c0_25 = arith.constant 0 : index
    %69 = vector.load %arg6[%c0_24, %c0_25] : memref<32x64xbf16, #tpu.memory_space<vmem>>, vector<32x64xbf16>
    %cst_26 = arith.constant dense<0.000000e+00> : vector<8x64xf32>
    %70 = tpu.matmul %68, %69, %cst_26 {dimension_numbers = #tpu.dot_dimension_numbers<[1], [0], [0], [1], [0, 0, 1, 1], [], []>} : vector<8x32xbf16>, vector<32x64xbf16>, vector<8x64xf32> -> vector<8x64xf32>
    %c0_27 = arith.constant 0 : index
    %c0_28 = arith.constant 0 : index
    %71 = vector.load %arg7[%c0_27, %c0_28] : memref<1x64xf32, #tpu.memory_space<vmem>>, vector<1x64xf32>
    %72 = vector.broadcast %71 : vector<1x64xf32> to vector<8x64xf32>
    %73 = arith.addf %70, %72 : vector<8x64xf32>
    %cst_29 = arith.constant 0.000000e+00 : f32
    %74 = vector.broadcast %cst_29 : f32 to vector<8x64xf32>
    %75 = arith.maximumf %73, %74 : vector<8x64xf32>
    %76 = arith.truncf %75 : vector<8x64xf32> to vector<8x64xbf16>
    %c0_30 = arith.constant 0 : index
    %c0_31 = arith.constant 0 : index
    %77 = vector.load %arg8[%c0_30, %c0_31] : memref<64x32xbf16, #tpu.memory_space<vmem>>, vector<64x32xbf16>
    %cst_32 = arith.constant dense<0.000000e+00> : vector<8x32xf32>
    %78 = tpu.matmul %76, %77, %cst_32 {dimension_numbers = #tpu.dot_dimension_numbers<[1], [0], [0], [1], [0, 0, 1, 1], [], []>} : vector<8x64xbf16>, vector<64x32xbf16>, vector<8x32xf32> -> vector<8x32xf32>
    %c0_33 = arith.constant 0 : index
    %c0_34 = arith.constant 0 : index
    %79 = vector.load %arg9[%c0_33, %c0_34] : memref<1x32xf32, #tpu.memory_space<vmem>>, vector<1x32xf32>
    %80 = vector.broadcast %79 : vector<1x32xf32> to vector<8x32xf32>
    %81 = arith.addf %78, %80 : vector<8x32xf32>
    %82 = arith.addf %67, %81 : vector<8x32xf32>
    %c0_35 = arith.constant 0 : index
    %c0_36 = arith.constant 0 : index
    %83 = vector.load %arg12[%c0_35, %c0_36] : memref<1x32xf32, #tpu.memory_space<vmem>>, vector<1x32xf32>
    %c0_37 = arith.constant 0 : index
    %c0_38 = arith.constant 0 : index
    %84 = vector.load %arg13[%c0_37, %c0_38] : memref<1x32xf32, #tpu.memory_space<vmem>>, vector<1x32xf32>
    %cst_39 = arith.constant dense<0.000000e+00> : vector<8xf32>
    %85 = vector.multi_reduction <add>, %82, %cst_39 [1] : vector<8x32xf32> to vector<8xf32>
    %86 = vector.shape_cast %85 : vector<8xf32> to vector<8x1xf32>
    %cst_40 = arith.constant 3.200000e+01 : f32
    %87 = vector.broadcast %cst_40 : f32 to vector<8x1xf32>
    %88 = arith.divf %86, %87 : vector<8x1xf32>
    %89 = vector.broadcast %88 : vector<8x1xf32> to vector<8x32xf32>
    %90 = arith.subf %82, %89 : vector<8x32xf32>
    %91 = arith.mulf %90, %90 : vector<8x32xf32>
    %cst_41 = arith.constant dense<0.000000e+00> : vector<8xf32>
    %92 = vector.multi_reduction <add>, %91, %cst_41 [1] : vector<8x32xf32> to vector<8xf32>
    %93 = vector.shape_cast %92 : vector<8xf32> to vector<8x1xf32>
    %cst_42 = arith.constant 3.200000e+01 : f32
    %94 = vector.broadcast %cst_42 : f32 to vector<8x1xf32>
    %95 = arith.divf %93, %94 : vector<8x1xf32>
    %cst_43 = arith.constant 9.99999974E-6 : f32
    %96 = vector.broadcast %cst_43 : f32 to vector<8x1xf32>
    %97 = arith.addf %95, %96 : vector<8x1xf32>
    %98 = math.rsqrt %97 : vector<8x1xf32>
    %99 = vector.broadcast %98 : vector<8x1xf32> to vector<8x32xf32>
    %100 = arith.mulf %90, %99 : vector<8x32xf32>
    %101 = vector.broadcast %83 : vector<1x32xf32> to vector<8x32xf32>
    %102 = arith.mulf %100, %101 : vector<8x32xf32>
    %103 = vector.broadcast %84 : vector<1x32xf32> to vector<8x32xf32>
    %104 = arith.addf %102, %103 : vector<8x32xf32>
    %105 = vector.shape_cast %104 : vector<8x32xf32> to vector<1x8x32xf32>
    %c0_44 = arith.constant 0 : index
    %c0_45 = arith.constant 0 : index
    %c0_46 = arith.constant 0 : index
    %106 = vector.load %arg14[%c0_44, %c0_45, %c0_46] : memref<1x8x32xf32, #tpu.memory_space<vmem>>, vector<1x8x32xf32>
    tpu.vector_store %arg14[%c0_44, %c0_45, %c0_46], %105 {strides = array<i32>} : memref<1x8x32xf32, #tpu.memory_space<vmem>>, vector<1x8x32xf32>,
    return
  }
  func.func @transform_0(%arg0: i32) -> (i32, i32, i32) {
    %c0_i32 = arith.constant 0 : i32
    %c0_i32_0 = arith.constant 0 : i32
    %c0_i32_1 = arith.constant 0 : i32
    return %arg0, %c0_i32, %c0_i32_0 : i32, i32, i32
  }
  func.func @transform_1(%arg0: i32) -> (i32, i32) {
    %c0_i32 = arith.constant 0 : i32
    %c0_i32_0 = arith.constant 0 : i32
    %c0_i32_1 = arith.constant 0 : i32
    return %c0_i32, %c0_i32_0 : i32, i32
  }
  func.func @transform_2(%arg0: i32) -> (i32, i32) {
    %c0_i32 = arith.constant 0 : i32
    %c0_i32_0 = arith.constant 0 : i32
    %c0_i32_1 = arith.constant 0 : i32
    return %c0_i32, %c0_i32_0 : i32, i32
  }
  func.func @transform_3(%arg0: i32) -> (i32, i32) {
    %c0_i32 = arith.constant 0 : i32
    %c0_i32_0 = arith.constant 0 : i32
    %c0_i32_1 = arith.constant 0 : i32
    return %c0_i32, %c0_i32_0 : i32, i32
  }
  func.func @transform_4(%arg0: i32) -> (i32, i32) {
    %c0_i32 = arith.constant 0 : i32
    %c0_i32_0 = arith.constant 0 : i32
    %c0_i32_1 = arith.constant 0 : i32
    return %c0_i32, %c0_i32_0 : i32, i32
  }
  func.func @transform_5(%arg0: i32) -> (i32, i32) {
    %c0_i32 = arith.constant 0 : i32
    %c0_i32_0 = arith.constant 0 : i32
    %c0_i32_1 = arith.constant 0 : i32
    return %c0_i32, %c0_i32_0 : i32, i32
  }
  func.func @transform_6(%arg0: i32) -> (i32, i32) {
    %c0_i32 = arith.constant 0 : i32
    %c0_i32_0 = arith.constant 0 : i32
    %c0_i32_1 = arith.constant 0 : i32
    return %c0_i32, %c0_i32_0 : i32, i32
  }
  func.func @transform_7(%arg0: i32) -> (i32, i32) {
    %c0_i32 = arith.constant 0 : i32
    %c0_i32_0 = arith.constant 0 : i32
    %c0_i32_1 = arith.constant 0 : i32
    return %c0_i32, %c0_i32_0 : i32, i32
  }
  func.func @transform_8(%arg0: i32) -> (i32, i32) {
    %c0_i32 = arith.constant 0 : i32
    %c0_i32_0 = arith.constant 0 : i32
    %c0_i32_1 = arith.constant 0 : i32
    return %c0_i32, %c0_i32_0 : i32, i32
  }
  func.func @transform_9(%arg0: i32) -> (i32, i32) {
    %c0_i32 = arith.constant 0 : i32
    %c0_i32_0 = arith.constant 0 : i32
    %c0_i32_1 = arith.constant 0 : i32
    return %c0_i32, %c0_i32_0 : i32, i32
  }
  func.func @transform_10(%arg0: i32) -> (i32, i32) {
    %c0_i32 = arith.constant 0 : i32
    %c0_i32_0 = arith.constant 0 : i32
    %c0_i32_1 = arith.constant 0 : i32
    return %c0_i32, %c0_i32_0 : i32, i32
  }
  func.func @transform_11(%arg0: i32) -> (i32, i32) {
    %c0_i32 = arith.constant 0 : i32
    %c0_i32_0 = arith.constant 0 : i32
    %c0_i32_1 = arith.constant 0 : i32
    return %c0_i32, %c0_i32_0 : i32, i32
  }
  func.func @transform_12(%arg0: i32) -> (i32, i32) {
    %c0_i32 = arith.constant 0 : i32
    %c0_i32_0 = arith.constant 0 : i32
    %c0_i32_1 = arith.constant 0 : i32
    return %c0_i32, %c0_i32_0 : i32, i32
  }
  func.func @transform_13(%arg0: i32) -> (i32, i32, i32) {
    %c0_i32 = arith.constant 0 : i32
    %c0_i32_0 = arith.constant 0 : i32
    %c0_i32_1 = arith.constant 0 : i32
    return %arg0, %c0_i32, %c0_i32_0 : i32, i32, i32
  }
}

module attributes {stable_mosaic.version = 11 : i64} {
  func.func @encoder_layer_kernel(%arg0: i32, %arg1: memref<1x4x32xf32, #tpu.memory_space<vmem>>, %arg2: memref<32x96xbf16, #tpu.memory_space<vmem>>, %arg3: memref<1x96xf32, #tpu.memory_space<vmem>>, %arg4: memref<32x32xbf16, #tpu.memory_space<vmem>>, %arg5: memref<1x32xf32, #tpu.memory_space<vmem>>, %arg6: memref<32x64xbf16, #tpu.memory_space<vmem>>, %arg7: memref<1x64xf32, #tpu.memory_space<vmem>>, %arg8: memref<64x32xbf16, #tpu.memory_space<vmem>>, %arg9: memref<1x32xf32, #tpu.memory_space<vmem>>, %arg10: memref<1x32xf32, #tpu.memory_space<vmem>>, %arg11: memref<1x32xf32, #tpu.memory_space<vmem>>, %arg12: memref<1x32xf32, #tpu.memory_space<vmem>>, %arg13: memref<1x32xf32, #tpu.memory_space<vmem>>, %arg14: memref<1x4x32xf32, #tpu.memory_space<vmem>>) attributes {dimension_semantics = [#tpu.dimension_semantics<parallel>], iteration_bounds = array<i64: 2>, scalar_prefetch = 0 : i64, scratch_operands = 0 : i64, tpu.core_type = #tpu.core_type<tc>, window_params = [{transform_indices = @transform_0, window_bounds = array<i64: 1, 4, 32>}, {pipeline_mode = #tpu.pipeline_mode<synchronous>, transform_indices = @transform_1, window_bounds = array<i64: 32, 96>}, {pipeline_mode = #tpu.pipeline_mode<synchronous>, transform_indices = @transform_2, window_bounds = array<i64: 1, 96>}, {pipeline_mode = #tpu.pipeline_mode<synchronous>, transform_indices = @transform_3, window_bounds = array<i64: 32, 32>}, {pipeline_mode = #tpu.pipeline_mode<synchronous>, transform_indices = @transform_4, window_bounds = array<i64: 1, 32>}, {pipeline_mode = #tpu.pipeline_mode<synchronous>, transform_indices = @transform_5, window_bounds = array<i64: 32, 64>}, {pipeline_mode = #tpu.pipeline_mode<synchronous>, transform_indices = @transform_6, window_bounds = array<i64: 1, 64>}, {pipeline_mode = #tpu.pipeline_mode<synchronous>, transform_indices = @transform_7, window_bounds = array<i64: 64, 32>}, {pipeline_mode = #tpu.pipeline_mode<synchronous>, transform_indices = @transform_8, window_bounds = array<i64: 1, 32>}, {pipeline_mode = #tpu.pipeline_mode<synchronous>, transform_indices = @transform_9, window_bounds = array<i64: 1, 32>}, {pipeline_mode = #tpu.pipeline_mode<synchronous>, transform_indices = @transform_10, window_bounds = array<i64: 1, 32>}, {pipeline_mode = #tpu.pipeline_mode<synchronous>, transform_indices = @transform_11, window_bounds = array<i64: 1, 32>}, {pipeline_mode = #tpu.pipeline_mode<synchronous>, transform_indices = @transform_12, window_bounds = array<i64: 1, 32>}, {transform_indices = @transform_13, window_bounds = array<i64: 1, 4, 32>}]} {
    %c0 = arith.constant 0 : index
    %c0_0 = arith.constant 0 : index
    %c0_1 = arith.constant 0 : index
    %0 = vector.load %arg1[%c0, %c0_0, %c0_1] : memref<1x4x32xf32, #tpu.memory_space<vmem>>, vector<1x4x32xf32>
    %1 = vector.shape_cast %0 : vector<1x4x32xf32> to vector<4x32xf32>
    %2 = arith.truncf %1 : vector<4x32xf32> to vector<4x32xbf16>
    %c0_2 = arith.constant 0 : index
    %c0_3 = arith.constant 0 : index
    %3 = vector.load %arg2[%c0_2, %c0_3] : memref<32x96xbf16, #tpu.memory_space<vmem>>, vector<32x96xbf16>
    %cst = arith.constant dense<0.000000e+00> : vector<4x96xf32>
    %4 = tpu.matmul %2, %3, %cst {dimension_numbers = #tpu.dot_dimension_numbers<[1], [0], [0], [1], [0, 0, 1, 1], [], []>} : vector<4x32xbf16>, vector<32x96xbf16>, vector<4x96xf32> -> vector<4x96xf32>
    %c0_4 = arith.constant 0 : index
    %c0_5 = arith.constant 0 : index
    %5 = vector.load %arg3[%c0_4, %c0_5] : memref<1x96xf32, #tpu.memory_space<vmem>>, vector<1x96xf32>
    %6 = vector.broadcast %5 : vector<1x96xf32> to vector<4x96xf32>
    %7 = arith.addf %4, %6 : vector<4x96xf32>
    %8 = vector.extract_strided_slice %7 {offsets = [0, 0], sizes = [4, 32], strides = [1, 1]} : vector<4x96xf32> to vector<4x32xf32>
    %9 = vector.shape_cast %8 : vector<4x32xf32> to vector<1x4x4x8xf32>
    %10 = tpu.transpose %9, [0, 2, 1, 3] : vector<1x4x4x8xf32> -> vector<1x4x4x8xf32>
    %11 = vector.shape_cast %10 : vector<1x4x4x8xf32> to vector<4x4x8xf32>
    %12 = arith.truncf %11 : vector<4x4x8xf32> to vector<4x4x8xbf16>
    %13 = vector.extract_strided_slice %7 {offsets = [0, 32], sizes = [4, 32], strides = [1, 1]} : vector<4x96xf32> to vector<4x32xf32>
    %14 = vector.shape_cast %13 : vector<4x32xf32> to vector<1x4x4x8xf32>
    %15 = tpu.transpose %14, [0, 2, 1, 3] : vector<1x4x4x8xf32> -> vector<1x4x4x8xf32>
    %16 = vector.shape_cast %15 : vector<1x4x4x8xf32> to vector<4x4x8xf32>
    %17 = arith.truncf %16 : vector<4x4x8xf32> to vector<4x4x8xbf16>
    %18 = vector.extract_strided_slice %7 {offsets = [0, 64], sizes = [4, 32], strides = [1, 1]} : vector<4x96xf32> to vector<4x32xf32>
    %19 = vector.shape_cast %18 : vector<4x32xf32> to vector<1x4x4x8xf32>
    %20 = tpu.transpose %19, [0, 2, 1, 3] : vector<1x4x4x8xf32> -> vector<1x4x4x8xf32>
    %21 = vector.shape_cast %20 : vector<1x4x4x8xf32> to vector<4x4x8xf32>
    %22 = arith.truncf %21 : vector<4x4x8xf32> to vector<4x4x8xbf16>
    "tpu.trace_start"() <{level = 10 : i32, message = "bqd,bkd->bqk"}> : () -> ()
    %cst_6 = arith.constant dense<0.000000e+00> : vector<4x4x4xf32>
    %23 = tpu.matmul %12, %17, %cst_6 {dimension_numbers = #tpu.dot_dimension_numbers<[2], [2], [1], [1], [0, 0, 0, 1, 1, 1], [0], [0]>} : vector<4x4x8xbf16>, vector<4x4x8xbf16>, vector<4x4x4xf32> -> vector<4x4x4xf32>
    "tpu.trace_stop"() : () -> ()
    %cst_7 = arith.constant dense<0xFF800000> : vector<4x4xf32>
    %24 = vector.multi_reduction <maximumf>, %23, %cst_7 [2] : vector<4x4x4xf32> to vector<4x4xf32>
    %25 = vector.shape_cast %24 : vector<4x4xf32> to vector<4x4x1xf32>
    %26 = vector.broadcast %25 : vector<4x4x1xf32> to vector<4x4x4xf32>
    %27 = arith.subf %23, %26 : vector<4x4x4xf32>
    %28 = math.exp %27 : vector<4x4x4xf32>
    %cst_8 = arith.constant dense<0.000000e+00> : vector<4x4xf32>
    %29 = vector.multi_reduction <add>, %28, %cst_8 [2] : vector<4x4x4xf32> to vector<4x4xf32>
    %30 = vector.shape_cast %29 : vector<4x4xf32> to vector<4x4x1xf32>
    %31 = tpu.reciprocal %30 {approx = true} : vector<4x4x1xf32> -> vector<4x4x1xf32>
    %32 = vector.broadcast %31 : vector<4x4x1xf32> to vector<4x4x4xf32>
    %33 = arith.mulf %28, %32 : vector<4x4x4xf32>
    %34 = arith.truncf %33 : vector<4x4x4xf32> to vector<4x4x4xbf16>
    "tpu.trace_start"() <{level = 10 : i32, message = "bqk,bkd->bqd"}> : () -> ()
    %cst_9 = arith.constant dense<0.000000e+00> : vector<4x4x8xf32>
    %35 = tpu.matmul %34, %22, %cst_9 {dimension_numbers = #tpu.dot_dimension_numbers<[2], [1], [1], [2], [0, 0, 0, 1, 1, 2], [0], [0]>} : vector<4x4x4xbf16>, vector<4x4x8xbf16>, vector<4x4x8xf32> -> vector<4x4x8xf32>
    "tpu.trace_stop"() : () -> ()
    %36 = vector.shape_cast %35 : vector<4x4x8xf32> to vector<1x4x4x8xf32>
    %37 = tpu.transpose %36, [0, 2, 1, 3] : vector<1x4x4x8xf32> -> vector<1x4x4x8xf32>
    %38 = vector.shape_cast %37 : vector<1x4x4x8xf32> to vector<4x32xf32>
    %39 = arith.truncf %38 : vector<4x32xf32> to vector<4x32xbf16>
    %c0_10 = arith.constant 0 : index
    %c0_11 = arith.constant 0 : index
    %40 = vector.load %arg4[%c0_10, %c0_11] : memref<32x32xbf16, #tpu.memory_space<vmem>>, vector<32x32xbf16>
    %cst_12 = arith.constant dense<0.000000e+00> : vector<4x32xf32>
    %41 = tpu.matmul %39, %40, %cst_12 {dimension_numbers = #tpu.dot_dimension_numbers<[1], [0], [0], [1], [0, 0, 1, 1], [], []>} : vector<4x32xbf16>, vector<32x32xbf16>, vector<4x32xf32> -> vector<4x32xf32>
    %c0_13 = arith.constant 0 : index
    %c0_14 = arith.constant 0 : index
    %42 = vector.load %arg5[%c0_13, %c0_14] : memref<1x32xf32, #tpu.memory_space<vmem>>, vector<1x32xf32>
    %43 = vector.broadcast %42 : vector<1x32xf32> to vector<4x32xf32>
    %44 = arith.addf %41, %43 : vector<4x32xf32>
    %45 = arith.addf %1, %44 : vector<4x32xf32>
    %c0_15 = arith.constant 0 : index
    %c0_16 = arith.constant 0 : index
    %46 = vector.load %arg10[%c0_15, %c0_16] : memref<1x32xf32, #tpu.memory_space<vmem>>, vector<1x32xf32>
    %c0_17 = arith.constant 0 : index
    %c0_18 = arith.constant 0 : index
    %47 = vector.load %arg11[%c0_17, %c0_18] : memref<1x32xf32, #tpu.memory_space<vmem>>, vector<1x32xf32>
    %cst_19 = arith.constant dense<0.000000e+00> : vector<4xf32>
    %48 = vector.multi_reduction <add>, %45, %cst_19 [1] : vector<4x32xf32> to vector<4xf32>
    %49 = vector.shape_cast %48 : vector<4xf32> to vector<4x1xf32>
    %cst_20 = arith.constant 3.200000e+01 : f32
    %50 = vector.broadcast %cst_20 : f32 to vector<4x1xf32>
    %51 = arith.divf %49, %50 : vector<4x1xf32>
    %52 = vector.broadcast %51 : vector<4x1xf32> to vector<4x32xf32>
    %53 = arith.subf %45, %52 : vector<4x32xf32>
    %54 = arith.mulf %53, %53 : vector<4x32xf32>
    %cst_21 = arith.constant dense<0.000000e+00> : vector<4xf32>
    %55 = vector.multi_reduction <add>, %54, %cst_21 [1] : vector<4x32xf32> to vector<4xf32>
    %56 = vector.shape_cast %55 : vector<4xf32> to vector<4x1xf32>
    %cst_22 = arith.constant 3.200000e+01 : f32
    %57 = vector.broadcast %cst_22 : f32 to vector<4x1xf32>
    %58 = arith.divf %56, %57 : vector<4x1xf32>
    %cst_23 = arith.constant 9.99999974E-6 : f32
    %59 = vector.broadcast %cst_23 : f32 to vector<4x1xf32>
    %60 = arith.addf %58, %59 : vector<4x1xf32>
    %61 = math.rsqrt %60 : vector<4x1xf32>
    %62 = vector.broadcast %61 : vector<4x1xf32> to vector<4x32xf32>
    %63 = arith.mulf %53, %62 : vector<4x32xf32>
    %64 = vector.broadcast %46 : vector<1x32xf32> to vector<4x32xf32>
    %65 = arith.mulf %63, %64 : vector<4x32xf32>
    %66 = vector.broadcast %47 : vector<1x32xf32> to vector<4x32xf32>
    %67 = arith.addf %65, %66 : vector<4x32xf32>
    %68 = arith.truncf %67 : vector<4x32xf32> to vector<4x32xbf16>
    %c0_24 = arith.constant 0 : index
    %c0_25 = arith.constant 0 : index
    %69 = vector.load %arg6[%c0_24, %c0_25] : memref<32x64xbf16, #tpu.memory_space<vmem>>, vector<32x64xbf16>
    %cst_26 = arith.constant dense<0.000000e+00> : vector<4x64xf32>
    %70 = tpu.matmul %68, %69, %cst_26 {dimension_numbers = #tpu.dot_dimension_numbers<[1], [0], [0], [1], [0, 0, 1, 1], [], []>} : vector<4x32xbf16>, vector<32x64xbf16>, vector<4x64xf32> -> vector<4x64xf32>
    %c0_27 = arith.constant 0 : index
    %c0_28 = arith.constant 0 : index
    %71 = vector.load %arg7[%c0_27, %c0_28] : memref<1x64xf32, #tpu.memory_space<vmem>>, vector<1x64xf32>
    %72 = vector.broadcast %71 : vector<1x64xf32> to vector<4x64xf32>
    %73 = arith.addf %70, %72 : vector<4x64xf32>
    %cst_29 = arith.constant 0.000000e+00 : f32
    %74 = vector.broadcast %cst_29 : f32 to vector<4x64xf32>
    %75 = arith.maximumf %73, %74 : vector<4x64xf32>
    %76 = arith.truncf %75 : vector<4x64xf32> to vector<4x64xbf16>
    %c0_30 = arith.constant 0 : index
    %c0_31 = arith.constant 0 : index
    %77 = vector.load %arg8[%c0_30, %c0_31] : memref<64x32xbf16, #tpu.memory_space<vmem>>, vector<64x32xbf16>
    %cst_32 = arith.constant dense<0.000000e+00> : vector<4x32xf32>
    %78 = tpu.matmul %76, %77, %cst_32 {dimension_numbers = #tpu.dot_dimension_numbers<[1], [0], [0], [1], [0, 0, 1, 1], [], []>} : vector<4x64xbf16>, vector<64x32xbf16>, vector<4x32xf32> -> vector<4x32xf32>
    %c0_33 = arith.constant 0 : index
    %c0_34 = arith.constant 0 : index
    %79 = vector.load %arg9[%c0_33, %c0_34] : memref<1x32xf32, #tpu.memory_space<vmem>>, vector<1x32xf32>
    %80 = vector.broadcast %79 : vector<1x32xf32> to vector<4x32xf32>
    %81 = arith.addf %78, %80 : vector<4x32xf32>
    %82 = arith.addf %67, %81 : vector<4x32xf32>
    %c0_35 = arith.constant 0 : index
    %c0_36 = arith.constant 0 : index
    %83 = vector.load %arg12[%c0_35, %c0_36] : memref<1x32xf32, #tpu.memory_space<vmem>>, vector<1x32xf32>
    %c0_37 = arith.constant 0 : index
    %c0_38 = arith.constant 0 : index
    %84 = vector.load %arg13[%c0_37, %c0_38] : memref<1x32xf32, #tpu.memory_space<vmem>>, vector<1x32xf32>
    %cst_39 = arith.constant dense<0.000000e+00> : vector<4xf32>
    %85 = vector.multi_reduction <add>, %82, %cst_39 [1] : vector<4x32xf32> to vector<4xf32>
    %86 = vector.shape_cast %85 : vector<4xf32> to vector<4x1xf32>
    %cst_40 = arith.constant 3.200000e+01 : f32
    %87 = vector.broadcast %cst_40 : f32 to vector<4x1xf32>
    %88 = arith.divf %86, %87 : vector<4x1xf32>
    %89 = vector.broadcast %88 : vector<4x1xf32> to vector<4x32xf32>
    %90 = arith.subf %82, %89 : vector<4x32xf32>
    %91 = arith.mulf %90, %90 : vector<4x32xf32>
    %cst_41 = arith.constant dense<0.000000e+00> : vector<4xf32>
    %92 = vector.multi_reduction <add>, %91, %cst_41 [1] : vector<4x32xf32> to vector<4xf32>
    %93 = vector.shape_cast %92 : vector<4xf32> to vector<4x1xf32>
    %cst_42 = arith.constant 3.200000e+01 : f32
    %94 = vector.broadcast %cst_42 : f32 to vector<4x1xf32>
    %95 = arith.divf %93, %94 : vector<4x1xf32>
    %cst_43 = arith.constant 9.99999974E-6 : f32
    %96 = vector.broadcast %cst_43 : f32 to vector<4x1xf32>
    %97 = arith.addf %95, %96 : vector<4x1xf32>
    %98 = math.rsqrt %97 : vector<4x1xf32>
    %99 = vector.broadcast %98 : vector<4x1xf32> to vector<4x32xf32>
    %100 = arith.mulf %90, %99 : vector<4x32xf32>
    %101 = vector.broadcast %83 : vector<1x32xf32> to vector<4x32xf32>
    %102 = arith.mulf %100, %101 : vector<4x32xf32>
    %103 = vector.broadcast %84 : vector<1x32xf32> to vector<4x32xf32>
    %104 = arith.addf %102, %103 : vector<4x32xf32>
    %105 = vector.shape_cast %104 : vector<4x32xf32> to vector<1x4x32xf32>
    %c0_44 = arith.constant 0 : index
    %c0_45 = arith.constant 0 : index
    %c0_46 = arith.constant 0 : index
    %106 = vector.load %arg14[%c0_44, %c0_45, %c0_46] : memref<1x4x32xf32, #tpu.memory_space<vmem>>, vector<1x4x32xf32>
    tpu.vector_store %arg14[%c0_44, %c0_45, %c0_46], %105 {strides = array<i32>} : memref<1x4x32xf32, #tpu.memory_space<vmem>>, vector<1x4x32xf32>,
    return
  }
  func.func @transform_0(%arg0: i32) -> (i32, i32, i32) {
    %c0_i32 = arith.constant 0 : i32
    %c0_i32_0 = arith.constant 0 : i32
    %c0_i32_1 = arith.constant 0 : i32
    return %arg0, %c0_i32, %c0_i32_0 : i32, i32, i32
  }
  func.func @transform_1(%arg0: i32) -> (i32, i32) {
    %c0_i32 = arith.constant 0 : i32
    %c0_i32_0 = arith.constant 0 : i32
    %c0_i32_1 = arith.constant 0 : i32
    return %c0_i32, %c0_i32_0 : i32, i32
  }
  func.func @transform_2(%arg0: i32) -> (i32, i32) {
    %c0_i32 = arith.constant 0 : i32
    %c0_i32_0 = arith.constant 0 : i32
    %c0_i32_1 = arith.constant 0 : i32
    return %c0_i32, %c0_i32_0 : i32, i32
  }
  func.func @transform_3(%arg0: i32) -> (i32, i32) {
    %c0_i32 = arith.constant 0 : i32
    %c0_i32_0 = arith.constant 0 : i32
    %c0_i32_1 = arith.constant 0 : i32
    return %c0_i32, %c0_i32_0 : i32, i32
  }
  func.func @transform_4(%arg0: i32) -> (i32, i32) {
    %c0_i32 = arith.constant 0 : i32
    %c0_i32_0 = arith.constant 0 : i32
    %c0_i32_1 = arith.constant 0 : i32
    return %c0_i32, %c0_i32_0 : i32, i32
  }
  func.func @transform_5(%arg0: i32) -> (i32, i32) {
    %c0_i32 = arith.constant 0 : i32
    %c0_i32_0 = arith.constant 0 : i32
    %c0_i32_1 = arith.constant 0 : i32
    return %c0_i32, %c0_i32_0 : i32, i32
  }
  func.func @transform_6(%arg0: i32) -> (i32, i32) {
    %c0_i32 = arith.constant 0 : i32
    %c0_i32_0 = arith.constant 0 : i32
    %c0_i32_1 = arith.constant 0 : i32
    return %c0_i32, %c0_i32_0 : i32, i32
  }
  func.func @transform_7(%arg0: i32) -> (i32, i32) {
    %c0_i32 = arith.constant 0 : i32
    %c0_i32_0 = arith.constant 0 : i32
    %c0_i32_1 = arith.constant 0 : i32
    return %c0_i32, %c0_i32_0 : i32, i32
  }
  func.func @transform_8(%arg0: i32) -> (i32, i32) {
    %c0_i32 = arith.constant 0 : i32
    %c0_i32_0 = arith.constant 0 : i32
    %c0_i32_1 = arith.constant 0 : i32
    return %c0_i32, %c0_i32_0 : i32, i32
  }
  func.func @transform_9(%arg0: i32) -> (i32, i32) {
    %c0_i32 = arith.constant 0 : i32
    %c0_i32_0 = arith.constant 0 : i32
    %c0_i32_1 = arith.constant 0 : i32
    return %c0_i32, %c0_i32_0 : i32, i32
  }
  func.func @transform_10(%arg0: i32) -> (i32, i32) {
    %c0_i32 = arith.constant 0 : i32
    %c0_i32_0 = arith.constant 0 : i32
    %c0_i32_1 = arith.constant 0 : i32
    return %c0_i32, %c0_i32_0 : i32, i32
  }
  func.func @transform_11(%arg0: i32) -> (i32, i32) {
    %c0_i32 = arith.constant 0 : i32
    %c0_i32_0 = arith.constant 0 : i32
    %c0_i32_1 = arith.constant 0 : i32
    return %c0_i32, %c0_i32_0 : i32, i32
  }
  func.func @transform_12(%arg0: i32) -> (i32, i32) {
    %c0_i32 = arith.constant 0 : i32
    %c0_i32_0 = arith.constant 0 : i32
    %c0_i32_1 = arith.constant 0 : i32
    return %c0_i32, %c0_i32_0 : i32, i32
  }
  func.func @transform_13(%arg0: i32) -> (i32, i32, i32) {
    %c0_i32 = arith.constant 0 : i32
    %c0_i32_0 = arith.constant 0 : i32
    %c0_i32_1 = arith.constant 0 : i32
    return %arg0, %c0_i32, %c0_i32_0 : i32, i32, i32
  }
}

module attributes {stable_mosaic.version = 11 : i64} {
  func.func @encoder_layer_kernel(%arg0: i32, %arg1: memref<1x2x32xf32, #tpu.memory_space<vmem>>, %arg2: memref<32x96xbf16, #tpu.memory_space<vmem>>, %arg3: memref<1x96xf32, #tpu.memory_space<vmem>>, %arg4: memref<32x32xbf16, #tpu.memory_space<vmem>>, %arg5: memref<1x32xf32, #tpu.memory_space<vmem>>, %arg6: memref<32x64xbf16, #tpu.memory_space<vmem>>, %arg7: memref<1x64xf32, #tpu.memory_space<vmem>>, %arg8: memref<64x32xbf16, #tpu.memory_space<vmem>>, %arg9: memref<1x32xf32, #tpu.memory_space<vmem>>, %arg10: memref<1x32xf32, #tpu.memory_space<vmem>>, %arg11: memref<1x32xf32, #tpu.memory_space<vmem>>, %arg12: memref<1x32xf32, #tpu.memory_space<vmem>>, %arg13: memref<1x32xf32, #tpu.memory_space<vmem>>, %arg14: memref<1x2x32xf32, #tpu.memory_space<vmem>>) attributes {dimension_semantics = [#tpu.dimension_semantics<parallel>], iteration_bounds = array<i64: 2>, scalar_prefetch = 0 : i64, scratch_operands = 0 : i64, tpu.core_type = #tpu.core_type<tc>, window_params = [{transform_indices = @transform_0, window_bounds = array<i64: 1, 2, 32>}, {pipeline_mode = #tpu.pipeline_mode<synchronous>, transform_indices = @transform_1, window_bounds = array<i64: 32, 96>}, {pipeline_mode = #tpu.pipeline_mode<synchronous>, transform_indices = @transform_2, window_bounds = array<i64: 1, 96>}, {pipeline_mode = #tpu.pipeline_mode<synchronous>, transform_indices = @transform_3, window_bounds = array<i64: 32, 32>}, {pipeline_mode = #tpu.pipeline_mode<synchronous>, transform_indices = @transform_4, window_bounds = array<i64: 1, 32>}, {pipeline_mode = #tpu.pipeline_mode<synchronous>, transform_indices = @transform_5, window_bounds = array<i64: 32, 64>}, {pipeline_mode = #tpu.pipeline_mode<synchronous>, transform_indices = @transform_6, window_bounds = array<i64: 1, 64>}, {pipeline_mode = #tpu.pipeline_mode<synchronous>, transform_indices = @transform_7, window_bounds = array<i64: 64, 32>}, {pipeline_mode = #tpu.pipeline_mode<synchronous>, transform_indices = @transform_8, window_bounds = array<i64: 1, 32>}, {pipeline_mode = #tpu.pipeline_mode<synchronous>, transform_indices = @transform_9, window_bounds = array<i64: 1, 32>}, {pipeline_mode = #tpu.pipeline_mode<synchronous>, transform_indices = @transform_10, window_bounds = array<i64: 1, 32>}, {pipeline_mode = #tpu.pipeline_mode<synchronous>, transform_indices = @transform_11, window_bounds = array<i64: 1, 32>}, {pipeline_mode = #tpu.pipeline_mode<synchronous>, transform_indices = @transform_12, window_bounds = array<i64: 1, 32>}, {transform_indices = @transform_13, window_bounds = array<i64: 1, 2, 32>}]} {
    %c0 = arith.constant 0 : index
    %c0_0 = arith.constant 0 : index
    %c0_1 = arith.constant 0 : index
    %0 = vector.load %arg1[%c0, %c0_0, %c0_1] : memref<1x2x32xf32, #tpu.memory_space<vmem>>, vector<1x2x32xf32>
    %1 = vector.shape_cast %0 : vector<1x2x32xf32> to vector<2x32xf32>
    %2 = arith.truncf %1 : vector<2x32xf32> to vector<2x32xbf16>
    %c0_2 = arith.constant 0 : index
    %c0_3 = arith.constant 0 : index
    %3 = vector.load %arg2[%c0_2, %c0_3] : memref<32x96xbf16, #tpu.memory_space<vmem>>, vector<32x96xbf16>
    %cst = arith.constant dense<0.000000e+00> : vector<2x96xf32>
    %4 = tpu.matmul %2, %3, %cst {dimension_numbers = #tpu.dot_dimension_numbers<[1], [0], [0], [1], [0, 0, 1, 1], [], []>} : vector<2x32xbf16>, vector<32x96xbf16>, vector<2x96xf32> -> vector<2x96xf32>
    %c0_4 = arith.constant 0 : index
    %c0_5 = arith.constant 0 : index
    %5 = vector.load %arg3[%c0_4, %c0_5] : memref<1x96xf32, #tpu.memory_space<vmem>>, vector<1x96xf32>
    %6 = vector.broadcast %5 : vector<1x96xf32> to vector<2x96xf32>
    %7 = arith.addf %4, %6 : vector<2x96xf32>
    %8 = vector.extract_strided_slice %7 {offsets = [0, 0], sizes = [2, 32], strides = [1, 1]} : vector<2x96xf32> to vector<2x32xf32>
    %9 = vector.shape_cast %8 : vector<2x32xf32> to vector<1x2x4x8xf32>
    %10 = tpu.transpose %9, [0, 2, 1, 3] : vector<1x2x4x8xf32> -> vector<1x4x2x8xf32>
    %11 = vector.shape_cast %10 : vector<1x4x2x8xf32> to vector<4x2x8xf32>
    %12 = arith.truncf %11 : vector<4x2x8xf32> to vector<4x2x8xbf16>
    %13 = vector.extract_strided_slice %7 {offsets = [0, 32], sizes = [2, 32], strides = [1, 1]} : vector<2x96xf32> to vector<2x32xf32>
    %14 = vector.shape_cast %13 : vector<2x32xf32> to vector<1x2x4x8xf32>
    %15 = tpu.transpose %14, [0, 2, 1, 3] : vector<1x2x4x8xf32> -> vector<1x4x2x8xf32>
    %16 = vector.shape_cast %15 : vector<1x4x2x8xf32> to vector<4x2x8xf32>
    %17 = arith.truncf %16 : vector<4x2x8xf32> to vector<4x2x8xbf16>
    %18 = vector.extract_strided_slice %7 {offsets = [0, 64], sizes = [2, 32], strides = [1, 1]} : vector<2x96xf32> to vector<2x32xf32>
    %19 = vector.shape_cast %18 : vector<2x32xf32> to vector<1x2x4x8xf32>
    %20 = tpu.transpose %19, [0, 2, 1, 3] : vector<1x2x4x8xf32> -> vector<1x4x2x8xf32>
    %21 = vector.shape_cast %20 : vector<1x4x2x8xf32> to vector<4x2x8xf32>
    %22 = arith.truncf %21 : vector<4x2x8xf32> to vector<4x2x8xbf16>
    "tpu.trace_start"() <{level = 10 : i32, message = "bqd,bkd->bqk"}> : () -> ()
    %cst_6 = arith.constant dense<0.000000e+00> : vector<4x2x2xf32>
    %23 = tpu.matmul %12, %17, %cst_6 {dimension_numbers = #tpu.dot_dimension_numbers<[2], [2], [1], [1], [0, 0, 0, 1, 1, 1], [0], [0]>} : vector<4x2x8xbf16>, vector<4x2x8xbf16>, vector<4x2x2xf32> -> vector<4x2x2xf32>
    "tpu.trace_stop"() : () -> ()
    %cst_7 = arith.constant dense<0xFF800000> : vector<4x2xf32>
    %24 = vector.multi_reduction <maximumf>, %23, %cst_7 [2] : vector<4x2x2xf32> to vector<4x2xf32>
    %25 = vector.shape_cast %24 : vector<4x2xf32> to vector<4x2x1xf32>
    %26 = vector.broadcast %25 : vector<4x2x1xf32> to vector<4x2x2xf32>
    %27 = arith.subf %23, %26 : vector<4x2x2xf32>
    %28 = math.exp %27 : vector<4x2x2xf32>
    %cst_8 = arith.constant dense<0.000000e+00> : vector<4x2xf32>
    %29 = vector.multi_reduction <add>, %28, %cst_8 [2] : vector<4x2x2xf32> to vector<4x2xf32>
    %30 = vector.shape_cast %29 : vector<4x2xf32> to vector<4x2x1xf32>
    %31 = tpu.reciprocal %30 {approx = true} : vector<4x2x1xf32> -> vector<4x2x1xf32>
    %32 = vector.broadcast %31 : vector<4x2x1xf32> to vector<4x2x2xf32>
    %33 = arith.mulf %28, %32 : vector<4x2x2xf32>
    %34 = arith.truncf %33 : vector<4x2x2xf32> to vector<4x2x2xbf16>
    "tpu.trace_start"() <{level = 10 : i32, message = "bqk,bkd->bqd"}> : () -> ()
    %cst_9 = arith.constant dense<0.000000e+00> : vector<4x2x8xf32>
    %35 = tpu.matmul %34, %22, %cst_9 {dimension_numbers = #tpu.dot_dimension_numbers<[2], [1], [1], [2], [0, 0, 0, 1, 1, 2], [0], [0]>} : vector<4x2x2xbf16>, vector<4x2x8xbf16>, vector<4x2x8xf32> -> vector<4x2x8xf32>
    "tpu.trace_stop"() : () -> ()
    %36 = vector.shape_cast %35 : vector<4x2x8xf32> to vector<1x4x2x8xf32>
    %37 = tpu.transpose %36, [0, 2, 1, 3] : vector<1x4x2x8xf32> -> vector<1x2x4x8xf32>
    %38 = vector.shape_cast %37 : vector<1x2x4x8xf32> to vector<2x32xf32>
    %39 = arith.truncf %38 : vector<2x32xf32> to vector<2x32xbf16>
    %c0_10 = arith.constant 0 : index
    %c0_11 = arith.constant 0 : index
    %40 = vector.load %arg4[%c0_10, %c0_11] : memref<32x32xbf16, #tpu.memory_space<vmem>>, vector<32x32xbf16>
    %cst_12 = arith.constant dense<0.000000e+00> : vector<2x32xf32>
    %41 = tpu.matmul %39, %40, %cst_12 {dimension_numbers = #tpu.dot_dimension_numbers<[1], [0], [0], [1], [0, 0, 1, 1], [], []>} : vector<2x32xbf16>, vector<32x32xbf16>, vector<2x32xf32> -> vector<2x32xf32>
    %c0_13 = arith.constant 0 : index
    %c0_14 = arith.constant 0 : index
    %42 = vector.load %arg5[%c0_13, %c0_14] : memref<1x32xf32, #tpu.memory_space<vmem>>, vector<1x32xf32>
    %43 = vector.broadcast %42 : vector<1x32xf32> to vector<2x32xf32>
    %44 = arith.addf %41, %43 : vector<2x32xf32>
    %45 = arith.addf %1, %44 : vector<2x32xf32>
    %c0_15 = arith.constant 0 : index
    %c0_16 = arith.constant 0 : index
    %46 = vector.load %arg10[%c0_15, %c0_16] : memref<1x32xf32, #tpu.memory_space<vmem>>, vector<1x32xf32>
    %c0_17 = arith.constant 0 : index
    %c0_18 = arith.constant 0 : index
    %47 = vector.load %arg11[%c0_17, %c0_18] : memref<1x32xf32, #tpu.memory_space<vmem>>, vector<1x32xf32>
    %cst_19 = arith.constant dense<0.000000e+00> : vector<2xf32>
    %48 = vector.multi_reduction <add>, %45, %cst_19 [1] : vector<2x32xf32> to vector<2xf32>
    %49 = vector.shape_cast %48 : vector<2xf32> to vector<2x1xf32>
    %cst_20 = arith.constant 3.200000e+01 : f32
    %50 = vector.broadcast %cst_20 : f32 to vector<2x1xf32>
    %51 = arith.divf %49, %50 : vector<2x1xf32>
    %52 = vector.broadcast %51 : vector<2x1xf32> to vector<2x32xf32>
    %53 = arith.subf %45, %52 : vector<2x32xf32>
    %54 = arith.mulf %53, %53 : vector<2x32xf32>
    %cst_21 = arith.constant dense<0.000000e+00> : vector<2xf32>
    %55 = vector.multi_reduction <add>, %54, %cst_21 [1] : vector<2x32xf32> to vector<2xf32>
    %56 = vector.shape_cast %55 : vector<2xf32> to vector<2x1xf32>
    %cst_22 = arith.constant 3.200000e+01 : f32
    %57 = vector.broadcast %cst_22 : f32 to vector<2x1xf32>
    %58 = arith.divf %56, %57 : vector<2x1xf32>
    %cst_23 = arith.constant 9.99999974E-6 : f32
    %59 = vector.broadcast %cst_23 : f32 to vector<2x1xf32>
    %60 = arith.addf %58, %59 : vector<2x1xf32>
    %61 = math.rsqrt %60 : vector<2x1xf32>
    %62 = vector.broadcast %61 : vector<2x1xf32> to vector<2x32xf32>
    %63 = arith.mulf %53, %62 : vector<2x32xf32>
    %64 = vector.broadcast %46 : vector<1x32xf32> to vector<2x32xf32>
    %65 = arith.mulf %63, %64 : vector<2x32xf32>
    %66 = vector.broadcast %47 : vector<1x32xf32> to vector<2x32xf32>
    %67 = arith.addf %65, %66 : vector<2x32xf32>
    %68 = arith.truncf %67 : vector<2x32xf32> to vector<2x32xbf16>
    %c0_24 = arith.constant 0 : index
    %c0_25 = arith.constant 0 : index
    %69 = vector.load %arg6[%c0_24, %c0_25] : memref<32x64xbf16, #tpu.memory_space<vmem>>, vector<32x64xbf16>
    %cst_26 = arith.constant dense<0.000000e+00> : vector<2x64xf32>
    %70 = tpu.matmul %68, %69, %cst_26 {dimension_numbers = #tpu.dot_dimension_numbers<[1], [0], [0], [1], [0, 0, 1, 1], [], []>} : vector<2x32xbf16>, vector<32x64xbf16>, vector<2x64xf32> -> vector<2x64xf32>
    %c0_27 = arith.constant 0 : index
    %c0_28 = arith.constant 0 : index
    %71 = vector.load %arg7[%c0_27, %c0_28] : memref<1x64xf32, #tpu.memory_space<vmem>>, vector<1x64xf32>
    %72 = vector.broadcast %71 : vector<1x64xf32> to vector<2x64xf32>
    %73 = arith.addf %70, %72 : vector<2x64xf32>
    %cst_29 = arith.constant 0.000000e+00 : f32
    %74 = vector.broadcast %cst_29 : f32 to vector<2x64xf32>
    %75 = arith.maximumf %73, %74 : vector<2x64xf32>
    %76 = arith.truncf %75 : vector<2x64xf32> to vector<2x64xbf16>
    %c0_30 = arith.constant 0 : index
    %c0_31 = arith.constant 0 : index
    %77 = vector.load %arg8[%c0_30, %c0_31] : memref<64x32xbf16, #tpu.memory_space<vmem>>, vector<64x32xbf16>
    %cst_32 = arith.constant dense<0.000000e+00> : vector<2x32xf32>
    %78 = tpu.matmul %76, %77, %cst_32 {dimension_numbers = #tpu.dot_dimension_numbers<[1], [0], [0], [1], [0, 0, 1, 1], [], []>} : vector<2x64xbf16>, vector<64x32xbf16>, vector<2x32xf32> -> vector<2x32xf32>
    %c0_33 = arith.constant 0 : index
    %c0_34 = arith.constant 0 : index
    %79 = vector.load %arg9[%c0_33, %c0_34] : memref<1x32xf32, #tpu.memory_space<vmem>>, vector<1x32xf32>
    %80 = vector.broadcast %79 : vector<1x32xf32> to vector<2x32xf32>
    %81 = arith.addf %78, %80 : vector<2x32xf32>
    %82 = arith.addf %67, %81 : vector<2x32xf32>
    %c0_35 = arith.constant 0 : index
    %c0_36 = arith.constant 0 : index
    %83 = vector.load %arg12[%c0_35, %c0_36] : memref<1x32xf32, #tpu.memory_space<vmem>>, vector<1x32xf32>
    %c0_37 = arith.constant 0 : index
    %c0_38 = arith.constant 0 : index
    %84 = vector.load %arg13[%c0_37, %c0_38] : memref<1x32xf32, #tpu.memory_space<vmem>>, vector<1x32xf32>
    %cst_39 = arith.constant dense<0.000000e+00> : vector<2xf32>
    %85 = vector.multi_reduction <add>, %82, %cst_39 [1] : vector<2x32xf32> to vector<2xf32>
    %86 = vector.shape_cast %85 : vector<2xf32> to vector<2x1xf32>
    %cst_40 = arith.constant 3.200000e+01 : f32
    %87 = vector.broadcast %cst_40 : f32 to vector<2x1xf32>
    %88 = arith.divf %86, %87 : vector<2x1xf32>
    %89 = vector.broadcast %88 : vector<2x1xf32> to vector<2x32xf32>
    %90 = arith.subf %82, %89 : vector<2x32xf32>
    %91 = arith.mulf %90, %90 : vector<2x32xf32>
    %cst_41 = arith.constant dense<0.000000e+00> : vector<2xf32>
    %92 = vector.multi_reduction <add>, %91, %cst_41 [1] : vector<2x32xf32> to vector<2xf32>
    %93 = vector.shape_cast %92 : vector<2xf32> to vector<2x1xf32>
    %cst_42 = arith.constant 3.200000e+01 : f32
    %94 = vector.broadcast %cst_42 : f32 to vector<2x1xf32>
    %95 = arith.divf %93, %94 : vector<2x1xf32>
    %cst_43 = arith.constant 9.99999974E-6 : f32
    %96 = vector.broadcast %cst_43 : f32 to vector<2x1xf32>
    %97 = arith.addf %95, %96 : vector<2x1xf32>
    %98 = math.rsqrt %97 : vector<2x1xf32>
    %99 = vector.broadcast %98 : vector<2x1xf32> to vector<2x32xf32>
    %100 = arith.mulf %90, %99 : vector<2x32xf32>
    %101 = vector.broadcast %83 : vector<1x32xf32> to vector<2x32xf32>
    %102 = arith.mulf %100, %101 : vector<2x32xf32>
    %103 = vector.broadcast %84 : vector<1x32xf32> to vector<2x32xf32>
    %104 = arith.addf %102, %103 : vector<2x32xf32>
    %105 = vector.shape_cast %104 : vector<2x32xf32> to vector<1x2x32xf32>
    %c0_44 = arith.constant 0 : index
    %c0_45 = arith.constant 0 : index
    %c0_46 = arith.constant 0 : index
    %106 = vector.load %arg14[%c0_44, %c0_45, %c0_46] : memref<1x2x32xf32, #tpu.memory_space<vmem>>, vector<1x2x32xf32>
    tpu.vector_store %arg14[%c0_44, %c0_45, %c0_46], %105 {strides = array<i32>} : memref<1x2x32xf32, #tpu.memory_space<vmem>>, vector<1x2x32xf32>,
    return
  }
  func.func @transform_0(%arg0: i32) -> (i32, i32, i32) {
    %c0_i32 = arith.constant 0 : i32
    %c0_i32_0 = arith.constant 0 : i32
    %c0_i32_1 = arith.constant 0 : i32
    return %arg0, %c0_i32, %c0_i32_0 : i32, i32, i32
  }
  func.func @transform_1(%arg0: i32) -> (i32, i32) {
    %c0_i32 = arith.constant 0 : i32
    %c0_i32_0 = arith.constant 0 : i32
    %c0_i32_1 = arith.constant 0 : i32
    return %c0_i32, %c0_i32_0 : i32, i32
  }
  func.func @transform_2(%arg0: i32) -> (i32, i32) {
    %c0_i32 = arith.constant 0 : i32
    %c0_i32_0 = arith.constant 0 : i32
    %c0_i32_1 = arith.constant 0 : i32
    return %c0_i32, %c0_i32_0 : i32, i32
  }
  func.func @transform_3(%arg0: i32) -> (i32, i32) {
    %c0_i32 = arith.constant 0 : i32
    %c0_i32_0 = arith.constant 0 : i32
    %c0_i32_1 = arith.constant 0 : i32
    return %c0_i32, %c0_i32_0 : i32, i32
  }
  func.func @transform_4(%arg0: i32) -> (i32, i32) {
    %c0_i32 = arith.constant 0 : i32
    %c0_i32_0 = arith.constant 0 : i32
    %c0_i32_1 = arith.constant 0 : i32
    return %c0_i32, %c0_i32_0 : i32, i32
  }
  func.func @transform_5(%arg0: i32) -> (i32, i32) {
    %c0_i32 = arith.constant 0 : i32
    %c0_i32_0 = arith.constant 0 : i32
    %c0_i32_1 = arith.constant 0 : i32
    return %c0_i32, %c0_i32_0 : i32, i32
  }
  func.func @transform_6(%arg0: i32) -> (i32, i32) {
    %c0_i32 = arith.constant 0 : i32
    %c0_i32_0 = arith.constant 0 : i32
    %c0_i32_1 = arith.constant 0 : i32
    return %c0_i32, %c0_i32_0 : i32, i32
  }
  func.func @transform_7(%arg0: i32) -> (i32, i32) {
    %c0_i32 = arith.constant 0 : i32
    %c0_i32_0 = arith.constant 0 : i32
    %c0_i32_1 = arith.constant 0 : i32
    return %c0_i32, %c0_i32_0 : i32, i32
  }
  func.func @transform_8(%arg0: i32) -> (i32, i32) {
    %c0_i32 = arith.constant 0 : i32
    %c0_i32_0 = arith.constant 0 : i32
    %c0_i32_1 = arith.constant 0 : i32
    return %c0_i32, %c0_i32_0 : i32, i32
  }
  func.func @transform_9(%arg0: i32) -> (i32, i32) {
    %c0_i32 = arith.constant 0 : i32
    %c0_i32_0 = arith.constant 0 : i32
    %c0_i32_1 = arith.constant 0 : i32
    return %c0_i32, %c0_i32_0 : i32, i32
  }
  func.func @transform_10(%arg0: i32) -> (i32, i32) {
    %c0_i32 = arith.constant 0 : i32
    %c0_i32_0 = arith.constant 0 : i32
    %c0_i32_1 = arith.constant 0 : i32
    return %c0_i32, %c0_i32_0 : i32, i32
  }
  func.func @transform_11(%arg0: i32) -> (i32, i32) {
    %c0_i32 = arith.constant 0 : i32
    %c0_i32_0 = arith.constant 0 : i32
    %c0_i32_1 = arith.constant 0 : i32
    return %c0_i32, %c0_i32_0 : i32, i32
  }
  func.func @transform_12(%arg0: i32) -> (i32, i32) {
    %c0_i32 = arith.constant 0 : i32
    %c0_i32_0 = arith.constant 0 : i32
    %c0_i32_1 = arith.constant 0 : i32
    return %c0_i32, %c0_i32_0 : i32, i32
  }
  func.func @transform_13(%arg0: i32) -> (i32, i32, i32) {
    %c0_i32 = arith.constant 0 : i32
    %c0_i32_0 = arith.constant 0 : i32
    %c0_i32_1 = arith.constant 0 : i32
    return %arg0, %c0_i32, %c0_i32_0 : i32, i32, i32
  }
}

</mosaic_0001>

<bundles_post_ra>
// kernel: encoder_stack_forward.4
= control target key start
LH: loop header
LB: loop body
LE: loop exit
PB: predicated region body
PF: predicated region fallthrough
CT: control target
= control target key end

     0   :  { %s1893_s25 = smov 0   ;;  %s2126_s0 = inlined_call_operand.vmem [shape: f32[2,4,32], index: 0, kind: input, shape index: {}]   ;;  %s2127_s1 = inlined_call_operand.vmem [shape: bf16[32,96], index: 1, kind: input, shape index: {}]   ;;  %s2128_s2 = inlined_call_operand.vmem [shape: f32[1,96], index: 2, kind: input, shape index: {}]   ;;  %s2129_s3 = inlined_call_operand.vmem [shape: bf16[32,32], index: 3, kind: input, shape index: {}]   ;;  %s2130_s4 = inlined_call_operand.vmem [shape: f32[1,32], index: 4, kind: input, shape index: {}]   ;;  %s2131_s5 = inlined_call_operand.vmem [shape: bf16[32,64], index: 5, kind: input, shape index: {}]   ;;  %s2132_s6 = inlined_call_operand.vmem [shape: f32[1,64], index: 6, kind: input, shape index: {}]   ;;  %s2133_s7 = inlined_call_operand.vmem [shape: bf16[64,32], index: 7, kind: input, shape index: {}]   ;;  %s2134_s8 = inlined_call_operand.vmem [shape: f32[1,32], index: 8, kind: input, shape index: {}]   ;;  %s2135_s9 = inlined_call_operand.vmem [shape: f32[1,32], index: 9, kind: input, shape index: {}]   ;;  %s2136_s10 = inlined_call_operand.vmem [shape: f32[1,32], index: 10, kind: input, shape index: {}]   ;;  %s2137_s11 = inlined_call_operand.vmem [shape: f32[1,32], index: 11, kind: input, shape index: {}]   ;;  %s2138_s12 = inlined_call_operand.vmem [shape: f32[1,32], index: 12, kind: input, shape index: {}]   ;;  %s2139_s13 = inlined_call_operand.vmem [shape: f32[2,4,32], index: 13, kind: output, shape index: {}]  }
   0x1 LB: > { %s1596_s26 = sadd.s32 4294967295, %s1809_s25   ;;  %p1600_p0 = scmp.ge.s32.totalorder %s1809_s25, 1  ;;  %s1809_s25 = sphi %s1893_s25, %s23_s25  }
   0x2   : > { %p386_p1 = scmp.lt.s32.totalorder %s1809_s25, 3 }
   0x4   : > { %p387_p2 = pnand %p1600_p0, %p386_p1 }
   0x5   : > { %v1773_v0 = vld [vmem:[%s2127_s1] sm:$0xff] (!%p387_p2)   ;;  %v1811_v1 = vmov (!%p387_p2), 0.0   ;;  %v1774_v2 = vld [vmem:[%s2127_s1 + $0x8] sm:$0xff] (!%p387_p2)   ;;  %vm1812_vm0 = vmmov (!%p387_p2), 0   ;;  %p428_p3 = scmp.lt.s32.totalorder (!%p387_p2), %s1596_s26, 1  ;;  %vm462_vm1 = vcmask (!%p387_p2), 261120   ;;  %v520_v16 = vlaneseq (!%p387_p2) }
   0x6   : > { %390 = sbr.rel (%p387_p2) target bundleno = 2705 (0xa91), region = 72  ;;  %1669 = vmatprep.subr.bf16.mxu0 (!%p387_p2), %v1811_v1  ;;  %1677 = vmatprep.subr.bf16.mxu1 (!%p387_p2), %v1811_v1  ;;  %v1603_v5 = vld [vmem:[%s2128_s2] ss:$0 sm:$0xff] (!%p387_p2)  ;;  %s1813_s20 = smov (!%p387_p2), 104   ;;  %v1817_v14 = vmov (!%p387_p2), 1983009808  }
   0x7   : > { %1670 = vmatpush3.bf16.msra.mxu0 (!%p387_p2), %v1773_v0  ;;  %1673 = vmatprep.mubr.msk.bf16.mxu0 (!%p387_p2), %vm1812_vm0, %v1811_v1  ;;  %s1814_s21 = smov (!%p387_p2), 120   ;;  %s1815_s22 = smov (!%p387_p2), 96   ;;  %v518_v15 = vunpack.c.l.s4 (!%p387_p2), %v1817_v14  ;;  %v521_v18 = vshrl.u32 (!%p387_p2), %v520_v16, 7  ;;  %v1818_v19 = vmov (!%p387_p2), 1934713408   ;;  %vm756_vm2 = vcmask (!%p387_p2), 64512  }
   0x8   : > { %1671 = vmatprep.subr.bf16.mxu0 (!%p387_p2), %v1811_v1  ;;  %1679 = vmatprep.mubr.msk.bf16.mxu1 (!%p387_p2), %vm1812_vm0, %v1811_v1  ;;  %s1816_s23 = smov (!%p387_p2), 112   ;;  %v535_v20 = vunpack.c.l.s4 (!%p387_p2), %v1818_v19  ;;  %vm941_vm3 = vcmask (!%p387_p2), 27648   ;;  %s1819_s24 = smov (!%p387_p2), 64   ;;  %vm994_vm4 = vcmask (!%p387_p2), 1041408   ;;  %vm990_vm5 = vcmask (!%p387_p2), 31744  }
   0x9   : > { %v519_v17 = vunpack.c.0.s8 (!%p387_p2), %v518_v15  ;;  %s1820_s15 = smov (!%p387_p2), 16   ;;  %s1821_s16 = smov (!%p387_p2), 8   ;;  %vm1257_vm6 = vcmask (!%p387_p2), 130048   ;;  %vm1259_vm7 = vcmask (!%p387_p2), 195584   ;;  %vm1331_vm8 = vcmask (!%p387_p2), 257024  }
   0xa   : > { %v536_v24 = vunpack.c.0.s8 (!%p387_p2), %v535_v20  ;;  %vm1468_vm9 = vcmask (!%p387_p2), 523264  }
   0xb   : > { %1672 = vmatpush3.bf16.msra.mxu0 (!%p387_p2), %v1774_v2  ;;  %v1950_v22 = vsub.s32 (!%p387_p2), %v519_v17, %v521_v18 }
   0xc   : > { %1683 = vmatprep.subr.bf16.mxu0 (!%p387_p2), %v1811_v1  ;;  %v1956_v29 = vsub.s32 (!%p387_p2), %v536_v24, %v521_v18 }
   0xd   : > { %s2141_s26 = smov (!%p428_p3, %s1596_s26), 1 }
   0xe   : > { %s1601_s14 = sshll.u32 %s2141_s26, 2 }
   0xf   : > { %s431_s17 = scalar_lea.vmem %s2126_s0, %s1601_s14  ;;  %s435_s18 = scalar_lea.vmem %s2139_s13, %s1601_s14 }
  0x10   : > { %v1923_v3 = vld [vmem:[%s431_s17] sm:$0xf]  ;;  %s1822_s17 = smov 24  }
  0x11   : > { %v438_v4 = vpack.c.bf16 %v1923_v3, %v1923_v3 }
  0x13   : > { %1674 = vmatmul.mubr.msk.bf16.vlgmr.msra.gmra.mrb[0].mxu0 %vm462_vm1, %v438_v4 }
  0x14   : > { %1685 = vmatprep.mubr.msk.bf16.mxu0 %vm1812_vm0, %v1811_v1 }
  0xe6   : > { %v500_v6 = vpop.f32.mrb[0].mxu0 }
  0xe7   : > { %v1933_v7 = vadd.f32 %v1603_v5, %v500_v6  ;;  %v1675_v8 = vpop.f32.mrb[1].mxu0 }
  0xe8   : > { %v503_v9 = vpop.f32.mrb[2].mxu0 }
  0xe9   : > { %513 = vrot.lane.b32.xlu1 %v1933_v7, %s1813_s20  ;;  %507 = vrot.lane.b32.xlu0 %v1933_v7, %s1814_s21  ;;  %v1676_v10 = vpop.f32.mrb[3].mxu0 }
  0xed   : > { %588 = vrot.lane.b32.xlu1 %v1933_v7, %s1815_s22  ;;  %510 = vrot.lane.b32.xlu0 %v1933_v7, %s1816_s23 }
 0x15b   : > { %v1939_v11 = vpop.permute.xlu0 %507  ;;  %v1942_v12 = vpop.permute.xlu1 %513 }
 0x15c   : > { %590 = vrot.lane.b32.xlu0 %v1939_v11, %s1815_s22  ;;  %v524_v23 = vcombine.low %v1939_v11, %v1942_v12 }
 0x15e   : > { %v531_v28 = vrot.slane %v524_v23, %v1950_v22 }
 0x15f   : > { %v1944_v13 = vpop.permute.xlu0 %510  ;;  %v589_v26 = vpop.permute.xlu1 %588 }
 0x160   : > { %594 = vrot.lane.b32.xlu0 %v1942_v12, %s1815_s22  ;;  %592 = vrot.lane.b32.xlu1 %v1944_v13, %s1815_s22  ;;  %v516_v21 = vcombine.low %v1933_v7, %v1944_v13 }
 0x162   : > { %v523_v25 = vrot.slane %v516_v21, %v1950_v22 }
 0x164   : > { %v532_v30 = vcombine.low %v523_v25, %v531_v28  ;;  %v533_v31 = vcombine.high %v523_v25, %v531_v28 }
 0x166   : > { %v540_v36 = vrot.slane %v532_v30, %v1956_v29  ;;  %v547_v37 = vrot.slane %v533_v31, %v1956_v29 }
 0x168   : > { %v550_v42 = vcombine.low %v540_v36, %v547_v37  ;;  %v1607_v43 = vcombine.high %v540_v36, %v547_v37 }
 0x16a   : > { %v557_v50 = vrot.slane %v550_v42, %v1950_v22  ;;  %v565_v51 = vrot.slane %v1607_v43, %v1950_v22 }
 0x16c   : > { %v566_v55 = vcombine.low %v557_v50, %v565_v51  ;;  %v567_v0 = vcombine.high %v557_v50, %v565_v51 }
 0x16e   : > { %v574_v61 = vrot.slane %v566_v55, %v1956_v29  ;;  %v581_v10 = vrot.slane %v567_v0, %v1956_v29 }
 0x170   : > { %v582_v2 = vcombine.high %v574_v61, %v1811_v1  ;;  %v584_v5 = vpack.c.bf16 %v574_v61, %v574_v61  ;;  %v583_v15 = vcombine.high %v581_v10, %v1811_v1  ;;  %v586_v16 = vpack.c.bf16 %v581_v10, %v581_v10 }
 0x172   : > { %v585_v9 = vpack.c.bf16 %v582_v2, %v582_v2  ;;  %v587_v17 = vpack.c.bf16 %v583_v15, %v583_v15 }
 0x1ce   : > { %v591_v27 = vpop.permute.xlu0 %590 }
 0x1d2   : > { %v593_v32 = vpop.permute.xlu1 %592  ;;  %v595_v33 = vpop.permute.xlu0 %594 }
 0x1d3   : > { %v600_v34 = vcombine.low %v589_v26, %v593_v32  ;;  %v608_v35 = vcombine.low %v591_v27, %v595_v33 }
 0x1d5   : > { %v607_v38 = vrot.slane %v600_v34, %v1950_v22  ;;  %v615_v39 = vrot.slane %v608_v35, %v1950_v22 }
 0x1d7   : > { %v616_v40 = vcombine.low %v607_v38, %v615_v39  ;;  %v617_v41 = vcombine.high %v607_v38, %v615_v39 }
 0x1d9   : > { %v624_v44 = vrot.slane %v616_v40, %v1956_v29  ;;  %v631_v45 = vrot.slane %v617_v41, %v1956_v29 }
 0x1db   : > { %v634_v46 = vcombine.low %v624_v44, %v631_v45  ;;  %v1608_v47 = vcombine.high %v624_v44, %v631_v45 }
 0x1dd   : > { %v641_v48 = vrot.slane %v634_v46, %v1950_v22  ;;  %v649_v49 = vrot.slane %v1608_v47, %v1950_v22 }
 0x1df   : > { %v650_v52 = vcombine.low %v641_v48, %v649_v49  ;;  %v651_v53 = vcombine.high %v641_v48, %v649_v49 }
 0x1e1   : > { %v658_v54 = vrot.slane %v650_v52, %v1956_v29  ;;  %v665_v58 = vrot.slane %v651_v53, %v1956_v29 }
 0x1e3   : > { %v668_v56 = vpack.c.bf16 %v658_v54, %v658_v54  ;;  %v666_v57 = vcombine.high %v658_v54, %v1811_v1  ;;  %v667_v63 = vcombine.high %v665_v58, %v1811_v1  ;;  %v670_v4 = vpack.c.bf16 %v665_v58, %v665_v58 }
 0x1e5   : > { %v761_v59 = vsel %vm756_vm2, %v668_v56, 0  ;;  %v669_v60 = vpack.c.bf16 %v666_v57, %v666_v57  ;;  %v671_v6 = vpack.c.bf16 %v667_v63, %v667_v63  ;;  %v853_v8 = vsel %vm756_vm2, %v670_v4, 0 }
 0x1e6   : > { %1678 = vmatpush3.bf16.xpose.msra.mxu1 %v761_v59 }
 0x1e7   : > { %v807_v62 = vsel %vm756_vm2, %v669_v60, 0  ;;  %1689 = vmatprep.subr.bf16.mxu1 %v1811_v1  ;;  %v899_v14 = vsel %vm756_vm2, %v671_v6, 0 }
 0x1e8   : > { %1684 = vmatpush3.bf16.xpose.msra.mxu0 %v807_v62 }
 0x1e9   : > { %1695 = vmatprep.subr.bf16.mxu0 %v1811_v1 }
 0x1ed   : > { %1680 = vmatmul.mubr.msk.bf16.vlgmr.msra.gmra.mrb[0].mxu1 %vm756_vm2, %v584_v5 }
 0x1ee   : > { %1690 = vmatpush3.bf16.xpose.msra.mxu1 %v853_v8  ;;  %1691 = vmatprep.mubr.msk.bf16.mxu1 %vm1812_vm0, %v1811_v1 }
 0x1ef   : > { %1686 = vmatmul.mubr.msk.bf16.vlgmr.msra.gmra.mrb[4].mxu0 %vm756_vm2, %v585_v9  ;;  %1701 = vmatprep.subr.bf16.mxu1 %v1811_v1 }
 0x1f0   : > { %1696 = vmatpush3.bf16.xpose.msra.mxu0 %v899_v14  ;;  %1697 = vmatprep.mubr.msk.bf16.mxu0 %vm1812_vm0, %v1811_v1 }
 0x1f1   : > { %1707 = vmatprep.subr.bf16.mxu0 %v1811_v1 }
 0x1f5   : > { %1692 = vmatmul.mubr.msk.bf16.vlgmr.msra.gmra.mrb[4].mxu1 %vm756_vm2, %v586_v16 }
 0x1f6   : > { %1703 = vmatprep.mubr.msk.bf16.mxu1 %vm1812_vm0, %v1811_v1 }
 0x1f7   : > { %1698 = vmatmul.mubr.msk.bf16.vlgmr.msra.gmra.mrb[8].mxu0 %vm756_vm2, %v587_v17 }
 0x1f8   : > { %1709 = vmatprep.mubr.msk.bf16.mxu0 %vm1812_vm0, %v1811_v1 }
 0x2c0   : > { %v797_v18 = vpop.f32.mrb[0].mxu1 }
 0x2c1   : > { %v1681_v19 = vpop.f32.mrb[1].mxu1  ;;  %v942_v20 = vsel %vm941_vm3, %v797_v18, -inf }
 0x2c2   : > { %943 = vmax.xlane.f32.xlu1 %v942_v20  ;;  %v800_v21 = vpop.f32.mrb[2].mxu1  ;;  %v843_v23 = vpop.f32.mrb[4].mxu0 }
 0x2c3   : > { %v1682_v24 = vpop.f32.mrb[3].mxu1  ;;  %v1687_v25 = vpop.f32.mrb[5].mxu0  ;;  %v945_v26 = vsel %vm941_vm3, %v843_v23, -inf }
 0x2c4   : > { %946 = vmax.xlane.f32.xlu0 %v945_v26  ;;  %v846_v27 = vpop.f32.mrb[6].mxu0 }
 0x2c5   : > { %v1688_v28 = vpop.f32.mrb[7].mxu0 }
 0x2c8   : > { %v889_v30 = vpop.f32.mrb[4].mxu1 }
 0x2c9   : > { %v1693_v31 = vpop.f32.mrb[5].mxu1  ;;  %v948_v32 = vsel %vm941_vm3, %v889_v30, -inf }
 0x2ca   : > { %v892_v33 = vpop.f32.mrb[6].mxu1  ;;  %949 = vmax.xlane.f32.xlu0 %v948_v32  ;;  %v935_v34 = vpop.f32.mrb[8].mxu0 }
 0x2cb   : > { %v1694_v35 = vpop.f32.mrb[7].mxu1  ;;  %v1699_v36 = vpop.f32.mrb[9].mxu0  ;;  %v951_v37 = vsel %vm941_vm3, %v935_v34, -inf }
 0x2cc   : > { %952 = vmax.xlane.f32.xlu1 %v951_v37  ;;  %v938_v38 = vpop.f32.mrb[10].mxu0 }
 0x2cd   : > { %v1700_v39 = vpop.f32.mrb[11].mxu0 }
 0x2dd   : > { %674 = vrot.lane.b32.xlu1 %v1939_v11, %s1819_s24 }
 0x2e0   : > { %672 = vrot.lane.b32.xlu0 %v1933_v7, %s1819_s24 }
 0x34f   : > { %v944_v40 = vpop.xlane.xlu1 %943 }
 0x350   : > { %v954_v41 = vsub.f32 %v797_v18, %v944_v40 }
 0x351   : > { %v947_v42 = vpop.xlane.xlu0 %946 }
 0x352   : > { %v958_v43 = vmul.f32 1.442695, %v954_v41  ;;  %v955_v44 = vsub.f32 %v843_v23, %v947_v42 }
 0x354   : > { %1783 = vpow2.f32 %v958_v43  ;;  %v960_v45 = vmul.f32 1.442695, %v955_v44 }
 0x356   : > { %1785 = vpow2.f32 %v960_v45 }
 0x357   : > { %v950_v11 = vpop.xlane.xlu0 %949 }
 0x358   : > { %v956_v51 = vsub.f32 %v889_v30, %v950_v11 }
 0x359   : > { %v953_v7 = vpop.xlane.xlu1 %952 }
 0x35a   : > { %v957_v50 = vsub.f32 %v935_v34, %v953_v7  ;;  %v962_v53 = vmul.f32 1.442695, %v956_v51 }
 0x35c   : > { %v964_v52 = vmul.f32 1.442695, %v957_v50 }
 0x35d   : > { %v675_v57 = vpop.permute.xlu1 %674 }
 0x35e   : > { %v1784_v46 = vpop.eup %1783  ;;  %1787 = vpow2.f32 %v964_v52 }
 0x35f   : > { %v966_v47 = vsel %vm941_vm3, %v1784_v46, 0.0  ;;  %1789 = vpow2.f32 %v962_v53 }
 0x360   : > { %v1786_v48 = vpop.eup %1785  ;;  %967 = vadd.xlane.f32.xlu0 %v966_v47 }
 0x361   : > { %v969_v49 = vsel %vm941_vm3, %v1786_v48, 0.0 }
 0x362   : > { %970 = vadd.xlane.f32.xlu1 %v969_v49 }
 0x368   : > { %v2006_v54 = vpop.eup %1787 }
 0x369   : > { %v2008_v55 = vpop.eup %1789  ;;  %v975_v56 = vsel %vm941_vm3, %v2006_v54, 0.0 }
 0x373   : > { %676 = vrot.lane.b32.xlu1 %v1944_v13, %s1819_s24  ;;  %v972_v13 = vsel %vm941_vm3, %v2008_v55, 0.0 }
 0x376   : > { %678 = vrot.lane.b32.xlu0 %v1942_v12, %s1819_s24  ;;  %v673_v12 = vpop.permute.xlu0 %672 }
 0x395   : > { %976 = vadd.xlane.f32.xlu0 %v975_v56 }
 0x397   : > { %973 = vadd.xlane.f32.xlu1 %v972_v13 }
 0x3ed   : > { %v968_v58 = vpop.xlane.xlu0 %967 }
 0x3ee   : > { %1791 = vrcp.f32 %v968_v58 }
 0x3ef   : > { %v971_v59 = vpop.xlane.xlu1 %970 }
 0x3f0   : > { %1793 = vrcp.f32 %v971_v59  ;;  %v1775_v59 = vld [vmem:[%s2129_s3] sm:$0xff]  }
 0x3f1   : > { %v679_v60 = vpop.permute.xlu0 %678 }
 0x3f2   : > { %v692_v61 = vcombine.low %v675_v57, %v679_v60 }
 0x3f3   : > { %v677_v62 = vpop.permute.xlu1 %676 }
 0x3f4   : > { %v684_v63 = vcombine.low %v673_v12, %v677_v62  ;;  %v699_v0 = vrot.slane %v692_v61, %v1950_v22 }
 0x3f6   : > { %v691_v2 = vrot.slane %v684_v63, %v1950_v22 }
 0x3f8   : > { %v700_v4 = vcombine.low %v691_v2, %v699_v0  ;;  %v701_v5 = vcombine.high %v691_v2, %v699_v0  ;;  %v1792_v18 = vpop.eup %1791  ;;  %v1776_v2 = vld [vmem:[%s2129_s3 + $0x8] sm:$0xff]  }
 0x3f9   : > { %v982_v23 = vmul.f32 %v1792_v18, %v1784_v46 }
 0x3fa   : > { %v708_v6 = vrot.slane %v700_v4, %v1956_v29  ;;  %v715_v8 = vrot.slane %v701_v5, %v1956_v29  ;;  %v1794_v21 = vpop.eup %1793 }
 0x3fb   : > { %v983_v27 = vmul.f32 %v1794_v21, %v1786_v48  ;;  %v986_v33 = vpack.c.bf16 %v982_v23, %v982_v23 }
 0x3fc   : > { %v718_v9 = vcombine.low %v708_v6, %v715_v8  ;;  %v1609_v10 = vcombine.high %v708_v6, %v715_v8 }
 0x3fd   : > { %v987_v36 = vpack.c.bf16 %v983_v27, %v983_v27 }
 0x3fe   : > { %v725_v14 = vrot.slane %v718_v9, %v1950_v22  ;;  %v733_v15 = vrot.slane %v1609_v10, %v1950_v22 }
 0x400   : > { %v734_v16 = vcombine.low %v725_v14, %v733_v15  ;;  %v735_v17 = vcombine.high %v725_v14, %v733_v15 }
 0x402   : > { %v742_v19 = vrot.slane %v734_v16, %v1956_v29  ;;  %v749_v20 = vrot.slane %v735_v17, %v1956_v29 }
 0x404   : > { %v752_v24 = vpack.c.bf16 %v742_v19, %v742_v19  ;;  %v750_v25 = vcombine.high %v742_v19, %v1811_v1  ;;  %v751_v26 = vcombine.high %v749_v20, %v1811_v1  ;;  %v754_v31 = vpack.c.bf16 %v749_v20, %v749_v20 }
 0x406   : > { %v996_v28 = vsel %vm994_vm4, %v752_v24, 0  ;;  %v753_v30 = vpack.c.bf16 %v750_v25, %v750_v25  ;;  %v755_v34 = vpack.c.bf16 %v751_v26, %v751_v26  ;;  %v1088_v35 = vsel %vm994_vm4, %v754_v31, 0  ;;  %v1619_v26 = vld [vmem:[%s2130_s4] ss:$0 sm:$0xff] }
 0x407   : > { %1702 = vmatpush3.bf16.msra.mxu1 %v996_v28 }
 0x408   : > { %v1042_v32 = vsel %vm994_vm4, %v753_v30, 0  ;;  %1713 = vmatprep.subr.bf16.mxu1 %v1811_v1  ;;  %v1134_v37 = vsel %vm994_vm4, %v755_v34, 0 }
 0x409   : > { %1708 = vmatpush3.bf16.msra.mxu0 %v1042_v32 }
 0x40a   : > { %1704 = vmatmul.mubr.msk.bf16.vlgmr.msra.gmra.mrb[8].mxu1 %vm990_vm5, %v986_v33  ;;  %1719 = vmatprep.subr.bf16.mxu0 %v1811_v1 }
 0x40b   : > { %1714 = vmatpush3.bf16.msra.mxu1 %v1088_v35  ;;  %1715 = vmatprep.mubr.msk.bf16.mxu1 %vm1812_vm0, %v1811_v1 }
 0x40c   : > { %1710 = vmatmul.mubr.msk.bf16.vlgmr.msra.gmra.mrb[12].mxu0 %vm990_vm5, %v987_v36  ;;  %1725 = vmatprep.subr.bf16.mxu1 %v1811_v1 }
 0x40d   : > { %1720 = vmatpush3.bf16.msra.mxu0 %v1134_v37  ;;  %1721 = vmatprep.mubr.msk.bf16.mxu0 %vm1812_vm0, %v1811_v1 }
 0x40e   : > { %1733 = vmatprep.subr.bf16.mxu0 %v1811_v1 }
 0x422   : > { %v977_v38 = vpop.xlane.xlu0 %976 }
 0x423   : > { %1795 = vrcp.f32 %v977_v38 }
 0x424   : > { %v974_v39 = vpop.xlane.xlu1 %973 }
 0x425   : > { %1797 = vrcp.f32 %v974_v39 }
 0x42d   : > { %v1796_v40 = vpop.eup %1795 }
 0x42e   : > { %v985_v41 = vmul.f32 %v1796_v40, %v2006_v54  ;;  %v1777_v40 = vld [vmem:[%s2131_s5] sm:$0xff]  }
 0x42f   : > { %v1798_v42 = vpop.eup %1797 }
 0x430   : > { %v984_v43 = vmul.f32 %v1798_v42, %v2008_v55  ;;  %v989_v44 = vpack.c.bf16 %v985_v41, %v985_v41  ;;  %v1779_v41 = vld [vmem:[%s2133_s7] sm:$0xff]   ;;  %v1780_v42 = vld [vmem:[%s2133_s7 + $0x8] sm:$0xff]  }
 0x432   : > { %1722 = vmatmul.mubr.msk.bf16.vlgmr.msra.gmra.mrb[16].mxu0 %vm990_vm5, %v989_v44  ;;  %v988_v45 = vpack.c.bf16 %v984_v43, %v984_v43 }
 0x433   : > { %1737 = vmatprep.mubr.msk.bf16.mxu0 %vm1812_vm0, %v1811_v1  ;;  %1734 = vmatpush3.bf16.msra.mxu0 %v1777_v40 }
 0x434   : > { %1716 = vmatmul.mubr.msk.bf16.vlgmr.msra.gmra.mrb[12].mxu1 %vm990_vm5, %v988_v45  ;;  %1735 = vmatprep.subr.bf16.mxu0 %v1811_v1 }
 0x435   : > { %1729 = vmatprep.mubr.msk.bf16.mxu1 %vm1812_vm0, %v1811_v1  ;;  %1726 = vmatpush3.bf16.msra.mxu1 %v1775_v59 }
 0x436   : > { %1727 = vmatprep.subr.bf16.mxu1 %v1811_v1 }
 0x439   : > { %1728 = vmatpush3.bf16.msra.mxu1 %v1776_v2 }
 0x43a   : > { %1741 = vmatprep.subr.bf16.mxu1 %v1811_v1 }
 0x4dd   : > { %v1032_v46 = vpop.f32.mrb[8].mxu1 }
 0x4de   : > { %v1705_v47 = vpop.f32.mrb[9].mxu1 }
 0x4df   : > { %v1035_v48 = vpop.f32.mrb[10].mxu1  ;;  %v1078_v49 = vpop.f32.mrb[12].mxu0  ;;  %v1623_v47 = vld [vmem:[%s2135_s9] ss:$0 sm:$0xff] }
 0x4e0   : > { %v1706_v7 = vpop.f32.mrb[11].mxu1  ;;  %v1711_v11 = vpop.f32.mrb[13].mxu0 }
 0x4e1   : > { %v1081_v50 = vpop.f32.mrb[14].mxu0 }
 0x4e2   : > { %v1712_v51 = vpop.f32.mrb[15].mxu0 }
 0x4e3   : > { %v1781_v51 = vld [vmem:[%s2133_s7 + $0x10] sm:$0xff]  }
 0x505   : > { %v1170_v52 = vpop.f32.mrb[16].mxu0 }
 0x506   : > { %v1184_v53 = vcombine.low %v1078_v49, %v1170_v52  ;;  %v1723_v54 = vpop.f32.mrb[17].mxu0  ;;  %v1624_v49 = vld [vmem:[%s2136_s10] ss:$0 sm:$0xff]  ;;  %v1782_v52 = vld [vmem:[%s2133_s7 + $0x18] sm:$0xff]  }
 0x507   : > { %v1124_v55 = vpop.f32.mrb[12].mxu1  ;;  %v1173_v56 = vpop.f32.mrb[18].mxu0 }
 0x508   : > { %v1176_v13 = vcombine.low %v1032_v46, %v1124_v55  ;;  %v1717_v12 = vpop.f32.mrb[13].mxu1  ;;  %v1724_v57 = vpop.f32.mrb[19].mxu0  ;;  %v1191_v60 = vrot.slane %v1184_v53, %v1950_v22  ;;  %v1625_v53 = vld [vmem:[%s2132_s6] ss:$0 sm:$0xff] }
 0x509   : > { %v1127_v58 = vpop.f32.mrb[14].mxu1 }
 0x50a   : > { %v1183_v61 = vrot.slane %v1176_v13, %v1950_v22  ;;  %v1718_v62 = vpop.f32.mrb[15].mxu1 }
 0x50c   : > { %v1192_v63 = vcombine.low %v1183_v61, %v1191_v60  ;;  %v1193_v0 = vcombine.high %v1183_v61, %v1191_v60 }
 0x50e   : > { %v1200_v4 = vrot.slane %v1192_v63, %v1956_v29  ;;  %v1207_v5 = vrot.slane %v1193_v0, %v1956_v29 }
 0x510   : > { %v1210_v6 = vcombine.low %v1200_v4, %v1207_v5  ;;  %v1618_v8 = vcombine.high %v1200_v4, %v1207_v5 }
 0x512   : > { %v1217_v9 = vrot.slane %v1210_v6, %v1950_v22  ;;  %v1225_v10 = vrot.slane %v1618_v8, %v1950_v22 }
 0x514   : > { %v1227_v14 = vcombine.high %v1217_v9, %v1225_v10  ;;  %v1226_v15 = vcombine.low %v1217_v9, %v1225_v10 }
 0x516   : > { %v1241_v16 = vrot.slane %v1227_v14, %v1956_v29  ;;  %v1234_v17 = vrot.slane %v1226_v15, %v1956_v29 }
 0x518   : > { %1249 = vrot.lane.b32.xlu1 %v1241_v16, %s1820_s15  ;;  %v1242_v18 = vcombine.high %v1234_v17, %v1811_v1  ;;  %v1243_v19 = vcombine.high %v1241_v16, %v1811_v1 }
 0x51a   : > { %1245 = vrot.lane.b32.xlu0 %v1242_v18, %s1821_s16 }
 0x51c   : > { %1253 = vrot.lane.b32.xlu1 %v1243_v19, %s1822_s17  ;;  %v1636_v19 = vld [vmem:[%s2138_s12] ss:$0 sm:$0xff] }
 0x58a   : > { %v1250_v20 = vpop.permute.xlu1 %1249 }
 0x58c   : > { %v1246_v21 = vpop.permute.xlu0 %1245 }
 0x58d   : > { %v1256_v22 = vsel %vm756_vm2, %v1234_v17, %v1246_v21  ;;  %v1635_v17 = vld [vmem:[%s2137_s11] ss:$0 sm:$0xff] }
 0x58e   : > { %v1254_v23 = vpop.permute.xlu1 %1253  ;;  %v1258_v24 = vsel %vm1257_vm6, %v1256_v22, %v1250_v20 }
 0x58f   : > { %v1260_v25 = vsel %vm1259_vm7, %v1258_v24, %v1254_v23 }
 0x590   : > { %v1261_v29 = vpack.c.bf16 %v1260_v25, %v1260_v25 }
 0x592   : > { %1730 = vmatmul.mubr.msk.bf16.vlgmr.msra.gmra.mrb[16].mxu1 %vm462_vm1, %v1261_v29 }
 0x593   : > { %1749 = vmatprep.mubr.msk.bf16.mxu1 %vm1812_vm0, %v1811_v1  ;;  %1742 = vmatpush3.bf16.msra.mxu1 %v1779_v41 }
 0x594   : > { %1743 = vmatprep.subr.bf16.mxu1 %v1811_v1 }
 0x597   : > { %1744 = vmatpush3.bf16.msra.mxu1 %v1780_v42 }
 0x598   : > { %1745 = vmatprep.subr.bf16.mxu1 %v1811_v1 }
 0x59b   : > { %1746 = vmatpush3.bf16.msra.mxu1 %v1781_v51 }
 0x59c   : > { %1747 = vmatprep.subr.bf16.mxu1 %v1811_v1  ;;  %v1629_v1 = vld [vmem:[%s2134_s8] ss:$0 sm:$0xff] }
 0x59f   : > { %1748 = vmatpush3.bf16.msra.mxu1 %v1782_v52 }
 0x665   : > { %v1322_v27 = vpop.f32.mrb[16].mxu1 }
 0x666   : > { %v1323_v28 = vadd.f32 %v1619_v26, %v1322_v27  ;;  %v1731_v30 = vpop.f32.mrb[17].mxu1 }
 0x667   : > { %v1325_v31 = vpop.f32.mrb[18].mxu1 }
 0x668   : > { %v1732_v32 = vpop.f32.mrb[19].mxu1  ;;  %v1328_v33 = vadd.f32 %v1323_v28, %v1923_v3  ;;  %v1778_v3 = vld [vmem:[%s2131_s5 + $0x8] sm:$0xff]  }
 0x669   : > { %1736 = vmatpush3.bf16.msra.mxu0 %v1778_v3 }
 0x66a   : > { %v1332_v34 = vsel %vm1331_vm8, %v1328_v33, 0.0 }
 0x66b   : > { %1333 = vadd.xlane.f32.xlu0 %v1332_v34 }
 0x6f8   : > { %v1334_v35 = vpop.xlane.xlu0 %1333 }
 0x6f9   : > { %v1336_v36 = vmul.f32 0.03125, %v1334_v35 }
 0x6fb   : > { %v1337_v37 = vsub.f32 %v1328_v33, %v1336_v36 }
 0x6fd   : > { %v1338_v38 = vmul.f32 %v1337_v37, %v1337_v37 }
 0x6ff   : > { %v1339_v39 = vsel %vm1331_vm8, %v1338_v38, 0.0 }
 0x700   : > { %1340 = vadd.xlane.f32.xlu1 %v1339_v39 }
 0x78d   : > { %v1341_v43 = vpop.xlane.xlu1 %1340 }
 0x78e   : > { %v1342_v44 = vmul.f32 0.03125, %v1341_v43 }
 0x790   : > { %v1343_v45 = vadd.f32 1e-05, %v1342_v44 }
 0x792   : > { %1799 = vrsqrt.f32 %v1343_v45 }
 0x79c   : > { %v1800_v46 = vpop.eup %1799 }
 0x79d   : > { %v1345_v48 = vmul.f32 %v1800_v46, %v1337_v37 }
 0x79f   : > { %v1352_v7 = vmul.f32 %v1623_v47, %v1345_v48 }
 0x7a1   : > { %v1359_v11 = vadd.f32 %v1624_v49, %v1352_v7 }
 0x7a3   : > { %v1360_v50 = vpack.c.bf16 %v1359_v11, %v1359_v11 }
 0x7a5   : > { %1738 = vmatmul.mubr.msk.bf16.vlgmr.msra.gmra.mrb[20].mxu0 %vm462_vm1, %v1360_v50 }
 0x878   : > { %v1421_v54 = vpop.f32.mrb[20].mxu0 }
 0x879   : > { %v1422_v55 = vadd.f32 %v1625_v53, %v1421_v54  ;;  %v1739_v56 = vpop.f32.mrb[21].mxu0 }
 0x87a   : > { %v1424_v13 = vpop.f32.mrb[22].mxu0 }
 0x87b   : > { %v1427_v12 = vmax.f32 %v1422_v55, 0.0  ;;  %v1740_v57 = vpop.f32.mrb[23].mxu0 }
 0x87d   : > { %v1428_v58 = vpack.c.bf16 %v1427_v12, %v1427_v12 }
 0x87f   : > { %1750 = vmatmul.mubr.msk.bf16.vlgmr.msra.gmra.mrb[20].mxu1 %vm1468_vm9, %v1428_v58 }
 0x952   : > { %v1506_v59 = vpop.f32.mrb[20].mxu1 }
 0x953   : > { %v1507_v60 = vadd.f32 %v1629_v1, %v1506_v59  ;;  %v1751_v61 = vpop.f32.mrb[21].mxu1 }
 0x954   : > { %v1509_v62 = vpop.f32.mrb[22].mxu1 }
 0x955   : > { %v1752_v63 = vpop.f32.mrb[23].mxu1  ;;  %v1512_v0 = vadd.f32 %v1507_v60, %v1359_v11 }
 0x957   : > { %v1515_v2 = vsel %vm1331_vm8, %v1512_v0, 0.0 }
 0x958   : > { %1516 = vadd.xlane.f32.xlu0 %v1515_v2 }
 0x9e5   : > { %v1517_v4 = vpop.xlane.xlu0 %1516 }
 0x9e6   : > { %v1518_v5 = vmul.f32 0.03125, %v1517_v4 }
 0x9e8   : > { %v1519_v6 = vsub.f32 %v1512_v0, %v1518_v5 }
 0x9ea   : > { %v1520_v8 = vmul.f32 %v1519_v6, %v1519_v6 }
 0x9ec   : > { %v1521_v9 = vsel %vm1331_vm8, %v1520_v8, 0.0 }
 0x9ed   : > { %1522 = vadd.xlane.f32.xlu0 %v1521_v9 }
 0xa7a   : > { %v1523_v10 = vpop.xlane.xlu0 %1522 }
 0xa7b   : > { %v1524_v14 = vmul.f32 0.03125, %v1523_v10 }
 0xa7d   : > { %v1525_v15 = vadd.f32 1e-05, %v1524_v14 }
 0xa7f   : > { %1801 = vrsqrt.f32 %v1525_v15 }
 0xa89   : > { %v1802_v16 = vpop.eup %1801 }
 0xa8a   : > { %v1527_v18 = vmul.f32 %v1802_v16, %v1519_v6 }
 0xa8c   : > { %v1534_v20 = vmul.f32 %v1635_v17, %v1527_v18 }
 0xa8e   : > { %v1541_v21 = vadd.f32 %v1636_v19, %v1534_v20 }
 0xa90   : > { %1542 = vst.msk [vmem:[%s435_s18] sm:$0xf] %vm1331_vm8, %v1541_v21 }
 0xa91 PF: > { %s23_s25 = sadd.s32 1, %s1809_s25  }
 0xa92   : > { %p20_p4 = scmp.ge.s32.totalorder %s23_s25, 4  }
 0xa94   :  { %22 = sbr.rel (!%p20_p4) target bundleno = 1 (0x1), region = 102 }

// kernel: encoder_stack_forward.3
= control target key start
LH: loop header
LB: loop body
LE: loop exit
PB: predicated region body
PF: predicated region fallthrough
CT: control target
= control target key end

     0   :  { %s2166_s25 = smov 0   ;;  %s2435_s0 = inlined_call_operand.vmem [shape: f32[2,8,32], index: 0, kind: input, shape index: {}]   ;;  %s2436_s1 = inlined_call_operand.vmem [shape: bf16[32,96], index: 1, kind: input, shape index: {}]   ;;  %s2437_s2 = inlined_call_operand.vmem [shape: f32[1,96], index: 2, kind: input, shape index: {}]   ;;  %s2438_s3 = inlined_call_operand.vmem [shape: bf16[32,32], index: 3, kind: input, shape index: {}]   ;;  %s2439_s4 = inlined_call_operand.vmem [shape: f32[1,32], index: 4, kind: input, shape index: {}]   ;;  %s2440_s5 = inlined_call_operand.vmem [shape: bf16[32,64], index: 5, kind: input, shape index: {}]   ;;  %s2441_s6 = inlined_call_operand.vmem [shape: f32[1,64], index: 6, kind: input, shape index: {}]   ;;  %s2442_s7 = inlined_call_operand.vmem [shape: bf16[64,32], index: 7, kind: input, shape index: {}]   ;;  %s2443_s8 = inlined_call_operand.vmem [shape: f32[1,32], index: 8, kind: input, shape index: {}]   ;;  %s2444_s9 = inlined_call_operand.vmem [shape: f32[1,32], index: 9, kind: input, shape index: {}]   ;;  %s2445_s10 = inlined_call_operand.vmem [shape: f32[1,32], index: 10, kind: input, shape index: {}]   ;;  %s2446_s11 = inlined_call_operand.vmem [shape: f32[1,32], index: 11, kind: input, shape index: {}]   ;;  %s2447_s12 = inlined_call_operand.vmem [shape: f32[1,32], index: 12, kind: input, shape index: {}]   ;;  %s2448_s13 = inlined_call_operand.vmem [shape: f32[2,8,32], index: 13, kind: output, shape index: {}]  }
   0x1 LB: > { %s1865_s26 = sadd.s32 4294967295, %s2082_s25   ;;  %p1869_p0 = scmp.ge.s32.totalorder %s2082_s25, 1  ;;  %s2082_s25 = sphi %s2166_s25, %s23_s25  }
   0x2   : > { %p386_p1 = scmp.lt.s32.totalorder %s2082_s25, 3 }
   0x4   : > { %p387_p2 = pnand %p1869_p0, %p386_p1 }
   0x5   : > { %v2046_v0 = vld [vmem:[%s2436_s1] sm:$0xff] (!%p387_p2)   ;;  %v2084_v1 = vmov (!%p387_p2), 0.0   ;;  %v2047_v2 = vld [vmem:[%s2436_s1 + $0x8] sm:$0xff] (!%p387_p2)   ;;  %vm2085_vm0 = vmmov (!%p387_p2), 0   ;;  %p428_p3 = scmp.lt.s32.totalorder (!%p387_p2), %s1865_s26, 1  ;;  %vm462_vm1 = vcmask (!%p387_p2), 261120   ;;  %v521_v16 = vlaneseq (!%p387_p2) }
   0x6   : > { %390 = sbr.rel (%p387_p2) target bundleno = 2708 (0xa94), region = 72  ;;  %1942 = vmatprep.subr.bf16.mxu0 (!%p387_p2), %v2084_v1  ;;  %1950 = vmatprep.subr.bf16.mxu1 (!%p387_p2), %v2084_v1  ;;  %v1872_v5 = vld [vmem:[%s2437_s2] ss:$0 sm:$0xff] (!%p387_p2)  ;;  %s2086_s20 = smov (!%p387_p2), 104   ;;  %v2090_v14 = vmov (!%p387_p2), 1983009808  }
   0x7   : > { %1943 = vmatpush3.bf16.msra.mxu0 (!%p387_p2), %v2046_v0  ;;  %1946 = vmatprep.mubr.msk.bf16.mxu0 (!%p387_p2), %vm2085_vm0, %v2084_v1  ;;  %s2087_s21 = smov (!%p387_p2), 120   ;;  %s2088_s22 = smov (!%p387_p2), 96   ;;  %v519_v15 = vunpack.c.l.s4 (!%p387_p2), %v2090_v14  ;;  %v522_v18 = vshrl.u32 (!%p387_p2), %v521_v16, 7  ;;  %v2091_v19 = vmov (!%p387_p2), 1934713408   ;;  %vm960_vm2 = vcmask (!%p387_p2), 64512  }
   0x8   : > { %1944 = vmatprep.subr.bf16.mxu0 (!%p387_p2), %v2084_v1  ;;  %1952 = vmatprep.mubr.msk.bf16.mxu1 (!%p387_p2), %vm2085_vm0, %v2084_v1  ;;  %s2089_s23 = smov (!%p387_p2), 112   ;;  %v551_v20 = vunpack.c.l.s4 (!%p387_p2), %v2091_v19  ;;  %s2092_s24 = smov (!%p387_p2), 64   ;;  %vm1196_vm3 = vcmask (!%p387_p2), 1043456   ;;  %vm1527_vm4 = vcmask (!%p387_p2), 130048   ;;  %vm1529_vm5 = vcmask (!%p387_p2), 195584  }
   0x9   : > { %v520_v17 = vunpack.c.0.s8 (!%p387_p2), %v519_v15  ;;  %s2093_s15 = smov (!%p387_p2), 16   ;;  %s2094_s16 = smov (!%p387_p2), 8   ;;  %vm1737_vm6 = vcmask (!%p387_p2), 523264  }
   0xa   : > { %v552_v26 = vunpack.c.0.s8 (!%p387_p2), %v551_v20 }
   0xb   : > { %1945 = vmatpush3.bf16.msra.mxu0 (!%p387_p2), %v2047_v2  ;;  %v2225_v23 = vsub.s32 (!%p387_p2), %v520_v17, %v522_v18 }
   0xc   : > { %1956 = vmatprep.subr.bf16.mxu0 (!%p387_p2), %v2084_v1  ;;  %v2235_v33 = vsub.s32 (!%p387_p2), %v552_v26, %v522_v18 }
   0xd   : > { %s2450_s26 = smov (!%p428_p3, %s1865_s26), 1 }
   0xe   : > { %s1870_s14 = sshll.u32 %s2450_s26, 3 }
   0xf   : > { %s431_s17 = scalar_lea.vmem %s2435_s0, %s1870_s14  ;;  %s435_s18 = scalar_lea.vmem %s2448_s13, %s1870_s14 }
  0x10   : > { %v2196_v3 = vld [vmem:[%s431_s17] sm:$0xff]  ;;  %s2095_s17 = smov 24  }
  0x11   : > { %v438_v4 = vpack.c.bf16 %v2196_v3, %v2196_v3 }
  0x13   : > { %1947 = vmatmul.mubr.msk.bf16.vlgmr.msra.gmra.mrb[0].mxu0 %vm462_vm1, %v438_v4 }
  0x14   : > { %1958 = vmatprep.mubr.msk.bf16.mxu0 %vm2085_vm0, %v2084_v1 }
  0xe6   : > { %v500_v6 = vpop.f32.mrb[0].mxu0 }
  0xe7   : > { %v2206_v7 = vadd.f32 %v1872_v5, %v500_v6  ;;  %v1948_v8 = vpop.f32.mrb[1].mxu0 }
  0xe8   : > { %v503_v9 = vpop.f32.mrb[2].mxu0 }
  0xe9   : > { %513 = vrot.lane.b32.xlu1 %v2206_v7, %s2086_s20  ;;  %507 = vrot.lane.b32.xlu0 %v2206_v7, %s2087_s21  ;;  %v1949_v10 = vpop.f32.mrb[3].mxu0 }
  0xed   : > { %656 = vrot.lane.b32.xlu1 %v2206_v7, %s2088_s22  ;;  %510 = vrot.lane.b32.xlu0 %v2206_v7, %s2089_s23 }
 0x15b   : > { %v2212_v11 = vpop.permute.xlu0 %507  ;;  %v2215_v12 = vpop.permute.xlu1 %513 }
 0x15c   : > { %658 = vrot.lane.b32.xlu0 %v2212_v11, %s2088_s22  ;;  %v532_v24 = vcombine.low %v2212_v11, %v2215_v12  ;;  %v533_v25 = vcombine.high %v2212_v11, %v2215_v12 }
 0x15e   : > { %v540_v29 = vrot.slane %v532_v24, %v2225_v23  ;;  %v547_v30 = vrot.slane %v533_v25, %v2225_v23 }
 0x15f   : > { %v2217_v13 = vpop.permute.xlu0 %510  ;;  %v657_v31 = vpop.permute.xlu1 %656 }
 0x160   : > { %662 = vrot.lane.b32.xlu0 %v2215_v12, %s2088_s22  ;;  %660 = vrot.lane.b32.xlu1 %v2217_v13, %s2088_s22  ;;  %v516_v21 = vcombine.low %v2206_v7, %v2217_v13  ;;  %v517_v22 = vcombine.high %v2206_v7, %v2217_v13 }
 0x162   : > { %v524_v27 = vrot.slane %v516_v21, %v2225_v23  ;;  %v531_v28 = vrot.slane %v517_v22, %v2225_v23 }
 0x164   : > { %v548_v34 = vcombine.low %v524_v27, %v540_v29  ;;  %v549_v35 = vcombine.high %v524_v27, %v540_v29  ;;  %v564_v36 = vcombine.low %v531_v28, %v547_v30  ;;  %v565_v37 = vcombine.high %v531_v28, %v547_v30 }
 0x166   : > { %v556_v44 = vrot.slane %v548_v34, %v2235_v33  ;;  %v563_v45 = vrot.slane %v549_v35, %v2235_v33  ;;  %v572_v46 = vrot.slane %v564_v36, %v2235_v33  ;;  %v579_v47 = vrot.slane %v565_v37, %v2235_v33 }
 0x168   : > { %v584_v56 = vcombine.low %v556_v44, %v563_v45  ;;  %v1876_v57 = vcombine.high %v556_v44, %v563_v45  ;;  %v600_v58 = vcombine.low %v572_v46, %v579_v47  ;;  %v1877_v59 = vcombine.high %v572_v46, %v579_v47 }
 0x16a   : > { %v591_v6 = vrot.slane %v584_v56, %v2225_v23  ;;  %v599_v8 = vrot.slane %v1876_v57, %v2225_v23  ;;  %v607_v9 = vrot.slane %v600_v58, %v2225_v23  ;;  %v615_v10 = vrot.slane %v1877_v59, %v2225_v23 }
 0x16c   : > { %v616_v25 = vcombine.low %v591_v6, %v599_v8  ;;  %v632_v26 = vcombine.low %v607_v9, %v615_v10 }
 0x16e   : > { %v624_v34 = vrot.slane %v616_v25, %v2235_v33  ;;  %v640_v35 = vrot.slane %v632_v26, %v2235_v33 }
 0x1ce   : > { %v659_v32 = vpop.permute.xlu0 %658 }
 0x1d2   : > { %v661_v38 = vpop.permute.xlu1 %660  ;;  %v663_v39 = vpop.permute.xlu0 %662 }
 0x1d3   : > { %v668_v40 = vcombine.low %v657_v31, %v661_v38  ;;  %v669_v41 = vcombine.high %v657_v31, %v661_v38  ;;  %v684_v42 = vcombine.low %v659_v32, %v663_v39  ;;  %v685_v43 = vcombine.high %v659_v32, %v663_v39 }
 0x1d5   : > { %v676_v48 = vrot.slane %v668_v40, %v2225_v23  ;;  %v683_v49 = vrot.slane %v669_v41, %v2225_v23  ;;  %v692_v50 = vrot.slane %v684_v42, %v2225_v23  ;;  %v699_v51 = vrot.slane %v685_v43, %v2225_v23 }
 0x1d6   : > { %v617_v40 = vcombine.high %v591_v6, %v599_v8  ;;  %v633_v41 = vcombine.high %v607_v9, %v615_v10  ;;  %v648_v42 = vcombine.low %v624_v34, %v640_v35  ;;  %v649_v43 = vcombine.high %v624_v34, %v640_v35 }
 0x1d7   : > { %v700_v52 = vcombine.low %v676_v48, %v692_v50  ;;  %v701_v53 = vcombine.high %v676_v48, %v692_v50  ;;  %v716_v54 = vcombine.low %v683_v49, %v699_v51  ;;  %v717_v55 = vcombine.high %v683_v49, %v699_v51 }
 0x1d8   : > { %v652_v46 = vpack.c.bf16 %v648_v42, %v648_v42  ;;  %v653_v47 = vpack.c.bf16 %v649_v43, %v649_v43  ;;  %v631_v48 = vrot.slane %v617_v40, %v2235_v33  ;;  %v647_v49 = vrot.slane %v633_v41, %v2235_v33 }
 0x1d9   : > { %v708_v60 = vrot.slane %v700_v52, %v2235_v33  ;;  %v715_v61 = vrot.slane %v701_v53, %v2235_v33  ;;  %v724_v62 = vrot.slane %v716_v54, %v2235_v33  ;;  %v731_v63 = vrot.slane %v717_v55, %v2235_v33 }
 0x1da   : > { %v650_v52 = vcombine.low %v631_v48, %v647_v49  ;;  %v651_v53 = vcombine.high %v631_v48, %v647_v49 }
 0x1db   : > { %v736_v0 = vcombine.low %v708_v60, %v715_v61  ;;  %v1878_v2 = vcombine.high %v708_v60, %v715_v61  ;;  %v752_v4 = vcombine.low %v724_v62, %v731_v63  ;;  %v1879_v5 = vcombine.high %v724_v62, %v731_v63 }
 0x1dc   : > { %v654_v54 = vpack.c.bf16 %v650_v52, %v650_v52  ;;  %v655_v55 = vpack.c.bf16 %v651_v53, %v651_v53 }
 0x1dd   : > { %v743_v14 = vrot.slane %v736_v0, %v2225_v23  ;;  %v751_v15 = vrot.slane %v1878_v2, %v2225_v23  ;;  %v759_v16 = vrot.slane %v752_v4, %v2225_v23  ;;  %v767_v17 = vrot.slane %v1879_v5, %v2225_v23 }
 0x1df   : > { %v768_v18 = vcombine.low %v743_v14, %v751_v15  ;;  %v784_v19 = vcombine.low %v759_v16, %v767_v17  ;;  %v769_v20 = vcombine.high %v743_v14, %v751_v15  ;;  %v785_v21 = vcombine.high %v759_v16, %v767_v17 }
 0x1e1   : > { %v776_v22 = vrot.slane %v768_v18, %v2235_v33  ;;  %v792_v24 = vrot.slane %v784_v19, %v2235_v33  ;;  %v783_v29 = vrot.slane %v769_v20, %v2235_v33  ;;  %v799_v30 = vrot.slane %v785_v21, %v2235_v33 }
 0x1e3   : > { %v800_v27 = vcombine.low %v776_v22, %v792_v24  ;;  %v801_v28 = vcombine.high %v776_v22, %v792_v24  ;;  %v802_v38 = vcombine.low %v783_v29, %v799_v30  ;;  %v803_v39 = vcombine.high %v783_v29, %v799_v30 }
 0x1e5   : > { %v804_v31 = vpack.c.bf16 %v800_v27, %v800_v27  ;;  %v805_v32 = vpack.c.bf16 %v801_v28, %v801_v28  ;;  %v806_v44 = vpack.c.bf16 %v802_v38, %v802_v38  ;;  %v807_v45 = vpack.c.bf16 %v803_v39, %v803_v39 }
 0x1e7   : > { %v965_v36 = vsel %vm960_vm2, %v804_v31, 0  ;;  %v1011_v37 = vsel %vm960_vm2, %v805_v32, 0  ;;  %v1057_v50 = vsel %vm960_vm2, %v806_v44, 0  ;;  %v1103_v51 = vsel %vm960_vm2, %v807_v45, 0 }
 0x1e8   : > { %1951 = vmatpush3.bf16.xpose.msra.mxu1 %v965_v36  ;;  %1957 = vmatpush3.bf16.xpose.msra.mxu0 %v1011_v37 }
 0x1e9   : > { %1962 = vmatprep.subr.bf16.mxu1 %v2084_v1  ;;  %1968 = vmatprep.subr.bf16.mxu0 %v2084_v1 }
 0x1ef   : > { %1953 = vmatmul.mubr.msk.bf16.vlgmr.msra.gmra.mrb[0].mxu1 %vm960_vm2, %v652_v46  ;;  %1959 = vmatmul.mubr.msk.bf16.vlgmr.msra.gmra.mrb[4].mxu0 %vm960_vm2, %v653_v47 }
 0x1f0   : > { %1963 = vmatpush3.bf16.xpose.msra.mxu1 %v1057_v50  ;;  %1969 = vmatpush3.bf16.xpose.msra.mxu0 %v1103_v51 }
 0x1f1   : > { %1964 = vmatprep.mubr.msk.bf16.mxu1 %vm2085_vm0, %v2084_v1  ;;  %1970 = vmatprep.mubr.msk.bf16.mxu0 %vm2085_vm0, %v2084_v1 }
 0x1f2   : > { %1974 = vmatprep.subr.bf16.mxu1 %v2084_v1  ;;  %1980 = vmatprep.subr.bf16.mxu0 %v2084_v1 }
 0x1f7   : > { %1965 = vmatmul.mubr.msk.bf16.vlgmr.msra.gmra.mrb[4].mxu1 %vm960_vm2, %v654_v54  ;;  %1971 = vmatmul.mubr.msk.bf16.vlgmr.msra.gmra.mrb[8].mxu0 %vm960_vm2, %v655_v55 }
 0x1f8   : > { %1976 = vmatprep.mubr.msk.bf16.mxu1 %vm2085_vm0, %v2084_v1  ;;  %1982 = vmatprep.mubr.msk.bf16.mxu0 %vm2085_vm0, %v2084_v1 }
 0x2c2   : > { %v1001_v56 = vpop.f32.mrb[0].mxu1  ;;  %v1047_v57 = vpop.f32.mrb[4].mxu0 }
 0x2c3   : > { %v1954_v58 = vpop.f32.mrb[1].mxu1  ;;  %v1960_v59 = vpop.f32.mrb[5].mxu0  ;;  %v1145_v60 = vsel %vm960_vm2, %v1001_v56, -inf  ;;  %v1148_v61 = vsel %vm960_vm2, %v1047_v57, -inf }
 0x2c4   : > { %1146 = vmax.xlane.f32.xlu1 %v1145_v60  ;;  %v1004_v62 = vpop.f32.mrb[2].mxu1  ;;  %1149 = vmax.xlane.f32.xlu0 %v1148_v61  ;;  %v1050_v63 = vpop.f32.mrb[6].mxu0 }
 0x2c5   : > { %v1955_v0 = vpop.f32.mrb[3].mxu1  ;;  %v1961_v2 = vpop.f32.mrb[7].mxu0 }
 0x2ca   : > { %v1093_v4 = vpop.f32.mrb[4].mxu1  ;;  %v1139_v5 = vpop.f32.mrb[8].mxu0 }
 0x2cb   : > { %v1966_v6 = vpop.f32.mrb[5].mxu1  ;;  %v1972_v8 = vpop.f32.mrb[9].mxu0  ;;  %v1151_v9 = vsel %vm960_vm2, %v1093_v4, -inf  ;;  %v1154_v10 = vsel %vm960_vm2, %v1139_v5, -inf }
 0x2cc   : > { %v1096_v14 = vpop.f32.mrb[6].mxu1  ;;  %1152 = vmax.xlane.f32.xlu0 %v1151_v9  ;;  %1155 = vmax.xlane.f32.xlu1 %v1154_v10  ;;  %v1142_v15 = vpop.f32.mrb[10].mxu0 }
 0x2cd   : > { %v1967_v16 = vpop.f32.mrb[7].mxu1  ;;  %v1973_v17 = vpop.f32.mrb[11].mxu0 }
 0x2dd   : > { %810 = vrot.lane.b32.xlu1 %v2212_v11, %s2092_s24 }
 0x2e2   : > { %808 = vrot.lane.b32.xlu0 %v2206_v7, %s2092_s24 }
 0x351   : > { %v1147_v18 = vpop.xlane.xlu1 %1146  ;;  %v1150_v19 = vpop.xlane.xlu0 %1149 }
 0x352   : > { %v1157_v20 = vsub.f32 %v1001_v56, %v1147_v18  ;;  %v1158_v21 = vsub.f32 %v1047_v57, %v1150_v19 }
 0x354   : > { %v1161_v22 = vmul.f32 1.442695, %v1157_v20  ;;  %v1163_v24 = vmul.f32 1.442695, %v1158_v21 }
 0x356   : > { %2056 = vpow2.f32 %v1161_v22 }
 0x357   : > { %2058 = vpow2.f32 %v1163_v24 }
 0x359   : > { %v1156_v7 = vpop.xlane.xlu1 %1155  ;;  %v1153_v28 = vpop.xlane.xlu0 %1152 }
 0x35a   : > { %v1160_v29 = vsub.f32 %v1139_v5, %v1156_v7  ;;  %v1159_v30 = vsub.f32 %v1093_v4, %v1153_v28 }
 0x35c   : > { %v1167_v31 = vmul.f32 1.442695, %v1160_v29  ;;  %v1165_v32 = vmul.f32 1.442695, %v1159_v30 }
 0x35d   : > { %v811_v37 = vpop.permute.xlu1 %810 }
 0x35e   : > { %2060 = vpow2.f32 %v1167_v31 }
 0x35f   : > { %2062 = vpow2.f32 %v1165_v32 }
 0x360   : > { %v2291_v25 = vpop.eup %2056 }
 0x361   : > { %v2293_v26 = vpop.eup %2058  ;;  %v1169_v27 = vsel %vm960_vm2, %v2291_v25, 0.0 }
 0x362   : > { %1170 = vadd.xlane.f32.xlu0 %v1169_v27  ;;  %v1172_v11 = vsel %vm960_vm2, %v2293_v26, 0.0 }
 0x363   : > { %1173 = vadd.xlane.f32.xlu1 %v1172_v11 }
 0x368   : > { %v2301_v34 = vpop.eup %2060 }
 0x369   : > { %v2303_v35 = vpop.eup %2062  ;;  %v1178_v36 = vsel %vm960_vm2, %v2301_v34, 0.0 }
 0x374   : > { %812 = vrot.lane.b32.xlu1 %v2217_v13, %s2092_s24  ;;  %v1175_v13 = vsel %vm960_vm2, %v2303_v35, 0.0 }
 0x378   : > { %814 = vrot.lane.b32.xlu0 %v2215_v12, %s2092_s24  ;;  %v809_v12 = vpop.permute.xlu0 %808 }
 0x397   : > { %1179 = vadd.xlane.f32.xlu0 %v1178_v36 }
 0x398   : > { %1176 = vadd.xlane.f32.xlu1 %v1175_v13 }
 0x3ef   : > { %v1171_v38 = vpop.xlane.xlu0 %1170 }
 0x3f0   : > { %v1174_v39 = vpop.xlane.xlu1 %1173  ;;  %2064 = vrcp.f32 %v1171_v38 }
 0x3f1   : > { %2066 = vrcp.f32 %v1174_v39 }
 0x3f3   : > { %v815_v40 = vpop.permute.xlu0 %814 }
 0x3f4   : > { %v836_v41 = vcombine.low %v811_v37, %v815_v40  ;;  %v837_v42 = vcombine.high %v811_v37, %v815_v40  ;;  %v813_v43 = vpop.permute.xlu1 %812 }
 0x3f5   : > { %v820_v44 = vcombine.low %v809_v12, %v813_v43  ;;  %v821_v45 = vcombine.high %v809_v12, %v813_v43 }
 0x3f6   : > { %v844_v46 = vrot.slane %v836_v41, %v2225_v23  ;;  %v851_v47 = vrot.slane %v837_v42, %v2225_v23 }
 0x3f7   : > { %v828_v48 = vrot.slane %v820_v44, %v2225_v23  ;;  %v835_v49 = vrot.slane %v821_v45, %v2225_v23 }
 0x3f9   : > { %v852_v50 = vcombine.low %v828_v48, %v844_v46  ;;  %v853_v51 = vcombine.high %v828_v48, %v844_v46  ;;  %v868_v52 = vcombine.low %v835_v49, %v851_v47  ;;  %v869_v53 = vcombine.high %v835_v49, %v851_v47 }
 0x3fa   : > { %v2065_v14 = vpop.eup %2064 }
 0x3fb   : > { %v860_v54 = vrot.slane %v852_v50, %v2235_v33  ;;  %v867_v55 = vrot.slane %v853_v51, %v2235_v33  ;;  %v876_v56 = vrot.slane %v868_v52, %v2235_v33  ;;  %v883_v57 = vrot.slane %v869_v53, %v2235_v33  ;;  %v2067_v17 = vpop.eup %2066 }
 0x3fc   : > { %v1185_v22 = vmul.f32 %v2065_v14, %v2291_v25  ;;  %v1186_v24 = vmul.f32 %v2067_v17, %v2293_v26 }
 0x3fd   : > { %v888_v58 = vcombine.low %v860_v54, %v867_v55  ;;  %v1880_v59 = vcombine.high %v860_v54, %v867_v55  ;;  %v904_v60 = vcombine.low %v876_v56, %v883_v57  ;;  %v1881_v61 = vcombine.high %v876_v56, %v883_v57 }
 0x3fe   : > { %v1189_v31 = vpack.c.bf16 %v1185_v22, %v1185_v22  ;;  %v1190_v32 = vpack.c.bf16 %v1186_v24, %v1186_v24 }
 0x3ff   : > { %v895_v62 = vrot.slane %v888_v58, %v2225_v23  ;;  %v903_v63 = vrot.slane %v1880_v59, %v2225_v23  ;;  %v911_v0 = vrot.slane %v904_v60, %v2225_v23  ;;  %v919_v2 = vrot.slane %v1881_v61, %v2225_v23 }
 0x401   : > { %v920_v4 = vcombine.low %v895_v62, %v903_v63  ;;  %v921_v5 = vcombine.high %v895_v62, %v903_v63  ;;  %v936_v6 = vcombine.low %v911_v0, %v919_v2  ;;  %v937_v8 = vcombine.high %v911_v0, %v919_v2 }
 0x403   : > { %v928_v9 = vrot.slane %v920_v4, %v2235_v33  ;;  %v935_v10 = vrot.slane %v921_v5, %v2235_v33  ;;  %v944_v15 = vrot.slane %v936_v6, %v2235_v33  ;;  %v951_v16 = vrot.slane %v937_v8, %v2235_v33  ;;  %v2048_v6 = vld [vmem:[%s2438_s3] sm:$0xff]  }
 0x405   : > { %v952_v18 = vcombine.low %v928_v9, %v944_v15  ;;  %v953_v19 = vcombine.high %v928_v9, %v944_v15  ;;  %v954_v20 = vcombine.low %v935_v10, %v951_v16  ;;  %v955_v21 = vcombine.high %v935_v10, %v951_v16 }
 0x407   : > { %v956_v27 = vpack.c.bf16 %v952_v18, %v952_v18  ;;  %v957_v11 = vpack.c.bf16 %v953_v19, %v953_v19  ;;  %v958_v29 = vpack.c.bf16 %v954_v20, %v954_v20  ;;  %v959_v30 = vpack.c.bf16 %v955_v21, %v955_v21  ;;  %v2049_v19 = vld [vmem:[%s2438_s3 + $0x8] sm:$0xff]  }
 0x409   : > { %v1198_v7 = vsel %vm1196_vm3, %v956_v27, 0  ;;  %v1244_v28 = vsel %vm1196_vm3, %v957_v11, 0  ;;  %v1290_v25 = vsel %vm1196_vm3, %v958_v29, 0  ;;  %v1336_v26 = vsel %vm1196_vm3, %v959_v30, 0 }
 0x40a   : > { %1975 = vmatpush3.bf16.msra.mxu1 %v1198_v7  ;;  %1981 = vmatpush3.bf16.msra.mxu0 %v1244_v28 }
 0x40b   : > { %1986 = vmatprep.subr.bf16.mxu1 %v2084_v1  ;;  %1992 = vmatprep.subr.bf16.mxu0 %v2084_v1 }
 0x40d   : > { %1977 = vmatmul.mubr.msk.bf16.vlgmr.msra.gmra.mrb[8].mxu1 %vm960_vm2, %v1189_v31  ;;  %1983 = vmatmul.mubr.msk.bf16.vlgmr.msra.gmra.mrb[12].mxu0 %vm960_vm2, %v1190_v32 }
 0x40e   : > { %1987 = vmatpush3.bf16.msra.mxu1 %v1290_v25  ;;  %1993 = vmatpush3.bf16.msra.mxu0 %v1336_v26 }
 0x40f   : > { %1988 = vmatprep.mubr.msk.bf16.mxu1 %vm2085_vm0, %v2084_v1  ;;  %1994 = vmatprep.mubr.msk.bf16.mxu0 %vm2085_vm0, %v2084_v1 }
 0x410   : > { %1998 = vmatprep.subr.bf16.mxu1 %v2084_v1  ;;  %2006 = vmatprep.subr.bf16.mxu0 %v2084_v1 }
 0x424   : > { %v1180_v36 = vpop.xlane.xlu0 %1179 }
 0x425   : > { %2068 = vrcp.f32 %v1180_v36  ;;  %v1177_v13 = vpop.xlane.xlu1 %1176 }
 0x426   : > { %2070 = vrcp.f32 %v1177_v13 }
 0x42f   : > { %v2069_v12 = vpop.eup %2068 }
 0x430   : > { %v2071_v37 = vpop.eup %2070  ;;  %v1188_v38 = vmul.f32 %v2069_v12, %v2301_v34 }
 0x431   : > { %v1187_v39 = vmul.f32 %v2071_v37, %v2303_v35 }
 0x432   : > { %v1192_v40 = vpack.c.bf16 %v1188_v38, %v1188_v38 }
 0x433   : > { %v1191_v41 = vpack.c.bf16 %v1187_v39, %v1187_v39 }
 0x434   : > { %1995 = vmatmul.mubr.msk.bf16.vlgmr.msra.gmra.mrb[16].mxu0 %vm960_vm2, %v1192_v40 }
 0x435   : > { %1989 = vmatmul.mubr.msk.bf16.vlgmr.msra.gmra.mrb[12].mxu1 %vm960_vm2, %v1191_v41  ;;  %2010 = vmatprep.mubr.msk.bf16.mxu0 %vm2085_vm0, %v2084_v1  ;;  %v1892_v41 = vld [vmem:[%s2439_s4] ss:$0 sm:$0xff] }
 0x436   : > { %2002 = vmatprep.mubr.msk.bf16.mxu1 %vm2085_vm0, %v2084_v1  ;;  %1999 = vmatpush3.bf16.msra.mxu1 %v2048_v6 }
 0x437   : > { %2000 = vmatprep.subr.bf16.mxu1 %v2084_v1 }
 0x43a   : > { %2001 = vmatpush3.bf16.msra.mxu1 %v2049_v19 }
 0x43b   : > { %2014 = vmatprep.subr.bf16.mxu1 %v2084_v1 }
 0x4e0   : > { %v1234_v42 = vpop.f32.mrb[8].mxu1  ;;  %v1280_v43 = vpop.f32.mrb[12].mxu0 }
 0x4e1   : > { %v1978_v44 = vpop.f32.mrb[9].mxu1  ;;  %v1984_v45 = vpop.f32.mrb[13].mxu0 }
 0x4e2   : > { %v1237_v46 = vpop.f32.mrb[10].mxu1  ;;  %v1283_v34 = vpop.f32.mrb[14].mxu0 }
 0x4e3   : > { %v1979_v47 = vpop.f32.mrb[11].mxu1  ;;  %v1985_v35 = vpop.f32.mrb[15].mxu0 }
 0x507   : > { %v1372_v48 = vpop.f32.mrb[16].mxu0 }
 0x508   : > { %v1326_v49 = vpop.f32.mrb[12].mxu1  ;;  %v1394_v50 = vcombine.low %v1280_v43, %v1372_v48  ;;  %v1395_v51 = vcombine.high %v1280_v43, %v1372_v48  ;;  %v1996_v52 = vpop.f32.mrb[17].mxu0 }
 0x509   : > { %v1378_v53 = vcombine.low %v1234_v42, %v1326_v49  ;;  %v1379_v54 = vcombine.high %v1234_v42, %v1326_v49  ;;  %v1990_v55 = vpop.f32.mrb[13].mxu1  ;;  %v1375_v56 = vpop.f32.mrb[18].mxu0  ;;  %v2050_v52 = vld [vmem:[%s2440_s5] sm:$0xff]  }
 0x50a   : > { %v1402_v57 = vrot.slane %v1394_v50, %v2225_v23  ;;  %v1409_v58 = vrot.slane %v1395_v51, %v2225_v23  ;;  %v1329_v59 = vpop.f32.mrb[14].mxu1  ;;  %v1997_v60 = vpop.f32.mrb[19].mxu0  ;;  %2007 = vmatpush3.bf16.msra.mxu0 %v2050_v52 }
 0x50b   : > { %v1386_v61 = vrot.slane %v1378_v53, %v2225_v23  ;;  %v1393_v62 = vrot.slane %v1379_v54, %v2225_v23  ;;  %v1991_v63 = vpop.f32.mrb[15].mxu1  ;;  %v2051_v53 = vld [vmem:[%s2440_s5 + $0x8] sm:$0xff]   ;;  %2008 = vmatprep.subr.bf16.mxu0 %v2084_v1  ;;  %v1896_v59 = vld [vmem:[%s2444_s9] ss:$0 sm:$0xff] }
 0x50c   : > { %v2053_v54 = vld [vmem:[%s2442_s7 + $0x8] sm:$0xff]  }
 0x50d   : > { %v1410_v0 = vcombine.low %v1386_v61, %v1402_v57  ;;  %v1411_v2 = vcombine.high %v1386_v61, %v1402_v57  ;;  %v1426_v4 = vcombine.low %v1393_v62, %v1409_v58  ;;  %v1427_v5 = vcombine.high %v1393_v62, %v1409_v58  ;;  %v1897_v61 = vld [vmem:[%s2445_s10] ss:$0 sm:$0xff] }
 0x50e   : > { %2009 = vmatpush3.bf16.msra.mxu0 %v2051_v53 }
 0x50f   : > { %v1418_v8 = vrot.slane %v1410_v0, %v2235_v33  ;;  %v1425_v9 = vrot.slane %v1411_v2, %v2235_v33  ;;  %v1434_v10 = vrot.slane %v1426_v4, %v2235_v33  ;;  %v1441_v14 = vrot.slane %v1427_v5, %v2235_v33  ;;  %v2054_v2 = vld [vmem:[%s2442_s7 + $0x10] sm:$0xff]   ;;  %v2055_v4 = vld [vmem:[%s2442_s7 + $0x18] sm:$0xff]   ;;  %v1898_v5 = vld [vmem:[%s2441_s6] ss:$0 sm:$0xff] }
 0x511   : > { %v1446_v15 = vcombine.low %v1418_v8, %v1425_v9  ;;  %v1890_v16 = vcombine.high %v1418_v8, %v1425_v9  ;;  %v1462_v17 = vcombine.low %v1434_v10, %v1441_v14  ;;  %v1891_v18 = vcombine.high %v1434_v10, %v1441_v14 }
 0x513   : > { %v1453_v20 = vrot.slane %v1446_v15, %v2225_v23  ;;  %v1461_v21 = vrot.slane %v1890_v16, %v2225_v23  ;;  %v1469_v22 = vrot.slane %v1462_v17, %v2225_v23  ;;  %v1477_v24 = vrot.slane %v1891_v18, %v2225_v23 }
 0x515   : > { %v1479_v27 = vcombine.high %v1453_v20, %v1461_v21  ;;  %v1495_v11 = vcombine.high %v1469_v22, %v1477_v24  ;;  %v1478_v7 = vcombine.low %v1453_v20, %v1461_v21  ;;  %v1494_v28 = vcombine.low %v1469_v22, %v1477_v24 }
 0x517   : > { %v1493_v29 = vrot.slane %v1479_v27, %v2235_v33  ;;  %v1509_v30 = vrot.slane %v1495_v11, %v2235_v33  ;;  %v1486_v31 = vrot.slane %v1478_v7, %v2235_v33  ;;  %v1502_v32 = vrot.slane %v1494_v28, %v2235_v33 }
 0x519   : > { %v1512_v25 = vcombine.low %v1493_v29, %v1509_v30  ;;  %v1511_v26 = vcombine.high %v1486_v31, %v1502_v32  ;;  %v1513_v36 = vcombine.high %v1493_v29, %v1509_v30  ;;  %v1510_v13 = vcombine.low %v1486_v31, %v1502_v32 }
 0x51b   : > { %1519 = vrot.lane.b32.xlu1 %v1512_v25, %s2093_s15  ;;  %1515 = vrot.lane.b32.xlu0 %v1511_v26, %s2094_s16  ;;  %v1908_v26 = vld [vmem:[%s2446_s11] ss:$0 sm:$0xff] }
 0x51f   : > { %1523 = vrot.lane.b32.xlu1 %v1513_v36, %s2095_s17 }
 0x58d   : > { %v1520_v23 = vpop.permute.xlu1 %1519  ;;  %v1516_v12 = vpop.permute.xlu0 %1515 }
 0x58e   : > { %v1526_v37 = vsel %vm960_vm2, %v1510_v13, %v1516_v12  ;;  %v1909_v13 = vld [vmem:[%s2447_s12] ss:$0 sm:$0xff] }
 0x58f   : > { %v1528_v39 = vsel %vm1527_vm4, %v1526_v37, %v1520_v23 }
 0x591   : > { %v1524_v38 = vpop.permute.xlu1 %1523 }
 0x592   : > { %v1530_v40 = vsel %vm1529_vm5, %v1528_v39, %v1524_v38 }
 0x593   : > { %v1531_v33 = vpack.c.bf16 %v1530_v40, %v1530_v40 }
 0x595   : > { %2003 = vmatmul.mubr.msk.bf16.vlgmr.msra.gmra.mrb[16].mxu1 %vm462_vm1, %v1531_v33 }
 0x596   : > { %2022 = vmatprep.mubr.msk.bf16.mxu1 %vm2085_vm0, %v2084_v1 }
 0x668   : > { %v1592_v42 = vpop.f32.mrb[16].mxu1 }
 0x669   : > { %v1593_v43 = vadd.f32 %v1892_v41, %v1592_v42  ;;  %v2004_v44 = vpop.f32.mrb[17].mxu1 }
 0x66a   : > { %v1595_v45 = vpop.f32.mrb[18].mxu1 }
 0x66b   : > { %v2005_v46 = vpop.f32.mrb[19].mxu1  ;;  %v1598_v34 = vadd.f32 %v1593_v43, %v2196_v3  ;;  %v2052_v3 = vld [vmem:[%s2442_s7] sm:$0xff]  }
 0x66c   : > { %2015 = vmatpush3.bf16.msra.mxu1 %v2052_v3 }
 0x66d   : > { %v1601_v47 = vsel %vm462_vm1, %v1598_v34, 0.0  ;;  %2016 = vmatprep.subr.bf16.mxu1 %v2084_v1 }
 0x66e   : > { %1602 = vadd.xlane.f32.xlu0 %v1601_v47 }
 0x670   : > { %2017 = vmatpush3.bf16.msra.mxu1 %v2053_v54 }
 0x671   : > { %2018 = vmatprep.subr.bf16.mxu1 %v2084_v1 }
 0x674   : > { %2019 = vmatpush3.bf16.msra.mxu1 %v2054_v2 }
 0x675   : > { %2020 = vmatprep.subr.bf16.mxu1 %v2084_v1  ;;  %v1902_v1 = vld [vmem:[%s2443_s8] ss:$0 sm:$0xff] }
 0x678   : > { %2021 = vmatpush3.bf16.msra.mxu1 %v2055_v4 }
 0x6fb   : > { %v1603_v35 = vpop.xlane.xlu0 %1602 }
 0x6fc   : > { %v1605_v48 = vmul.f32 0.03125, %v1603_v35 }
 0x6fe   : > { %v1606_v49 = vsub.f32 %v1598_v34, %v1605_v48 }
 0x700   : > { %v1607_v50 = vmul.f32 %v1606_v49, %v1606_v49 }
 0x702   : > { %v1608_v51 = vsel %vm462_vm1, %v1607_v50, 0.0 }
 0x703   : > { %1609 = vadd.xlane.f32.xlu1 %v1608_v51 }
 0x790   : > { %v1610_v55 = vpop.xlane.xlu1 %1609 }
 0x791   : > { %v1611_v56 = vmul.f32 0.03125, %v1610_v55 }
 0x793   : > { %v1612_v57 = vadd.f32 1e-05, %v1611_v56 }
 0x795   : > { %2072 = vrsqrt.f32 %v1612_v57 }
 0x79f   : > { %v2073_v58 = vpop.eup %2072 }
 0x7a0   : > { %v1614_v60 = vmul.f32 %v2073_v58, %v1606_v49 }
 0x7a2   : > { %v1621_v62 = vmul.f32 %v1896_v59, %v1614_v60 }
 0x7a4   : > { %v1628_v63 = vadd.f32 %v1897_v61, %v1621_v62 }
 0x7a6   : > { %v1629_v0 = vpack.c.bf16 %v1628_v63, %v1628_v63 }
 0x7a8   : > { %2011 = vmatmul.mubr.msk.bf16.vlgmr.msra.gmra.mrb[20].mxu0 %vm462_vm1, %v1629_v0 }
 0x87b   : > { %v1690_v6 = vpop.f32.mrb[20].mxu0 }
 0x87c   : > { %v1691_v8 = vadd.f32 %v1898_v5, %v1690_v6  ;;  %v2012_v9 = vpop.f32.mrb[21].mxu0 }
 0x87d   : > { %v1693_v10 = vpop.f32.mrb[22].mxu0 }
 0x87e   : > { %v1696_v14 = vmax.f32 %v1691_v8, 0.0  ;;  %v2013_v15 = vpop.f32.mrb[23].mxu0 }
 0x880   : > { %v1697_v16 = vpack.c.bf16 %v1696_v14, %v1696_v14 }
 0x882   : > { %2023 = vmatmul.mubr.msk.bf16.vlgmr.msra.gmra.mrb[20].mxu1 %vm1737_vm6, %v1697_v16 }
 0x955   : > { %v1775_v17 = vpop.f32.mrb[20].mxu1 }
 0x956   : > { %v1776_v18 = vadd.f32 %v1902_v1, %v1775_v17  ;;  %v2024_v19 = vpop.f32.mrb[21].mxu1 }
 0x957   : > { %v1778_v20 = vpop.f32.mrb[22].mxu1 }
 0x958   : > { %v2025_v21 = vpop.f32.mrb[23].mxu1  ;;  %v1781_v22 = vadd.f32 %v1776_v18, %v1628_v63 }
 0x95a   : > { %v1784_v24 = vsel %vm462_vm1, %v1781_v22, 0.0 }
 0x95b   : > { %1785 = vadd.xlane.f32.xlu0 %v1784_v24 }
 0x9e8   : > { %v1786_v27 = vpop.xlane.xlu0 %1785 }
 0x9e9   : > { %v1787_v11 = vmul.f32 0.03125, %v1786_v27 }
 0x9eb   : > { %v1788_v7 = vsub.f32 %v1781_v22, %v1787_v11 }
 0x9ed   : > { %v1789_v28 = vmul.f32 %v1788_v7, %v1788_v7 }
 0x9ef   : > { %v1790_v29 = vsel %vm462_vm1, %v1789_v28, 0.0 }
 0x9f0   : > { %1791 = vadd.xlane.f32.xlu0 %v1790_v29 }
 0xa7d   : > { %v1792_v30 = vpop.xlane.xlu0 %1791 }
 0xa7e   : > { %v1793_v31 = vmul.f32 0.03125, %v1792_v30 }
 0xa80   : > { %v1794_v32 = vadd.f32 1e-05, %v1793_v31 }
 0xa82   : > { %2074 = vrsqrt.f32 %v1794_v32 }
 0xa8c   : > { %v2075_v25 = vpop.eup %2074 }
 0xa8d   : > { %v1796_v36 = vmul.f32 %v2075_v25, %v1788_v7 }
 0xa8f   : > { %v1803_v23 = vmul.f32 %v1908_v26, %v1796_v36 }
 0xa91   : > { %v1810_v12 = vadd.f32 %v1909_v13, %v1803_v23 }
 0xa93   : > { %1811 = vst.msk [vmem:[%s435_s18] sm:$0xff] %vm462_vm1, %v1810_v12 }
 0xa94 PF: > { %s23_s25 = sadd.s32 1, %s2082_s25  }
 0xa95   : > { %p20_p4 = scmp.ge.s32.totalorder %s23_s25, 4  }
 0xa97   :  { %22 = sbr.rel (!%p20_p4) target bundleno = 1 (0x1), region = 102 }

// kernel: encoder_stack_forward.5
= control target key start
LH: loop header
LB: loop body
LE: loop exit
PB: predicated region body
PF: predicated region fallthrough
CT: control target
= control target key end

     0   :  { %s1845_s25 = smov 0   ;;  %s2074_s0 = inlined_call_operand.vmem [shape: f32[2,2,32], index: 0, kind: input, shape index: {}]   ;;  %s2075_s1 = inlined_call_operand.vmem [shape: bf16[32,96], index: 1, kind: input, shape index: {}]   ;;  %s2076_s2 = inlined_call_operand.vmem [shape: f32[1,96], index: 2, kind: input, shape index: {}]   ;;  %s2077_s3 = inlined_call_operand.vmem [shape: bf16[32,32], index: 3, kind: input, shape index: {}]   ;;  %s2078_s4 = inlined_call_operand.vmem [shape: f32[1,32], index: 4, kind: input, shape index: {}]   ;;  %s2079_s5 = inlined_call_operand.vmem [shape: bf16[32,64], index: 5, kind: input, shape index: {}]   ;;  %s2080_s6 = inlined_call_operand.vmem [shape: f32[1,64], index: 6, kind: input, shape index: {}]   ;;  %s2081_s7 = inlined_call_operand.vmem [shape: bf16[64,32], index: 7, kind: input, shape index: {}]   ;;  %s2082_s8 = inlined_call_operand.vmem [shape: f32[1,32], index: 8, kind: input, shape index: {}]   ;;  %s2083_s9 = inlined_call_operand.vmem [shape: f32[1,32], index: 9, kind: input, shape index: {}]   ;;  %s2084_s10 = inlined_call_operand.vmem [shape: f32[1,32], index: 10, kind: input, shape index: {}]   ;;  %s2085_s11 = inlined_call_operand.vmem [shape: f32[1,32], index: 11, kind: input, shape index: {}]   ;;  %s2086_s12 = inlined_call_operand.vmem [shape: f32[1,32], index: 12, kind: input, shape index: {}]   ;;  %s2087_s13 = inlined_call_operand.vmem [shape: f32[2,2,32], index: 13, kind: output, shape index: {}]  }
   0x1 LB: > { %s1552_s26 = sadd.s32 4294967295, %s1761_s25   ;;  %p1556_p0 = scmp.ge.s32.totalorder %s1761_s25, 1  ;;  %s1761_s25 = sphi %s1845_s25, %s23_s25  }
   0x2   : > { %p386_p1 = scmp.lt.s32.totalorder %s1761_s25, 3 }
   0x4   : > { %p387_p2 = pnand %p1556_p0, %p386_p1 }
   0x5   : > { %v1725_v0 = vld [vmem:[%s2075_s1] sm:$0xff] (!%p387_p2)   ;;  %v1763_v1 = vmov (!%p387_p2), 0.0   ;;  %v1726_v2 = vld [vmem:[%s2075_s1 + $0x8] sm:$0xff] (!%p387_p2)   ;;  %vm1764_vm0 = vmmov (!%p387_p2), 0   ;;  %p428_p3 = scmp.lt.s32.totalorder (!%p387_p2), %s1552_s26, 1  ;;  %vm462_vm1 = vcmask (!%p387_p2), 261120   ;;  %v520_v16 = vlaneseq (!%p387_p2) }
   0x6   : > { %390 = sbr.rel (%p387_p2) target bundleno = 2705 (0xa91), region = 72  ;;  %1621 = vmatprep.subr.bf16.mxu0 (!%p387_p2), %v1763_v1  ;;  %1629 = vmatprep.subr.bf16.mxu1 (!%p387_p2), %v1763_v1  ;;  %v1559_v5 = vld [vmem:[%s2076_s2] ss:$0 sm:$0xff] (!%p387_p2)  ;;  %s1765_s20 = smov (!%p387_p2), 104   ;;  %v1769_v14 = vmov (!%p387_p2), 1983009808  }
   0x7   : > { %1622 = vmatpush3.bf16.msra.mxu0 (!%p387_p2), %v1725_v0  ;;  %1625 = vmatprep.mubr.msk.bf16.mxu0 (!%p387_p2), %vm1764_vm0, %v1763_v1  ;;  %s1766_s21 = smov (!%p387_p2), 120   ;;  %s1767_s22 = smov (!%p387_p2), 96   ;;  %v518_v15 = vunpack.c.l.s4 (!%p387_p2), %v1769_v14  ;;  %v521_v18 = vshrl.u32 (!%p387_p2), %v520_v16, 7  ;;  %v1770_v19 = vmov (!%p387_p2), 1934713408   ;;  %vm723_vm2 = vcmask (!%p387_p2), 64512  }
   0x8   : > { %1623 = vmatprep.subr.bf16.mxu0 (!%p387_p2), %v1763_v1  ;;  %1631 = vmatprep.mubr.msk.bf16.mxu1 (!%p387_p2), %vm1764_vm0, %v1763_v1  ;;  %s1768_s23 = smov (!%p387_p2), 112   ;;  %v534_v20 = vunpack.c.l.s4 (!%p387_p2), %v1770_v19  ;;  %vm908_vm3 = vcmask (!%p387_p2), 9216   ;;  %s1771_s24 = smov (!%p387_p2), 64   ;;  %vm961_vm4 = vcmask (!%p387_p2), 1040384   ;;  %vm957_vm5 = vcmask (!%p387_p2), 15360  }
   0x9   : > { %v519_v17 = vunpack.c.0.s8 (!%p387_p2), %v518_v15  ;;  %s1772_s15 = smov (!%p387_p2), 16   ;;  %s1773_s16 = smov (!%p387_p2), 8   ;;  %vm1213_vm6 = vcmask (!%p387_p2), 130048   ;;  %vm1215_vm7 = vcmask (!%p387_p2), 195584   ;;  %vm1287_vm8 = vcmask (!%p387_p2), 254976  }
   0xa   : > { %v535_v24 = vunpack.c.0.s8 (!%p387_p2), %v534_v20  ;;  %vm1424_vm9 = vcmask (!%p387_p2), 523264  }
   0xb   : > { %1624 = vmatpush3.bf16.msra.mxu0 (!%p387_p2), %v1726_v2  ;;  %v1902_v22 = vsub.s32 (!%p387_p2), %v519_v17, %v521_v18 }
   0xc   : > { %1635 = vmatprep.subr.bf16.mxu0 (!%p387_p2), %v1763_v1  ;;  %v1908_v29 = vsub.s32 (!%p387_p2), %v535_v24, %v521_v18 }
   0xd   : > { %s2089_s26 = smov (!%p428_p3, %s1552_s26), 1 }
   0xe   : > { %s1557_s14 = sshll.u32 %s2089_s26, 1 }
   0xf   : > { %s431_s17 = scalar_lea.vmem %s2074_s0, %s1557_s14  ;;  %s435_s18 = scalar_lea.vmem %s2087_s13, %s1557_s14 }
  0x10   : > { %v1875_v3 = vld [vmem:[%s431_s17] sm:$0x3]  ;;  %s1774_s17 = smov 24  }
  0x11   : > { %v438_v4 = vpack.c.bf16 %v1875_v3, %v1875_v3 }
  0x13   : > { %1626 = vmatmul.mubr.msk.bf16.vlgmr.msra.gmra.mrb[0].mxu0 %vm462_vm1, %v438_v4 }
  0x14   : > { %1637 = vmatprep.mubr.msk.bf16.mxu0 %vm1764_vm0, %v1763_v1 }
  0xe6   : > { %v500_v6 = vpop.f32.mrb[0].mxu0 }
  0xe7   : > { %v1885_v7 = vadd.f32 %v1559_v5, %v500_v6  ;;  %v1627_v8 = vpop.f32.mrb[1].mxu0 }
  0xe8   : > { %v503_v9 = vpop.f32.mrb[2].mxu0 }
  0xe9   : > { %513 = vrot.lane.b32.xlu1 %v1885_v7, %s1765_s20  ;;  %507 = vrot.lane.b32.xlu0 %v1885_v7, %s1766_s21  ;;  %v1628_v10 = vpop.f32.mrb[3].mxu0 }
  0xed   : > { %577 = vrot.lane.b32.xlu1 %v1885_v7, %s1767_s22  ;;  %510 = vrot.lane.b32.xlu0 %v1885_v7, %s1768_s23 }
 0x15b   : > { %v1891_v11 = vpop.permute.xlu0 %507  ;;  %v1894_v12 = vpop.permute.xlu1 %513 }
 0x15c   : > { %579 = vrot.lane.b32.xlu0 %v1891_v11, %s1767_s22  ;;  %v524_v23 = vcombine.low %v1891_v11, %v1894_v12 }
 0x15e   : > { %v531_v28 = vrot.slane %v524_v23, %v1902_v22 }
 0x15f   : > { %v1896_v13 = vpop.permute.xlu0 %510  ;;  %v578_v26 = vpop.permute.xlu1 %577 }
 0x160   : > { %583 = vrot.lane.b32.xlu0 %v1894_v12, %s1767_s22  ;;  %581 = vrot.lane.b32.xlu1 %v1896_v13, %s1767_s22  ;;  %v516_v21 = vcombine.low %v1885_v7, %v1896_v13 }
 0x162   : > { %v523_v25 = vrot.slane %v516_v21, %v1902_v22 }
 0x164   : > { %v532_v30 = vcombine.low %v523_v25, %v531_v28 }
 0x166   : > { %v539_v35 = vrot.slane %v532_v30, %v1908_v29 }
 0x168   : > { %v547_v39 = vcombine.high %v539_v35, %v1763_v1  ;;  %v546_v45 = vrot.slane %v539_v35, %v1902_v22 }
 0x16a   : > { %v554_v42 = vrot.slane %v547_v39, %v1902_v22 }
 0x16c   : > { %v555_v49 = vcombine.low %v546_v45, %v554_v42  ;;  %v556_v58 = vcombine.high %v546_v45, %v554_v42 }
 0x16e   : > { %v563_v55 = vrot.slane %v555_v49, %v1908_v29  ;;  %v570_v2 = vrot.slane %v556_v58, %v1908_v29 }
 0x170   : > { %v571_v59 = vcombine.high %v563_v55, %v1763_v1  ;;  %v573_v61 = vpack.c.bf16 %v563_v55, %v563_v55  ;;  %v572_v5 = vcombine.high %v570_v2, %v1763_v1  ;;  %v575_v6 = vpack.c.bf16 %v570_v2, %v570_v2 }
 0x172   : > { %v574_v0 = vpack.c.bf16 %v571_v59, %v571_v59  ;;  %v576_v8 = vpack.c.bf16 %v572_v5, %v572_v5 }
 0x1ce   : > { %v580_v27 = vpop.permute.xlu0 %579 }
 0x1d2   : > { %v582_v31 = vpop.permute.xlu1 %581  ;;  %v584_v32 = vpop.permute.xlu0 %583 }
 0x1d3   : > { %v589_v33 = vcombine.low %v578_v26, %v582_v31  ;;  %v597_v34 = vcombine.low %v580_v27, %v584_v32 }
 0x1d5   : > { %v596_v36 = vrot.slane %v589_v33, %v1902_v22  ;;  %v604_v37 = vrot.slane %v597_v34, %v1902_v22 }
 0x1d7   : > { %v605_v38 = vcombine.low %v596_v36, %v604_v37 }
 0x1d9   : > { %v612_v40 = vrot.slane %v605_v38, %v1908_v29 }
 0x1db   : > { %v620_v41 = vcombine.high %v612_v40, %v1763_v1  ;;  %v619_v43 = vrot.slane %v612_v40, %v1902_v22 }
 0x1dd   : > { %v627_v44 = vrot.slane %v620_v41, %v1902_v22 }
 0x1df   : > { %v628_v46 = vcombine.low %v619_v43, %v627_v44  ;;  %v629_v47 = vcombine.high %v619_v43, %v627_v44 }
 0x1e1   : > { %v636_v48 = vrot.slane %v628_v46, %v1908_v29  ;;  %v643_v52 = vrot.slane %v629_v47, %v1908_v29 }
 0x1e3   : > { %v646_v50 = vpack.c.bf16 %v636_v48, %v636_v48  ;;  %v644_v51 = vcombine.high %v636_v48, %v1763_v1  ;;  %v645_v57 = vcombine.high %v643_v52, %v1763_v1  ;;  %v648_v60 = vpack.c.bf16 %v643_v52, %v643_v52 }
 0x1e5   : > { %v728_v53 = vsel %vm723_vm2, %v646_v50, 0  ;;  %v647_v54 = vpack.c.bf16 %v644_v51, %v644_v51  ;;  %v649_v62 = vpack.c.bf16 %v645_v57, %v645_v57  ;;  %v820_v63 = vsel %vm723_vm2, %v648_v60, 0 }
 0x1e6   : > { %1630 = vmatpush3.bf16.xpose.msra.mxu1 %v728_v53 }
 0x1e7   : > { %v774_v56 = vsel %vm723_vm2, %v647_v54, 0  ;;  %1641 = vmatprep.subr.bf16.mxu1 %v1763_v1  ;;  %v866_v4 = vsel %vm723_vm2, %v649_v62, 0 }
 0x1e8   : > { %1636 = vmatpush3.bf16.xpose.msra.mxu0 %v774_v56 }
 0x1e9   : > { %1647 = vmatprep.subr.bf16.mxu0 %v1763_v1 }
 0x1ed   : > { %1632 = vmatmul.mubr.msk.bf16.vlgmr.msra.gmra.mrb[0].mxu1 %vm723_vm2, %v573_v61 }
 0x1ee   : > { %1642 = vmatpush3.bf16.xpose.msra.mxu1 %v820_v63  ;;  %1643 = vmatprep.mubr.msk.bf16.mxu1 %vm1764_vm0, %v1763_v1 }
 0x1ef   : > { %1638 = vmatmul.mubr.msk.bf16.vlgmr.msra.gmra.mrb[4].mxu0 %vm723_vm2, %v574_v0  ;;  %1653 = vmatprep.subr.bf16.mxu1 %v1763_v1 }
 0x1f0   : > { %1648 = vmatpush3.bf16.xpose.msra.mxu0 %v866_v4  ;;  %1649 = vmatprep.mubr.msk.bf16.mxu0 %vm1764_vm0, %v1763_v1 }
 0x1f1   : > { %1659 = vmatprep.subr.bf16.mxu0 %v1763_v1 }
 0x1f5   : > { %1644 = vmatmul.mubr.msk.bf16.vlgmr.msra.gmra.mrb[4].mxu1 %vm723_vm2, %v575_v6 }
 0x1f6   : > { %1655 = vmatprep.mubr.msk.bf16.mxu1 %vm1764_vm0, %v1763_v1 }
 0x1f7   : > { %1650 = vmatmul.mubr.msk.bf16.vlgmr.msra.gmra.mrb[8].mxu0 %vm723_vm2, %v576_v8 }
 0x1f8   : > { %1661 = vmatprep.mubr.msk.bf16.mxu0 %vm1764_vm0, %v1763_v1 }
 0x2c0   : > { %v764_v9 = vpop.f32.mrb[0].mxu1 }
 0x2c1   : > { %v1633_v10 = vpop.f32.mrb[1].mxu1  ;;  %v909_v14 = vsel %vm908_vm3, %v764_v9, -inf }
 0x2c2   : > { %910 = vmax.xlane.f32.xlu1 %v909_v14  ;;  %v767_v15 = vpop.f32.mrb[2].mxu1  ;;  %v810_v16 = vpop.f32.mrb[4].mxu0 }
 0x2c3   : > { %v1634_v17 = vpop.f32.mrb[3].mxu1  ;;  %v1639_v18 = vpop.f32.mrb[5].mxu0  ;;  %v912_v19 = vsel %vm908_vm3, %v810_v16, -inf }
 0x2c4   : > { %913 = vmax.xlane.f32.xlu0 %v912_v19  ;;  %v813_v20 = vpop.f32.mrb[6].mxu0 }
 0x2c5   : > { %v1640_v21 = vpop.f32.mrb[7].mxu0 }
 0x2c8   : > { %v856_v23 = vpop.f32.mrb[4].mxu1 }
 0x2c9   : > { %v1645_v24 = vpop.f32.mrb[5].mxu1  ;;  %v915_v25 = vsel %vm908_vm3, %v856_v23, -inf }
 0x2ca   : > { %v859_v26 = vpop.f32.mrb[6].mxu1  ;;  %916 = vmax.xlane.f32.xlu0 %v915_v25  ;;  %v902_v27 = vpop.f32.mrb[8].mxu0 }
 0x2cb   : > { %v1646_v28 = vpop.f32.mrb[7].mxu1  ;;  %v1651_v30 = vpop.f32.mrb[9].mxu0  ;;  %v918_v31 = vsel %vm908_vm3, %v902_v27, -inf }
 0x2cc   : > { %919 = vmax.xlane.f32.xlu1 %v918_v31  ;;  %v905_v32 = vpop.f32.mrb[10].mxu0 }
 0x2cd   : > { %v1652_v33 = vpop.f32.mrb[11].mxu0 }
 0x2dd   : > { %652 = vrot.lane.b32.xlu1 %v1891_v11, %s1771_s24 }
 0x2e0   : > { %650 = vrot.lane.b32.xlu0 %v1885_v7, %s1771_s24 }
 0x34f   : > { %v911_v34 = vpop.xlane.xlu1 %910 }
 0x350   : > { %v921_v35 = vsub.f32 %v764_v9, %v911_v34 }
 0x351   : > { %v914_v36 = vpop.xlane.xlu0 %913 }
 0x352   : > { %v925_v37 = vmul.f32 1.442695, %v921_v35  ;;  %v922_v38 = vsub.f32 %v810_v16, %v914_v36 }
 0x354   : > { %1735 = vpow2.f32 %v925_v37  ;;  %v927_v39 = vmul.f32 1.442695, %v922_v38 }
 0x356   : > { %1737 = vpow2.f32 %v927_v39 }
 0x357   : > { %v917_v11 = vpop.xlane.xlu0 %916 }
 0x358   : > { %v923_v45 = vsub.f32 %v856_v23, %v917_v11 }
 0x359   : > { %v920_v7 = vpop.xlane.xlu1 %919 }
 0x35a   : > { %v924_v44 = vsub.f32 %v902_v27, %v920_v7  ;;  %v929_v47 = vmul.f32 1.442695, %v923_v45 }
 0x35c   : > { %v931_v46 = vmul.f32 1.442695, %v924_v44 }
 0x35e   : > { %v1736_v40 = vpop.eup %1735  ;;  %1739 = vpow2.f32 %v931_v46 }
 0x35f   : > { %v933_v41 = vsel %vm908_vm3, %v1736_v40, 0.0  ;;  %1741 = vpow2.f32 %v929_v47 }
 0x360   : > { %v1738_v42 = vpop.eup %1737  ;;  %934 = vadd.xlane.f32.xlu0 %v933_v41 }
 0x361   : > { %v936_v43 = vsel %vm908_vm3, %v1738_v42, 0.0 }
 0x362   : > { %937 = vadd.xlane.f32.xlu1 %v936_v43 }
 0x368   : > { %v1740_v48 = vpop.eup %1739 }
 0x369   : > { %v1958_v49 = vpop.eup %1741  ;;  %v942_v50 = vsel %vm908_vm3, %v1740_v48, 0.0 }
 0x36a   : > { %v939_v51 = vsel %vm908_vm3, %v1958_v49, 0.0 }
 0x373   : > { %654 = vrot.lane.b32.xlu1 %v1896_v13, %s1771_s24  ;;  %v651_v13 = vpop.permute.xlu0 %650 }
 0x376   : > { %656 = vrot.lane.b32.xlu0 %v1894_v12, %s1771_s24  ;;  %v653_v12 = vpop.permute.xlu1 %652 }
 0x395   : > { %943 = vadd.xlane.f32.xlu0 %v942_v50 }
 0x397   : > { %940 = vadd.xlane.f32.xlu1 %v939_v51 }
 0x3ed   : > { %v935_v52 = vpop.xlane.xlu0 %934 }
 0x3ee   : > { %1743 = vrcp.f32 %v935_v52 }
 0x3ef   : > { %v938_v53 = vpop.xlane.xlu1 %937 }
 0x3f0   : > { %1745 = vrcp.f32 %v938_v53 }
 0x3f1   : > { %v657_v54 = vpop.permute.xlu0 %656 }
 0x3f2   : > { %v670_v55 = vcombine.low %v653_v12, %v657_v54 }
 0x3f3   : > { %v655_v56 = vpop.permute.xlu1 %654 }
 0x3f4   : > { %v662_v57 = vcombine.low %v651_v13, %v655_v56  ;;  %v677_v58 = vrot.slane %v670_v55, %v1902_v22  ;;  %v1727_v13 = vld [vmem:[%s2077_s3] sm:$0xff]   ;;  %v1728_v55 = vld [vmem:[%s2077_s3 + $0x8] sm:$0xff]  }
 0x3f6   : > { %v669_v59 = vrot.slane %v662_v57, %v1902_v22 }
 0x3f8   : > { %v678_v60 = vcombine.low %v669_v59, %v677_v58  ;;  %v1744_v5 = vpop.eup %1743 }
 0x3f9   : > { %v949_v10 = vmul.f32 %v1744_v5, %v1736_v40 }
 0x3fa   : > { %v685_v61 = vrot.slane %v678_v60, %v1908_v29  ;;  %v1746_v9 = vpop.eup %1745 }
 0x3fb   : > { %v950_v17 = vmul.f32 %v1746_v9, %v1738_v42  ;;  %v953_v23 = vpack.c.bf16 %v949_v10, %v949_v10  ;;  %v1571_v10 = vld [vmem:[%s2078_s4] ss:$0 sm:$0xff] }
 0x3fc   : > { %v693_v62 = vcombine.high %v685_v61, %v1763_v1  ;;  %v692_v63 = vrot.slane %v685_v61, %v1902_v22 }
 0x3fd   : > { %v954_v26 = vpack.c.bf16 %v950_v17, %v950_v17 }
 0x3fe   : > { %v700_v0 = vrot.slane %v693_v62, %v1902_v22 }
 0x400   : > { %v701_v2 = vcombine.low %v692_v63, %v700_v0  ;;  %v702_v4 = vcombine.high %v692_v63, %v700_v0 }
 0x402   : > { %v709_v6 = vrot.slane %v701_v2, %v1908_v29  ;;  %v716_v8 = vrot.slane %v702_v4, %v1908_v29 }
 0x404   : > { %v719_v14 = vpack.c.bf16 %v709_v6, %v709_v6  ;;  %v717_v15 = vcombine.high %v709_v6, %v1763_v1  ;;  %v718_v16 = vcombine.high %v716_v8, %v1763_v1  ;;  %v721_v20 = vpack.c.bf16 %v716_v8, %v716_v8 }
 0x406   : > { %v963_v18 = vsel %vm961_vm4, %v719_v14, 0  ;;  %v720_v19 = vpack.c.bf16 %v717_v15, %v717_v15  ;;  %v722_v24 = vpack.c.bf16 %v718_v16, %v718_v16  ;;  %v1055_v25 = vsel %vm961_vm4, %v721_v20, 0 }
 0x407   : > { %1654 = vmatpush3.bf16.msra.mxu1 %v963_v18 }
 0x408   : > { %v1009_v21 = vsel %vm961_vm4, %v720_v19, 0  ;;  %1665 = vmatprep.subr.bf16.mxu1 %v1763_v1  ;;  %v1101_v27 = vsel %vm961_vm4, %v722_v24, 0 }
 0x409   : > { %1660 = vmatpush3.bf16.msra.mxu0 %v1009_v21 }
 0x40a   : > { %1656 = vmatmul.mubr.msk.bf16.vlgmr.msra.gmra.mrb[8].mxu1 %vm957_vm5, %v953_v23  ;;  %1671 = vmatprep.subr.bf16.mxu0 %v1763_v1 }
 0x40b   : > { %1666 = vmatpush3.bf16.msra.mxu1 %v1055_v25  ;;  %1667 = vmatprep.mubr.msk.bf16.mxu1 %vm1764_vm0, %v1763_v1 }
 0x40c   : > { %1662 = vmatmul.mubr.msk.bf16.vlgmr.msra.gmra.mrb[12].mxu0 %vm957_vm5, %v954_v26  ;;  %1677 = vmatprep.subr.bf16.mxu1 %v1763_v1 }
 0x40d   : > { %1672 = vmatpush3.bf16.msra.mxu0 %v1101_v27  ;;  %1673 = vmatprep.mubr.msk.bf16.mxu0 %vm1764_vm0, %v1763_v1  ;;  %v1729_v27 = vld [vmem:[%s2079_s5] sm:$0xff]  }
 0x40e   : > { %1685 = vmatprep.subr.bf16.mxu0 %v1763_v1 }
 0x422   : > { %v944_v28 = vpop.xlane.xlu0 %943 }
 0x423   : > { %1747 = vrcp.f32 %v944_v28  ;;  %v1731_v28 = vld [vmem:[%s2081_s7] sm:$0xff]  }
 0x424   : > { %v941_v30 = vpop.xlane.xlu1 %940 }
 0x425   : > { %1749 = vrcp.f32 %v941_v30  ;;  %v1732_v30 = vld [vmem:[%s2081_s7 + $0x8] sm:$0xff]  }
 0x42d   : > { %v1748_v31 = vpop.eup %1747 }
 0x42e   : > { %v952_v32 = vmul.f32 %v1748_v31, %v1740_v48 }
 0x42f   : > { %v1750_v33 = vpop.eup %1749 }
 0x430   : > { %v951_v34 = vmul.f32 %v1750_v33, %v1958_v49  ;;  %v956_v35 = vpack.c.bf16 %v952_v32, %v952_v32 }
 0x432   : > { %1674 = vmatmul.mubr.msk.bf16.vlgmr.msra.gmra.mrb[16].mxu0 %vm957_vm5, %v956_v35  ;;  %v955_v36 = vpack.c.bf16 %v951_v34, %v951_v34  ;;  %v1575_v35 = vld [vmem:[%s2083_s9] ss:$0 sm:$0xff] }
 0x433   : > { %1689 = vmatprep.mubr.msk.bf16.mxu0 %vm1764_vm0, %v1763_v1  ;;  %1686 = vmatpush3.bf16.msra.mxu0 %v1729_v27 }
 0x434   : > { %1668 = vmatmul.mubr.msk.bf16.vlgmr.msra.gmra.mrb[12].mxu1 %vm957_vm5, %v955_v36  ;;  %1687 = vmatprep.subr.bf16.mxu0 %v1763_v1 }
 0x435   : > { %1681 = vmatprep.mubr.msk.bf16.mxu1 %vm1764_vm0, %v1763_v1  ;;  %1678 = vmatpush3.bf16.msra.mxu1 %v1727_v13 }
 0x436   : > { %1679 = vmatprep.subr.bf16.mxu1 %v1763_v1 }
 0x439   : > { %1680 = vmatpush3.bf16.msra.mxu1 %v1728_v55 }
 0x43a   : > { %1693 = vmatprep.subr.bf16.mxu1 %v1763_v1 }
 0x4dd   : > { %v999_v37 = vpop.f32.mrb[8].mxu1 }
 0x4de   : > { %v1657_v38 = vpop.f32.mrb[9].mxu1 }
 0x4df   : > { %v1002_v39 = vpop.f32.mrb[10].mxu1  ;;  %v1045_v40 = vpop.f32.mrb[12].mxu0 }
 0x4e0   : > { %v1658_v41 = vpop.f32.mrb[11].mxu1  ;;  %v1663_v42 = vpop.f32.mrb[13].mxu0 }
 0x4e1   : > { %v1048_v43 = vpop.f32.mrb[14].mxu0  ;;  %v1733_v41 = vld [vmem:[%s2081_s7 + $0x10] sm:$0xff]   ;;  %v1734_v42 = vld [vmem:[%s2081_s7 + $0x18] sm:$0xff]  }
 0x4e2   : > { %v1664_v7 = vpop.f32.mrb[15].mxu0  ;;  %v1577_v43 = vld [vmem:[%s2080_s6] ss:$0 sm:$0xff] }
 0x505   : > { %v1137_v11 = vpop.f32.mrb[16].mxu0 }
 0x506   : > { %v1151_v44 = vcombine.low %v1045_v40, %v1137_v11  ;;  %v1675_v45 = vpop.f32.mrb[17].mxu0 }
 0x507   : > { %v1091_v46 = vpop.f32.mrb[12].mxu1  ;;  %v1140_v47 = vpop.f32.mrb[18].mxu0 }
 0x508   : > { %v1143_v48 = vcombine.low %v999_v37, %v1091_v46  ;;  %v1669_v49 = vpop.f32.mrb[13].mxu1  ;;  %v1676_v50 = vpop.f32.mrb[19].mxu0  ;;  %v1158_v12 = vrot.slane %v1151_v44, %v1902_v22  ;;  %v1576_v37 = vld [vmem:[%s2084_s10] ss:$0 sm:$0xff] }
 0x509   : > { %v1094_v51 = vpop.f32.mrb[14].mxu1 }
 0x50a   : > { %v1150_v52 = vrot.slane %v1143_v48, %v1902_v22  ;;  %v1670_v53 = vpop.f32.mrb[15].mxu1 }
 0x50c   : > { %v1159_v54 = vcombine.low %v1150_v52, %v1158_v12 }
 0x50e   : > { %v1166_v56 = vrot.slane %v1159_v54, %v1908_v29 }
 0x510   : > { %v1174_v57 = vcombine.high %v1166_v56, %v1763_v1  ;;  %v1173_v58 = vrot.slane %v1166_v56, %v1902_v22 }
 0x512   : > { %v1181_v59 = vrot.slane %v1174_v57, %v1902_v22 }
 0x514   : > { %v1183_v60 = vcombine.high %v1173_v58, %v1181_v59  ;;  %v1182_v61 = vcombine.low %v1173_v58, %v1181_v59 }
 0x516   : > { %v1197_v62 = vrot.slane %v1183_v60, %v1908_v29  ;;  %v1190_v63 = vrot.slane %v1182_v61, %v1908_v29 }
 0x518   : > { %1205 = vrot.lane.b32.xlu1 %v1197_v62, %s1772_s15  ;;  %v1198_v0 = vcombine.high %v1190_v63, %v1763_v1  ;;  %v1199_v2 = vcombine.high %v1197_v62, %v1763_v1 }
 0x51a   : > { %1201 = vrot.lane.b32.xlu0 %v1198_v0, %s1773_s16 }
 0x51c   : > { %1209 = vrot.lane.b32.xlu1 %v1199_v2, %s1774_s17  ;;  %v1588_v2 = vld [vmem:[%s2086_s12] ss:$0 sm:$0xff] }
 0x58a   : > { %v1206_v4 = vpop.permute.xlu1 %1205 }
 0x58c   : > { %v1202_v5 = vpop.permute.xlu0 %1201 }
 0x58d   : > { %v1212_v22 = vsel %vm723_vm2, %v1190_v63, %v1202_v5  ;;  %v1587_v63 = vld [vmem:[%s2085_s11] ss:$0 sm:$0xff] }
 0x58e   : > { %v1210_v6 = vpop.permute.xlu1 %1209  ;;  %v1214_v8 = vsel %vm1213_vm6, %v1212_v22, %v1206_v4 }
 0x58f   : > { %v1216_v9 = vsel %vm1215_vm7, %v1214_v8, %v1210_v6 }
 0x590   : > { %v1217_v29 = vpack.c.bf16 %v1216_v9, %v1216_v9 }
 0x592   : > { %1682 = vmatmul.mubr.msk.bf16.vlgmr.msra.gmra.mrb[16].mxu1 %vm462_vm1, %v1217_v29 }
 0x593   : > { %1701 = vmatprep.mubr.msk.bf16.mxu1 %vm1764_vm0, %v1763_v1  ;;  %1694 = vmatpush3.bf16.msra.mxu1 %v1731_v28 }
 0x594   : > { %1695 = vmatprep.subr.bf16.mxu1 %v1763_v1 }
 0x597   : > { %1696 = vmatpush3.bf16.msra.mxu1 %v1732_v30 }
 0x598   : > { %1697 = vmatprep.subr.bf16.mxu1 %v1763_v1 }
 0x59b   : > { %1698 = vmatpush3.bf16.msra.mxu1 %v1733_v41 }
 0x59c   : > { %1699 = vmatprep.subr.bf16.mxu1 %v1763_v1  ;;  %v1581_v1 = vld [vmem:[%s2082_s8] ss:$0 sm:$0xff] }
 0x59f   : > { %1700 = vmatpush3.bf16.msra.mxu1 %v1734_v42 }
 0x665   : > { %v1278_v14 = vpop.f32.mrb[16].mxu1 }
 0x666   : > { %v1279_v15 = vadd.f32 %v1571_v10, %v1278_v14  ;;  %v1683_v16 = vpop.f32.mrb[17].mxu1 }
 0x667   : > { %v1281_v17 = vpop.f32.mrb[18].mxu1 }
 0x668   : > { %v1684_v18 = vpop.f32.mrb[19].mxu1  ;;  %v1284_v19 = vadd.f32 %v1279_v15, %v1875_v3  ;;  %v1730_v3 = vld [vmem:[%s2079_s5 + $0x8] sm:$0xff]  }
 0x669   : > { %1688 = vmatpush3.bf16.msra.mxu0 %v1730_v3 }
 0x66a   : > { %v1288_v20 = vsel %vm1287_vm8, %v1284_v19, 0.0 }
 0x66b   : > { %1289 = vadd.xlane.f32.xlu0 %v1288_v20 }
 0x6f8   : > { %v1290_v21 = vpop.xlane.xlu0 %1289 }
 0x6f9   : > { %v1292_v23 = vmul.f32 0.03125, %v1290_v21 }
 0x6fb   : > { %v1293_v24 = vsub.f32 %v1284_v19, %v1292_v23 }
 0x6fd   : > { %v1294_v25 = vmul.f32 %v1293_v24, %v1293_v24 }
 0x6ff   : > { %v1295_v26 = vsel %vm1287_vm8, %v1294_v25, 0.0 }
 0x700   : > { %1296 = vadd.xlane.f32.xlu1 %v1295_v26 }
 0x78d   : > { %v1297_v31 = vpop.xlane.xlu1 %1296 }
 0x78e   : > { %v1298_v32 = vmul.f32 0.03125, %v1297_v31 }
 0x790   : > { %v1299_v33 = vadd.f32 1e-05, %v1298_v32 }
 0x792   : > { %1751 = vrsqrt.f32 %v1299_v33 }
 0x79c   : > { %v1752_v34 = vpop.eup %1751 }
 0x79d   : > { %v1301_v36 = vmul.f32 %v1752_v34, %v1293_v24 }
 0x79f   : > { %v1308_v38 = vmul.f32 %v1575_v35, %v1301_v36 }
 0x7a1   : > { %v1315_v39 = vadd.f32 %v1576_v37, %v1308_v38 }
 0x7a3   : > { %v1316_v40 = vpack.c.bf16 %v1315_v39, %v1315_v39 }
 0x7a5   : > { %1690 = vmatmul.mubr.msk.bf16.vlgmr.msra.gmra.mrb[20].mxu0 %vm462_vm1, %v1316_v40 }
 0x878   : > { %v1377_v7 = vpop.f32.mrb[20].mxu0 }
 0x879   : > { %v1378_v11 = vadd.f32 %v1577_v43, %v1377_v7  ;;  %v1691_v44 = vpop.f32.mrb[21].mxu0 }
 0x87a   : > { %v1380_v45 = vpop.f32.mrb[22].mxu0 }
 0x87b   : > { %v1383_v46 = vmax.f32 %v1378_v11, 0.0  ;;  %v1692_v47 = vpop.f32.mrb[23].mxu0 }
 0x87d   : > { %v1384_v48 = vpack.c.bf16 %v1383_v46, %v1383_v46 }
 0x87f   : > { %1702 = vmatmul.mubr.msk.bf16.vlgmr.msra.gmra.mrb[20].mxu1 %vm1424_vm9, %v1384_v48 }
 0x952   : > { %v1462_v49 = vpop.f32.mrb[20].mxu1 }
 0x953   : > { %v1463_v50 = vadd.f32 %v1581_v1, %v1462_v49  ;;  %v1703_v51 = vpop.f32.mrb[21].mxu1 }
 0x954   : > { %v1465_v13 = vpop.f32.mrb[22].mxu1 }
 0x955   : > { %v1704_v12 = vpop.f32.mrb[23].mxu1  ;;  %v1468_v52 = vadd.f32 %v1463_v50, %v1315_v39 }
 0x957   : > { %v1471_v53 = vsel %vm1287_vm8, %v1468_v52, 0.0 }
 0x958   : > { %1472 = vadd.xlane.f32.xlu0 %v1471_v53 }
 0x9e5   : > { %v1473_v54 = vpop.xlane.xlu0 %1472 }
 0x9e6   : > { %v1474_v55 = vmul.f32 0.03125, %v1473_v54 }
 0x9e8   : > { %v1475_v56 = vsub.f32 %v1468_v52, %v1474_v55 }
 0x9ea   : > { %v1476_v57 = vmul.f32 %v1475_v56, %v1475_v56 }
 0x9ec   : > { %v1477_v58 = vsel %vm1287_vm8, %v1476_v57, 0.0 }
 0x9ed   : > { %1478 = vadd.xlane.f32.xlu0 %v1477_v58 }
 0xa7a   : > { %v1479_v59 = vpop.xlane.xlu0 %1478 }
 0xa7b   : > { %v1480_v60 = vmul.f32 0.03125, %v1479_v59 }
 0xa7d   : > { %v1481_v61 = vadd.f32 1e-05, %v1480_v60 }
 0xa7f   : > { %1753 = vrsqrt.f32 %v1481_v61 }
 0xa89   : > { %v1754_v62 = vpop.eup %1753 }
 0xa8a   : > { %v1483_v0 = vmul.f32 %v1754_v62, %v1475_v56 }
 0xa8c   : > { %v1490_v4 = vmul.f32 %v1587_v63, %v1483_v0 }
 0xa8e   : > { %v1497_v5 = vadd.f32 %v1588_v2, %v1490_v4 }
 0xa90   : > { %1498 = vst.msk [vmem:[%s435_s18] sm:$0x3] %vm1287_vm8, %v1497_v5 }
 0xa91 PF: > { %s23_s25 = sadd.s32 1, %s1761_s25  }
 0xa92   : > { %p20_p4 = scmp.ge.s32.totalorder %s23_s25, 4  }
 0xa94   :  { %22 = sbr.rel (!%p20_p4) target bundleno = 1 (0x1), region = 102 }

</bundles_post_ra>
